<compile_context>
chip_gen: v7x
topology: tpu7x:2x2x1
jax: 0.10.0
libtpu: 0.0.40
codegen_flags: <defaults>
</compile_context>

<pallas_src>
import functools

import jax
import jax.numpy as jnp
from jax import lax
from jax.experimental import pallas as pl
from jax.experimental.pallas import tpu as pltpu

SQRT_2_OVER_PI = 0.7978845608028654  # sqrt(2/pi)
LN_EPS = 1e-5                        # PyTorch nn.LayerNorm default


def _gelu_tanh(x):
    # Matches the module's custom GELU: 0.5*x*(1+tanh(sqrt(2/pi)*(x+0.044715*x^3)))
    return 0.5 * x * (1.0 + jnp.tanh(SQRT_2_OVER_PI * (x + 0.044715 * x * x * x)))


def _layernorm(x, gamma, beta):
    # x: (R, C), normalize over last axis in f32. gamma/beta: (1, C).
    mean = jnp.mean(x, axis=-1, keepdims=True)
    xc = x - mean
    var = jnp.mean(xc * xc, axis=-1, keepdims=True)
    return xc * lax.rsqrt(var + LN_EPS) * gamma + beta


def mixer_block_kernel(
    x_ref,                        # (rows, D) f32, rows = bt*N
    ln1_g_ref, ln1_b_ref,         # (1, D) f32
    tok_w1_ref, tok_b1_ref,       # (N, Tt) cdtype, (1, Tt) f32
    tok_w2_ref, tok_b2_ref,       # (Tt, N) cdtype, (N, 1) f32
    ln2_g_ref, ln2_b_ref,         # (1, D) f32
    ch_w1_ref, ch_b1_ref,         # (D, tcb) cdtype, (1, tcb) f32
    ch_w2_ref, ch_b2_ref,         # (tcb, D) cdtype, (1, D) f32
    o_ref,                        # (rows, D) f32
    x1_ref,                       # scratch (rows, D) f32: residual / y2 accumulator
    xln2_ref,                     # scratch (rows, D) cdtype: LN2(x1)
    *, bt, n, compute_dtype,
):
    j = pl.program_id(1)          # channel-hidden (Tc) tile index

    # ---- token mixing + LN2: once per batch block (first Tc step) ----
    @pl.when(j == 0)
    def _token_mix():
        x = x_ref[...]                                                 # f32
        x_ln = _layernorm(x, ln1_g_ref[...], ln1_b_ref[...]).astype(compute_dtype)
        w1 = tok_w1_ref[...]
        b1 = tok_b1_ref[...]
        w2 = tok_w2_ref[...]
        b2 = tok_b2_ref[...]
        for b in range(bt):                    # static unroll; bt is small
            lo = b * n
            xb = x_ln[lo:lo + n, :]                                    # (N, D)
            # contract over N: (N,D) x (N,Tt) -> (D,Tt), no explicit transpose
            h = lax.dot_general(xb, w1, (((0,), (0,)), ((), ())),
                                preferred_element_type=jnp.float32)
            h = _gelu_tanh(h + b1).astype(compute_dtype)               # (D, Tt)
            # contract over Tt: (Tt,N) x (D,Tt) -> (N,D), already in (N,D)
            y = lax.dot_general(w2, h, (((0,), (1,)), ((), ())),
                                preferred_element_type=jnp.float32)
            x1_ref[lo:lo + n, :] = x[lo:lo + n, :] + y + b2            # residual
        x1 = x1_ref[...]
        xln2_ref[...] = _layernorm(x1, ln2_g_ref[...], ln2_b_ref[...]
                                   ).astype(compute_dtype)
        # Seed the channel-mixing accumulator (residual + final bias, once).
        x1_ref[...] = x1 + ch_b2_ref[...]

    # ---- channel mixing: one Tc tile per grid step, accumulate into x1_ref ----
    h2 = jnp.dot(xln2_ref[...], ch_w1_ref[...],
                 preferred_element_type=jnp.float32)                   # (rows, tcb)
    h2 = _gelu_tanh(h2 + ch_b1_ref[...]).astype(compute_dtype)
    x1_ref[...] = x1_ref[...] + jnp.dot(h2, ch_w2_ref[...],
                                        preferred_element_type=jnp.float32)

    @pl.when(j == pl.num_programs(1) - 1)
    def _finalize():
        o_ref[...] = x1_ref[...]


def _vmem_capacity_bytes():
    try:
        return int(pltpu.get_tpu_info().vmem_capacity_bytes)
    except Exception:
        return 64 * 1024 * 1024   # conservative: v7x per-TensorCore VMEM


def _vmem_bytes_estimate(rows, d, n, tt, tcb, cs):
    """Explicit buffer inventory for one grid step (conservative)."""
    f32 = 4
    b = 2 * 2 * rows * d * f32                               # x in + out, double-buffered f32
    b += rows * d * (f32 + cs)                                # scratches: x1 acc + LN2 act
    b += 2 * (2 * n * tt * cs + (tt + n + 5 * d) * f32)       # token weights + LN/bias params
    b += 2 * (2 * d * tcb * cs + tcb * f32)                   # channel weight tile (dbl-buffered)
    # live temporaries: x, x_ln, h (D,Tt), h2 (rows,tcb), y2 partial
    b += rows * d * (f32 + cs) + d * tt * (f32 + cs) + rows * tcb * (f32 + cs) + rows * d * f32
    return b + (1 << 20)                                      # fixed compiler slack


def _select_tiling(batch, n, d, tt, tc, cs, budget):
    # >= 2 grid steps along the batch axis so in/out DMAs overlap compute;
    # >= 4 when possible so both v7x TensorCores still get >= 2 steps each.
    min_steps = 4 if batch >= 4 else (2 if batch >= 2 else 1)
    bts = [b for b in range(1, batch + 1)
           if batch % b == 0 and batch // b >= min_steps and (b * n) % 8 == 0]
    if not bts:
        bts = [b for b in range(1, batch + 1)
               if batch % b == 0 and (b * n) % 8 == 0] or [batch]
    tcs = [tc]
    t = tc
    while t % 2 == 0 and (t // 2) % 128 == 0:
        t //= 2
        tcs.append(t)
    for bt in sorted(bts, reverse=True):
        for tcb in tcs:
            if _vmem_bytes_estimate(bt * n, d, n, tt, tcb, cs) <= budget:
                return bt, tcb
    return min(bts), tcs[-1]


def mixer_block(x, params, *, block_b=None, tc_block=None,
                compute_dtype=jnp.bfloat16):
    """x: (B, N, D) float32. params: dict (see init_params).

    Best performance when D, Tt, Tc are multiples of 256 (v6e/v7x MXU) and N
    is a multiple of 8.
    """
    B, N, D = x.shape
    Tt = params["tok_w1"].shape[1]
    Tc = params["ch_w1"].shape[1]
    cs = jnp.dtype(compute_dtype).itemsize

    capacity = _vmem_capacity_bytes()
    # Ask for ~82% of this generation's VMEM (v5e/v6e: ~105 of 128 MiB,
    # v7x: ~52 of 64 MiB/TC); leave the rest for compiler scratch/semaphores.
    vmem_limit = int(capacity * 0.82)
    budget = int(vmem_limit * 0.9)

    auto_bt, auto_tcb = _select_tiling(B, N, D, Tt, Tc, cs, budget)
    bt = block_b if block_b is not None else auto_bt
    tcb = tc_block if tc_block is not None else auto_tcb
    assert B % bt == 0, "block_b must divide batch"
    assert Tc % tcb == 0, "tc_block must divide channel_dim"
    assert tcb == Tc or tcb % 128 == 0, "tc_block must be a multiple of 128 (or Tc)"
    rows = bt * N
    n_tc = Tc // tcb

    # Pre-cast matmul weights to the compute dtype (halves weight DMA + VMEM).
    tok_w1 = params["tok_w1"].astype(compute_dtype)
    tok_w2 = params["tok_w2"].astype(compute_dtype)
    ch_w1 = params["ch_w1"].astype(compute_dtype)
    ch_w2 = params["ch_w2"].astype(compute_dtype)

    # (B, N, D) -> (B*N, D): free row-major reshape, lane-dense 2-D blocks.
    xf = x.reshape(B * N, D).astype(jnp.float32)

    kernel = functools.partial(mixer_block_kernel, bt=bt, n=N,
                               compute_dtype=compute_dtype)

    def _build(single_buffer):
        def const_spec(shape, imap):
            if single_buffer:
                return pl.BlockSpec(shape, imap, pipeline_mode=pl.Buffered(1))
            return pl.BlockSpec(shape, imap)

        zero = lambda i, j: (0, 0)
        if n_tc == 1:
            # Constant-index channel weights: single-bufferable.
            cw1_spec = const_spec((D, tcb), zero)
            cb1_spec = const_spec((1, tcb), zero)
            cw2_spec = const_spec((tcb, D), zero)
        else:
            # Streamed along the Tc axis: keep default double-buffering.
            cw1_spec = pl.BlockSpec((D, tcb), lambda i, j: (0, j))
            cb1_spec = pl.BlockSpec((1, tcb), lambda i, j: (0, j))
            cw2_spec = pl.BlockSpec((tcb, D), lambda i, j: (j, 0))

        in_specs = [
            pl.BlockSpec((rows, D), lambda i, j: (i, 0)),          # x block
            const_spec((1, D), zero), const_spec((1, D), zero),    # ln1 gamma/beta
            const_spec((N, Tt), zero), const_spec((1, Tt), zero),  # token W1^T, b1
            const_spec((Tt, N), zero), const_spec((N, 1), zero),   # token W2^T, b2
            const_spec((1, D), zero), const_spec((1, D), zero),    # ln2 gamma/beta
            cw1_spec, cb1_spec, cw2_spec,                          # channel W1^T, b1, W2^T
            const_spec((1, D), zero),                              # channel b2
        ]
        out_spec = pl.BlockSpec((rows, D), lambda i, j: (i, 0))

        return pl.pallas_call(
            kernel,
            out_shape=jax.ShapeDtypeStruct((B * N, D), jnp.float32),
            grid_spec=pltpu.PrefetchScalarGridSpec(
                num_scalar_prefetch=0,
                grid=(B // bt, n_tc),
                in_specs=in_specs,
                out_specs=out_spec,
                scratch_shapes=[
                    pltpu.VMEM((rows, D), jnp.float32),    # x1 residual / y2 accumulator
                    pltpu.VMEM((rows, D), compute_dtype),  # LN2 activations
                ],
            ),
            compiler_params=pltpu.CompilerParams(
                dimension_semantics=("parallel", "arbitrary"),
                vmem_limit_bytes=vmem_limit),
        )

    args = (xf,
            params["ln1_g"], params["ln1_b"],
            tok_w1, params["tok_b1"], tok_w2, params["tok_b2"],
            params["ln2_g"], params["ln2_b"],
            ch_w1, params["ch_b1"], ch_w2, params["ch_b2"])

    if hasattr(pl, "Buffered"):
        try:
            out = _build(True)(*args)
        except (TypeError, ValueError, NotImplementedError,
                pltpu.LoweringException):
            # Only pipeline_mode=Buffered(1) incompatibilities are retried;
            # VMEM OOM / runtime errors propagate unmasked.
            out = _build(False)(*args)
    else:
        out = _build(False)(*args)
    return out.reshape(B, N, D)


def init_params(key, dim, num_patch, token_dim, channel_dim):
    """Deterministic synthetic params. Linear weights stored as (in, out)."""
    ks = jax.random.split(key, 8)
    s = 0.02
    return {
        "ln1_g": jnp.ones((1, dim), jnp.float32),
        "ln1_b": jnp.zeros((1, dim), jnp.float32),
        "tok_w1": s * jax.random.normal(ks[0], (num_patch, token_dim), jnp.float32),
        "tok_b1": s * jax.random.normal(ks[1], (1, token_dim), jnp.float32),
        "tok_w2": s * jax.random.normal(ks[2], (token_dim, num_patch), jnp.float32),
        "tok_b2": s * jax.random.normal(ks[3], (num_patch, 1), jnp.float32),
        "ln2_g": jnp.ones((1, dim), jnp.float32),
        "ln2_b": jnp.zeros((1, dim), jnp.float32),
        "ch_w1": s * jax.random.normal(ks[4], (dim, channel_dim), jnp.float32),
        "ch_b1": s * jax.random.normal(ks[5], (1, channel_dim), jnp.float32),
        "ch_w2": s * jax.random.normal(ks[6], (channel_dim, dim), jnp.float32),
        "ch_b2": s * jax.random.normal(ks[7], (1, dim), jnp.float32),
    }


def mixer_block_ref(x, p):
    """Pure-JAX f32 reference matching the PyTorch forward (dropout=0 => no-op)."""
    def ln(x, g, b):
        mu = jnp.mean(x, -1, keepdims=True)
        var = jnp.mean((x - mu) ** 2, -1, keepdims=True)
        return (x - mu) * lax.rsqrt(var + LN_EPS) * g + b

    y = ln(x, p["ln1_g"], p["ln1_b"])            # (B,N,D)
    y = jnp.swapaxes(y, 1, 2)                    # (B,D,N)
    y = _gelu_tanh(y @ p["tok_w1"] + p["tok_b1"])
    y = y @ p["tok_w2"] + p["tok_b2"][:, 0]      # bias along last (N) axis
    y = jnp.swapaxes(y, 1, 2)                    # (B,N,D)
    x = x + y
    y = ln(x, p["ln2_g"], p["ln2_b"])
    y = _gelu_tanh(y @ p["ch_w1"] + p["ch_b1"])
    y = y @ p["ch_w2"] + p["ch_b2"]
    return x + y


if __name__ == "__main__":
    # Small but TPU-friendly shapes; matmul dims are multiples of 256
    # (v6e/v7x MXU tiles), N a multiple of 8.
    B, N, D = 4, 8, 256          # batch, num_patch, dim
    token_dim, channel_dim = 256, 512

    key = jax.random.PRNGKey(0)
    kx, kp = jax.random.split(key)
    x = jax.random.normal(kx, (B, N, D), jnp.float32)
    params = init_params(kp, D, N, token_dim, channel_dim)

    ref = mixer_block_ref(x, params)

    # 1) f32 MXU path, auto tiling (grid >= 4 batch steps, Tc untiled): strict.
    out_f32 = jax.block_until_ready(
        mixer_block(x, params, compute_dtype=jnp.float32))
    assert out_f32.shape == (B, N, D)
    err32 = float(jnp.max(jnp.abs(out_f32 - ref)))
    assert jnp.allclose(out_f32, ref, atol=1e-5, rtol=1e-5), err32

    # 2) bf16 MXU path with explicit batch blocking and Tc tiling
    #    (exercises the (parallel, arbitrary) 2-D grid accumulator).
    out_bf16 = jax.block_until_ready(
        mixer_block(x, params, block_b=2, tc_block=256))
    err16 = float(jnp.max(jnp.abs(out_bf16 - ref)))
    assert jnp.allclose(out_bf16, ref, atol=5e-2, rtol=5e-2), err16

    print("KERNEL_OK")
</pallas_src>

<mosaic_0001>
module attributes {stable_mosaic.version = 11 : i64} {
  func.func @mixer_block_kernel(%arg0: i32, %arg1: i32, %arg2: memref<8x256xf32, #tpu.memory_space<vmem>>, %arg3: memref<1x256xf32, #tpu.memory_space<vmem>>, %arg4: memref<1x256xf32, #tpu.memory_space<vmem>>, %arg5: memref<8x256xf32, #tpu.memory_space<vmem>>, %arg6: memref<1x256xf32, #tpu.memory_space<vmem>>, %arg7: memref<256x8xf32, #tpu.memory_space<vmem>>, %arg8: memref<8x1xf32, #tpu.memory_space<vmem>>, %arg9: memref<1x256xf32, #tpu.memory_space<vmem>>, %arg10: memref<1x256xf32, #tpu.memory_space<vmem>>, %arg11: memref<256x512xf32, #tpu.memory_space<vmem>>, %arg12: memref<1x512xf32, #tpu.memory_space<vmem>>, %arg13: memref<512x256xf32, #tpu.memory_space<vmem>>, %arg14: memref<1x256xf32, #tpu.memory_space<vmem>>, %arg15: memref<8x256xf32, #tpu.memory_space<vmem>>, %arg16: memref<8x256xf32, #tpu.memory_space<vmem>>, %arg17: memref<8x256xf32, #tpu.memory_space<vmem>>) attributes {dimension_semantics = [#tpu.dimension_semantics<parallel>, #tpu.dimension_semantics<arbitrary>], iteration_bounds = array<i64: 4, 1>, scalar_prefetch = 0 : i64, scratch_operands = 2 : i64, tpu.core_type = #tpu.core_type<tc>, window_params = [{transform_indices = @transform_0, window_bounds = array<i64: 8, 256>}, {pipeline_mode = #tpu.pipeline_mode<synchronous>, transform_indices = @transform_1, window_bounds = array<i64: 1, 256>}, {pipeline_mode = #tpu.pipeline_mode<synchronous>, transform_indices = @transform_2, window_bounds = array<i64: 1, 256>}, {pipeline_mode = #tpu.pipeline_mode<synchronous>, transform_indices = @transform_3, window_bounds = array<i64: 8, 256>}, {pipeline_mode = #tpu.pipeline_mode<synchronous>, transform_indices = @transform_4, window_bounds = array<i64: 1, 256>}, {pipeline_mode = #tpu.pipeline_mode<synchronous>, transform_indices = @transform_5, window_bounds = array<i64: 256, 8>}, {pipeline_mode = #tpu.pipeline_mode<synchronous>, transform_indices = @transform_6, window_bounds = array<i64: 8, 1>}, {pipeline_mode = #tpu.pipeline_mode<synchronous>, transform_indices = @transform_7, window_bounds = array<i64: 1, 256>}, {pipeline_mode = #tpu.pipeline_mode<synchronous>, transform_indices = @transform_8, window_bounds = array<i64: 1, 256>}, {pipeline_mode = #tpu.pipeline_mode<synchronous>, transform_indices = @transform_9, window_bounds = array<i64: 256, 512>}, {pipeline_mode = #tpu.pipeline_mode<synchronous>, transform_indices = @transform_10, window_bounds = array<i64: 1, 512>}, {pipeline_mode = #tpu.pipeline_mode<synchronous>, transform_indices = @transform_11, window_bounds = array<i64: 512, 256>}, {pipeline_mode = #tpu.pipeline_mode<synchronous>, transform_indices = @transform_12, window_bounds = array<i64: 1, 256>}, {transform_indices = @transform_13, window_bounds = array<i64: 8, 256>}]} {
    %c0_i32 = arith.constant 0 : i32
    %0 = arith.cmpi eq, %arg1, %c0_i32 : i32
    %1 = arith.extui %0 : i1 to i32
    %c0_i32_0 = arith.constant 0 : i32
    %2 = arith.cmpi ne, %1, %c0_i32_0 : i32
    scf.if %2 {
      %c0_19 = arith.constant 0 : index
      %c0_20 = arith.constant 0 : index
      %30 = vector.load %arg2[%c0_19, %c0_20] : memref<8x256xf32, #tpu.memory_space<vmem>>, vector<8x256xf32>
      %c0_21 = arith.constant 0 : index
      %c0_22 = arith.constant 0 : index
      %31 = vector.load %arg3[%c0_21, %c0_22] : memref<1x256xf32, #tpu.memory_space<vmem>>, vector<1x256xf32>
      %c0_23 = arith.constant 0 : index
      %c0_24 = arith.constant 0 : index
      %32 = vector.load %arg4[%c0_23, %c0_24] : memref<1x256xf32, #tpu.memory_space<vmem>>, vector<1x256xf32>
      %cst_25 = arith.constant dense<0.000000e+00> : vector<8xf32>
      %33 = vector.multi_reduction <add>, %30, %cst_25 [1] : vector<8x256xf32> to vector<8xf32>
      %34 = vector.shape_cast %33 : vector<8xf32> to vector<8x1xf32>
      %cst_26 = arith.constant 2.560000e+02 : f32
      %35 = vector.broadcast %cst_26 : f32 to vector<8x1xf32>
      %36 = arith.divf %34, %35 : vector<8x1xf32>
      %37 = vector.broadcast %36 : vector<8x1xf32> to vector<8x256xf32>
      %38 = arith.subf %30, %37 : vector<8x256xf32>
      %39 = arith.mulf %38, %38 : vector<8x256xf32>
      %cst_27 = arith.constant dense<0.000000e+00> : vector<8xf32>
      %40 = vector.multi_reduction <add>, %39, %cst_27 [1] : vector<8x256xf32> to vector<8xf32>
      %41 = vector.shape_cast %40 : vector<8xf32> to vector<8x1xf32>
      %cst_28 = arith.constant 2.560000e+02 : f32
      %42 = vector.broadcast %cst_28 : f32 to vector<8x1xf32>
      %43 = arith.divf %41, %42 : vector<8x1xf32>
      %cst_29 = arith.constant 9.99999974E-6 : f32
      %44 = vector.broadcast %cst_29 : f32 to vector<8x1xf32>
      %45 = arith.addf %43, %44 : vector<8x1xf32>
      %46 = math.rsqrt %45 : vector<8x1xf32>
      %47 = vector.broadcast %46 : vector<8x1xf32> to vector<8x256xf32>
      %48 = arith.mulf %38, %47 : vector<8x256xf32>
      %49 = vector.broadcast %31 : vector<1x256xf32> to vector<8x256xf32>
      %50 = arith.mulf %48, %49 : vector<8x256xf32>
      %51 = vector.broadcast %32 : vector<1x256xf32> to vector<8x256xf32>
      %52 = arith.addf %50, %51 : vector<8x256xf32>
      %c0_30 = arith.constant 0 : index
      %c0_31 = arith.constant 0 : index
      %53 = vector.load %arg5[%c0_30, %c0_31] : memref<8x256xf32, #tpu.memory_space<vmem>>, vector<8x256xf32>
      %c0_32 = arith.constant 0 : index
      %c0_33 = arith.constant 0 : index
      %54 = vector.load %arg6[%c0_32, %c0_33] : memref<1x256xf32, #tpu.memory_space<vmem>>, vector<1x256xf32>
      %c0_34 = arith.constant 0 : index
      %c0_35 = arith.constant 0 : index
      %55 = vector.load %arg7[%c0_34, %c0_35] : memref<256x8xf32, #tpu.memory_space<vmem>>, vector<256x8xf32>
      %c0_36 = arith.constant 0 : index
      %c0_37 = arith.constant 0 : index
      %56 = vector.load %arg8[%c0_36, %c0_37] : memref<8x1xf32, #tpu.memory_space<vmem>>, vector<8x1xf32>
      %cst_38 = arith.constant dense<0.000000e+00> : vector<256x256xf32>
      %57 = tpu.matmul %52, %53, %cst_38 {dimension_numbers = #tpu.dot_dimension_numbers<[0], [0], [1], [1], [0, 1, 1, 1], [], []>} : vector<8x256xf32>, vector<8x256xf32>, vector<256x256xf32> -> vector<256x256xf32>
      %58 = vector.broadcast %54 : vector<1x256xf32> to vector<256x256xf32>
      %59 = arith.addf %57, %58 : vector<256x256xf32>
      %cst_39 = arith.constant 5.000000e-01 : f32
      %60 = vector.broadcast %cst_39 : f32 to vector<256x256xf32>
      %61 = arith.mulf %60, %59 : vector<256x256xf32>
      %cst_40 = arith.constant 4.471500e-02 : f32
      %62 = vector.broadcast %cst_40 : f32 to vector<256x256xf32>
      %63 = arith.mulf %62, %59 : vector<256x256xf32>
      %64 = arith.mulf %63, %59 : vector<256x256xf32>
      %65 = arith.mulf %64, %59 : vector<256x256xf32>
      %66 = arith.addf %59, %65 : vector<256x256xf32>
      %cst_41 = arith.constant 0.797884583 : f32
      %67 = vector.broadcast %cst_41 : f32 to vector<256x256xf32>
      %68 = arith.mulf %67, %66 : vector<256x256xf32>
      %69 = math.tanh %68 : vector<256x256xf32>
      %cst_42 = arith.constant 1.000000e+00 : f32
      %70 = vector.broadcast %cst_42 : f32 to vector<256x256xf32>
      %71 = arith.addf %70, %69 : vector<256x256xf32>
      %72 = arith.mulf %61, %71 : vector<256x256xf32>
      %cst_43 = arith.constant dense<0.000000e+00> : vector<8x256xf32>
      %73 = tpu.matmul %55, %72, %cst_43 {dimension_numbers = #tpu.dot_dimension_numbers<[0], [1], [1], [0], [0, 1, 1, 0], [], []>} : vector<256x8xf32>, vector<256x256xf32>, vector<8x256xf32> -> vector<8x256xf32>
      %74 = arith.addf %30, %73 : vector<8x256xf32>
      %75 = vector.broadcast %56 : vector<8x1xf32> to vector<8x256xf32>
      %76 = arith.addf %74, %75 : vector<8x256xf32>
      %c0_44 = arith.constant 0 : index
      %c0_45 = arith.constant 0 : index
      %77 = vector.load %arg16[%c0_44, %c0_45] : memref<8x256xf32, #tpu.memory_space<vmem>>, vector<8x256xf32>
      tpu.vector_store %arg16[%c0_44, %c0_45], %76 {strides = array<i32>} : memref<8x256xf32, #tpu.memory_space<vmem>>, vector<8x256xf32>,
      %c0_46 = arith.constant 0 : index
      %c0_47 = arith.constant 0 : index
      %78 = vector.load %arg16[%c0_46, %c0_47] : memref<8x256xf32, #tpu.memory_space<vmem>>, vector<8x256xf32>
      %c0_48 = arith.constant 0 : index
      %c0_49 = arith.constant 0 : index
      %79 = vector.load %arg9[%c0_48, %c0_49] : memref<1x256xf32, #tpu.memory_space<vmem>>, vector<1x256xf32>
      %c0_50 = arith.constant 0 : index
      %c0_51 = arith.constant 0 : index
      %80 = vector.load %arg10[%c0_50, %c0_51] : memref<1x256xf32, #tpu.memory_space<vmem>>, vector<1x256xf32>
      %cst_52 = arith.constant dense<0.000000e+00> : vector<8xf32>
      %81 = vector.multi_reduction <add>, %78, %cst_52 [1] : vector<8x256xf32> to vector<8xf32>
      %82 = vector.shape_cast %81 : vector<8xf32> to vector<8x1xf32>
      %cst_53 = arith.constant 2.560000e+02 : f32
      %83 = vector.broadcast %cst_53 : f32 to vector<8x1xf32>
      %84 = arith.divf %82, %83 : vector<8x1xf32>
      %85 = vector.broadcast %84 : vector<8x1xf32> to vector<8x256xf32>
      %86 = arith.subf %78, %85 : vector<8x256xf32>
      %87 = arith.mulf %86, %86 : vector<8x256xf32>
      %cst_54 = arith.constant dense<0.000000e+00> : vector<8xf32>
      %88 = vector.multi_reduction <add>, %87, %cst_54 [1] : vector<8x256xf32> to vector<8xf32>
      %89 = vector.shape_cast %88 : vector<8xf32> to vector<8x1xf32>
      %cst_55 = arith.constant 2.560000e+02 : f32
      %90 = vector.broadcast %cst_55 : f32 to vector<8x1xf32>
      %91 = arith.divf %89, %90 : vector<8x1xf32>
      %cst_56 = arith.constant 9.99999974E-6 : f32
      %92 = vector.broadcast %cst_56 : f32 to vector<8x1xf32>
      %93 = arith.addf %91, %92 : vector<8x1xf32>
      %94 = math.rsqrt %93 : vector<8x1xf32>
      %95 = vector.broadcast %94 : vector<8x1xf32> to vector<8x256xf32>
      %96 = arith.mulf %86, %95 : vector<8x256xf32>
      %97 = vector.broadcast %79 : vector<1x256xf32> to vector<8x256xf32>
      %98 = arith.mulf %96, %97 : vector<8x256xf32>
      %99 = vector.broadcast %80 : vector<1x256xf32> to vector<8x256xf32>
      %100 = arith.addf %98, %99 : vector<8x256xf32>
      %c0_57 = arith.constant 0 : index
      %c0_58 = arith.constant 0 : index
      %101 = vector.load %arg17[%c0_57, %c0_58] : memref<8x256xf32, #tpu.memory_space<vmem>>, vector<8x256xf32>
      tpu.vector_store %arg17[%c0_57, %c0_58], %100 {strides = array<i32>} : memref<8x256xf32, #tpu.memory_space<vmem>>, vector<8x256xf32>,
      %c0_59 = arith.constant 0 : index
      %c0_60 = arith.constant 0 : index
      %102 = vector.load %arg14[%c0_59, %c0_60] : memref<1x256xf32, #tpu.memory_space<vmem>>, vector<1x256xf32>
      %103 = vector.broadcast %102 : vector<1x256xf32> to vector<8x256xf32>
      %104 = arith.addf %78, %103 : vector<8x256xf32>
      %c0_61 = arith.constant 0 : index
      %c0_62 = arith.constant 0 : index
      %105 = vector.load %arg16[%c0_61, %c0_62] : memref<8x256xf32, #tpu.memory_space<vmem>>, vector<8x256xf32>
      tpu.vector_store %arg16[%c0_61, %c0_62], %104 {strides = array<i32>} : memref<8x256xf32, #tpu.memory_space<vmem>>, vector<8x256xf32>,
    } else {
    }
    %c0 = arith.constant 0 : index
    %c0_1 = arith.constant 0 : index
    %3 = vector.load %arg17[%c0, %c0_1] : memref<8x256xf32, #tpu.memory_space<vmem>>, vector<8x256xf32>
    %c0_2 = arith.constant 0 : index
    %c0_3 = arith.constant 0 : index
    %4 = vector.load %arg11[%c0_2, %c0_3] : memref<256x512xf32, #tpu.memory_space<vmem>>, vector<256x512xf32>
    %cst = arith.constant dense<0.000000e+00> : vector<8x512xf32>
    %5 = tpu.matmul %3, %4, %cst {dimension_numbers = #tpu.dot_dimension_numbers<[1], [0], [0], [1], [0, 0, 1, 1], [], []>} : vector<8x256xf32>, vector<256x512xf32>, vector<8x512xf32> -> vector<8x512xf32>
    %c0_4 = arith.constant 0 : index
    %c0_5 = arith.constant 0 : index
    %6 = vector.load %arg12[%c0_4, %c0_5] : memref<1x512xf32, #tpu.memory_space<vmem>>, vector<1x512xf32>
    %7 = vector.broadcast %6 : vector<1x512xf32> to vector<8x512xf32>
    %8 = arith.addf %5, %7 : vector<8x512xf32>
    %cst_6 = arith.constant 5.000000e-01 : f32
    %9 = vector.broadcast %cst_6 : f32 to vector<8x512xf32>
    %10 = arith.mulf %9, %8 : vector<8x512xf32>
    %cst_7 = arith.constant 4.471500e-02 : f32
    %11 = vector.broadcast %cst_7 : f32 to vector<8x512xf32>
    %12 = arith.mulf %11, %8 : vector<8x512xf32>
    %13 = arith.mulf %12, %8 : vector<8x512xf32>
    %14 = arith.mulf %13, %8 : vector<8x512xf32>
    %15 = arith.addf %8, %14 : vector<8x512xf32>
    %cst_8 = arith.constant 0.797884583 : f32
    %16 = vector.broadcast %cst_8 : f32 to vector<8x512xf32>
    %17 = arith.mulf %16, %15 : vector<8x512xf32>
    %18 = math.tanh %17 : vector<8x512xf32>
    %cst_9 = arith.constant 1.000000e+00 : f32
    %19 = vector.broadcast %cst_9 : f32 to vector<8x512xf32>
    %20 = arith.addf %19, %18 : vector<8x512xf32>
    %21 = arith.mulf %10, %20 : vector<8x512xf32>
    %c0_10 = arith.constant 0 : index
    %c0_11 = arith.constant 0 : index
    %22 = vector.load %arg16[%c0_10, %c0_11] : memref<8x256xf32, #tpu.memory_space<vmem>>, vector<8x256xf32>
    %c0_12 = arith.constant 0 : index
    %c0_13 = arith.constant 0 : index
    %23 = vector.load %arg13[%c0_12, %c0_13] : memref<512x256xf32, #tpu.memory_space<vmem>>, vector<512x256xf32>
    %cst_14 = arith.constant dense<0.000000e+00> : vector<8x256xf32>
    %24 = tpu.matmul %21, %23, %cst_14 {dimension_numbers = #tpu.dot_dimension_numbers<[1], [0], [0], [1], [0, 0, 1, 1], [], []>} : vector<8x512xf32>, vector<512x256xf32>, vector<8x256xf32> -> vector<8x256xf32>
    %25 = arith.addf %22, %24 : vector<8x256xf32>
    %c0_15 = arith.constant 0 : index
    %c0_16 = arith.constant 0 : index
    %26 = vector.load %arg16[%c0_15, %c0_16] : memref<8x256xf32, #tpu.memory_space<vmem>>, vector<8x256xf32>
    tpu.vector_store %arg16[%c0_15, %c0_16], %25 {strides = array<i32>} : memref<8x256xf32, #tpu.memory_space<vmem>>, vector<8x256xf32>,
    %c0_i32_17 = arith.constant 0 : i32
    %27 = arith.cmpi eq, %arg1, %c0_i32_17 : i32
    %28 = arith.extui %27 : i1 to i32
    %c0_i32_18 = arith.constant 0 : i32
    %29 = arith.cmpi ne, %28, %c0_i32_18 : i32
    scf.if %29 {
      %c0_19 = arith.constant 0 : index
      %c0_20 = arith.constant 0 : index
      %30 = vector.load %arg16[%c0_19, %c0_20] : memref<8x256xf32, #tpu.memory_space<vmem>>, vector<8x256xf32>
      %c0_21 = arith.constant 0 : index
      %c0_22 = arith.constant 0 : index
      %31 = vector.load %arg15[%c0_21, %c0_22] : memref<8x256xf32, #tpu.memory_space<vmem>>, vector<8x256xf32>
      tpu.vector_store %arg15[%c0_21, %c0_22], %30 {strides = array<i32>} : memref<8x256xf32, #tpu.memory_space<vmem>>, vector<8x256xf32>,
    } else {
    }
    return
  }
  func.func @transform_0(%arg0: i32, %arg1: i32) -> (i32, i32) {
    %c0_i32 = arith.constant 0 : i32
    %c0_i32_0 = arith.constant 0 : i32
    return %arg0, %c0_i32 : i32, i32
  }
  func.func @transform_1(%arg0: i32, %arg1: i32) -> (i32, i32) {
    %c0_i32 = arith.constant 0 : i32
    %c0_i32_0 = arith.constant 0 : i32
    %c0_i32_1 = arith.constant 0 : i32
    return %c0_i32, %c0_i32_0 : i32, i32
  }
  func.func @transform_2(%arg0: i32, %arg1: i32) -> (i32, i32) {
    %c0_i32 = arith.constant 0 : i32
    %c0_i32_0 = arith.constant 0 : i32
    %c0_i32_1 = arith.constant 0 : i32
    return %c0_i32, %c0_i32_0 : i32, i32
  }
  func.func @transform_3(%arg0: i32, %arg1: i32) -> (i32, i32) {
    %c0_i32 = arith.constant 0 : i32
    %c0_i32_0 = arith.constant 0 : i32
    %c0_i32_1 = arith.constant 0 : i32
    return %c0_i32, %c0_i32_0 : i32, i32
  }
  func.func @transform_4(%arg0: i32, %arg1: i32) -> (i32, i32) {
    %c0_i32 = arith.constant 0 : i32
    %c0_i32_0 = arith.constant 0 : i32
    %c0_i32_1 = arith.constant 0 : i32
    return %c0_i32, %c0_i32_0 : i32, i32
  }
  func.func @transform_5(%arg0: i32, %arg1: i32) -> (i32, i32) {
    %c0_i32 = arith.constant 0 : i32
    %c0_i32_0 = arith.constant 0 : i32
    %c0_i32_1 = arith.constant 0 : i32
    return %c0_i32, %c0_i32_0 : i32, i32
  }
  func.func @transform_6(%arg0: i32, %arg1: i32) -> (i32, i32) {
    %c0_i32 = arith.constant 0 : i32
    %c0_i32_0 = arith.constant 0 : i32
    %c0_i32_1 = arith.constant 0 : i32
    return %c0_i32, %c0_i32_0 : i32, i32
  }
  func.func @transform_7(%arg0: i32, %arg1: i32) -> (i32, i32) {
    %c0_i32 = arith.constant 0 : i32
    %c0_i32_0 = arith.constant 0 : i32
    %c0_i32_1 = arith.constant 0 : i32
    return %c0_i32, %c0_i32_0 : i32, i32
  }
  func.func @transform_8(%arg0: i32, %arg1: i32) -> (i32, i32) {
    %c0_i32 = arith.constant 0 : i32
    %c0_i32_0 = arith.constant 0 : i32
    %c0_i32_1 = arith.constant 0 : i32
    return %c0_i32, %c0_i32_0 : i32, i32
  }
  func.func @transform_9(%arg0: i32, %arg1: i32) -> (i32, i32) {
    %c0_i32 = arith.constant 0 : i32
    %c0_i32_0 = arith.constant 0 : i32
    %c0_i32_1 = arith.constant 0 : i32
    return %c0_i32, %c0_i32_0 : i32, i32
  }
  func.func @transform_10(%arg0: i32, %arg1: i32) -> (i32, i32) {
    %c0_i32 = arith.constant 0 : i32
    %c0_i32_0 = arith.constant 0 : i32
    %c0_i32_1 = arith.constant 0 : i32
    return %c0_i32, %c0_i32_0 : i32, i32
  }
  func.func @transform_11(%arg0: i32, %arg1: i32) -> (i32, i32) {
    %c0_i32 = arith.constant 0 : i32
    %c0_i32_0 = arith.constant 0 : i32
    %c0_i32_1 = arith.constant 0 : i32
    return %c0_i32, %c0_i32_0 : i32, i32
  }
  func.func @transform_12(%arg0: i32, %arg1: i32) -> (i32, i32) {
    %c0_i32 = arith.constant 0 : i32
    %c0_i32_0 = arith.constant 0 : i32
    %c0_i32_1 = arith.constant 0 : i32
    return %c0_i32, %c0_i32_0 : i32, i32
  }
  func.func @transform_13(%arg0: i32, %arg1: i32) -> (i32, i32) {
    %c0_i32 = arith.constant 0 : i32
    %c0_i32_0 = arith.constant 0 : i32
    return %arg0, %c0_i32 : i32, i32
  }
}

</mosaic_0001>

<bundles_post_ra>
// kernel: tpu_custom_call.1
= control target key start
LH: loop header
LB: loop body
LE: loop exit
PB: predicated region body
PF: predicated region fallthrough
CT: control target
= control target key end

     0   :  { %s4573_s0 = inlined_call_operand.vmem [shape: f32[32,256], index: 0, kind: input, shape index: {}]   ;;  %s4574_s1 = inlined_call_operand.vmem [shape: f32[1,256], index: 1, kind: input, shape index: {}]   ;;  %s4575_s2 = inlined_call_operand.vmem [shape: f32[1,256], index: 2, kind: input, shape index: {}]   ;;  %s4576_s3 = inlined_call_operand.vmem [shape: f32[8,256], index: 3, kind: input, shape index: {}]   ;;  %s4577_s4 = inlined_call_operand.vmem [shape: f32[1,256], index: 4, kind: input, shape index: {}]   ;;  %s4578_s5 = inlined_call_operand.vmem [shape: f32[256,8], index: 5, kind: input, shape index: {}]   ;;  %s4579_s6 = inlined_call_operand.vmem [shape: f32[8,1], index: 6, kind: input, shape index: {}]   ;;  %s4580_s7 = inlined_call_operand.vmem [shape: f32[1,256], index: 7, kind: input, shape index: {}]   ;;  %s4581_s8 = inlined_call_operand.vmem [shape: f32[1,256], index: 8, kind: input, shape index: {}]   ;;  %s4582_s9 = inlined_call_operand.hbm [shape: f32[256,512], index: 9, kind: input, shape index: {}]   ;;  %s4583_s10 = inlined_call_operand.vmem [shape: f32[1,512], index: 10, kind: input, shape index: {}]   ;;  %s4584_s11 = inlined_call_operand.hbm [shape: f32[512,256], index: 11, kind: input, shape index: {}]   ;;  %s4585_s12 = inlined_call_operand.vmem [shape: f32[1,256], index: 12, kind: input, shape index: {}]   ;;  %s4586_s13 = inlined_call_operand.hbm [shape: f32[32,256], index: 13, kind: output, shape index: {}]  }
   0x1   :  { %4603 = sst [smem:[#allocation22_spill]] %s4586_s13 }
   0x2   :  { %18 = vsyncpa [#allocation5], 0 }
   0x3   :  { %19 = vsyncpa [#allocation8], 0 }
   0x4   :  { %20 = vsyncpa [#allocation6], 0 }
   0x5   :  { %22 = vsyncpa [#allocation6 + $0x1], 0  ;;  %s3359_s25 = smov 0   ;;  %s3361_s26 = smov 0  }
   0x6   :  { %s3363_s27 = smov 0   ;;  %s3365_s28 = smov 0  }
   0x7   :  { %s3367_s29 = smov 0   ;;  %s3369_s30 = smov 0  }
   0x8 LB: > { %4604 = sst [smem:[#allocation13_spill]] %s3258_s25  ;;  %s2500_s14 = sadd.s32 4294967295, %s3278_s30   ;;  %s3278_s30 = sphi %s3369_s30, %s28_s30   ;;  %s3274_s29 = sphi %s3367_s29, %s4634_s29   ;;  %s3270_s28 = sphi %s3365_s28, %s4633_s28   ;;  %s3266_s27 = sphi %s3363_s27, %s4632_s27   ;;  %s3262_s26 = sphi %s3361_s26, %s4636_s26   ;;  %s3258_s25 = sphi %s3359_s25, %s4635_s25  }
   0x9   : > { %4605 = sst [smem:[#allocation14_spill]] %s3266_s27  ;;  %s2501_s15 = sadd.s32 4294967294, %s3278_s30  }
   0xa   : > { %4606 = sst [smem:[#allocation15_spill]] %s3274_s29  ;;  %s40_s16 = sadd.s32 1, %s3274_s29 }
   0xb   : > { %4607 = sst [smem:[#allocation16_spill]] %s3278_s30  ;;  %s325_s17 = sadd.s32 1, %s3266_s27 }
   0xc   : > { %p42_p0 = scmp.ge.s32.totalorder %s40_s16, 4  ;;  %p335_p1 = scmp.ne.s32.totalorder %s3266_s27, %s3262_s26 }
   0xd   : > { %p336_p2 = scmp.eq.s32.totalorder %s2500_s14, 3  ;;  %p341_p3 = scmp.ne.s32.totalorder %s3262_s26, %s3258_s25 }
   0xe   : > { %s4638_s16 = smov (%p42_p0, %s40_s16), 0  ;;  %p342_p5 = scmp.eq.s32.totalorder %s2501_s15, 3 }
   0xf   : > { %4608 = sst [smem:[#allocation17_spill]] %s4638_s16  ;;  %p3399_p4 = por %p336_p2, %p335_p1 }
  0x10   : > { %s322_s19 = ssub.s32 %s3274_s29, %s4638_s16  ;;  %p2502_p6 = scmp.ge.s32.totalorder %s3278_s30, 1 }
  0x11   : > { %s4609_s18 = scalar_select %p3399_p4, 1, 0 }
  0x12   : > { %p323_p7 = scmp.eq.s32.totalorder %s322_s19, 0  ;;  %p3406_p8 = por %p342_p5, %p341_p3 }
  0x13   : > { %4610 = sst [smem:[#allocation18_spill]] %s4609_s18  ;;  %p349_p9 = scmp.lt.s32.totalorder %s3278_s30, 5 }
  0x14   : > { %s4611_s20 = scalar_select %p3406_p8, 1, 0 }
  0x15   : > { %s3412_s21 = scalar_select %p323_p7, %s3266_s27, %s325_s17  }
  0x16   : > { %4612 = sst [smem:[#allocation19_spill]] %s4611_s20  ;;  %p3414_p10 = pnand %p2502_p6, %p349_p9 }
  0x17   : > { %4613 = sst [smem:[#allocation20_spill]] %s3412_s21  ;;  %p3418_p11 = scmp.eq.s32.totalorder %s2500_s14, 0 }
  0x18   : > { %s4614_s22 = scalar_select %p3414_p10, 1, 0 }
  0x19   : > { %s4615_s23 = scalar_select %p3418_p11, 1, 0 }
  0x1a   : > { %p2883_p12 = pneg %p3414_p10  ;;  %s3280_s24 = smov [#allocation4]  }
  0x1b   : > { %s385_s15 = sshll.u32 %s3280_s24, 4  ;;  %s3281_s17 = smov [#allocation7]   ;;  %s386_s15 = int_to_ptr.vmem [resolvable:$true] %s385_s15 }
  0x1c   : > { %p3426_p13 = pnand %p3418_p11, %p2883_p12  ;;  %s401_s16 = sshll.u32 %s3281_s17, 4  ;;  %s3430_s16 = int_to_ptr.vmem [resolvable:$true] %s401_s16 }
  0x1d   : > { %s3136_s21 = scalar_lea.hbm %s4582_s9, 16384 }
  0x1e   : > { %p3137_p0 = scmp.ne.s32.totalorder %s4582_s9, %s3136_s21  ;;  %p3138_p1 = pneg %p3426_p13 }
  0x1f   : > { %p3143_p5 = scmp.lt.u32.totalorder %s3136_s21, %s4582_s9 }
  0x20   : > { %p3139_p2 = pnand %p3138_p1, %p3137_p0 }
  0x22   : > { %p3140_p3 = pneg %p3139_p2 }
  0x24   : > { %p3145_p6 = pnand %p3143_p5, %p3140_p3 }
  0x26   : > { %3148 = shalt.err (!%p3145_p6)
}
  0x27   : > { %s3149_s17 = scalar_lea.vmem %s386_s15, 16384  ;;  %p3157_p8 = scmp.lt.s32.totalorder %s386_s15, %s386_s15 }
  0x28   : > { %p3150_p7 = scmp.ne.s32.totalorder %s386_s15, %s3149_s17  ;;  %p3158_p4 = scmp.lt.s32.totalorder %s3149_s17, %s3149_s17 }
  0x2a   : > { %p3152_p9 = pnand %p3150_p7, %p3138_p1  ;;  %p3159_p11 = por %p3158_p4, %p3157_p8 }
  0x2c   : > { %p3153_p12 = pneg %p3152_p9 }
  0x2e   : > { %p3160_p10 = pnand %p3159_p11, %p3153_p12 }
  0x30   : > { %3163 = shalt.err (!%p3160_p10)
}
  0x31   : > { %s3282_s27 = smov 512   ;;  %s3283_s29 = smov 32  }
  0x32   : > { %2886 = dma.hbm_to_vmem [thread:$0]  (!%p3426_p13), %s4582_s9, 16384, %s386_s15, [#allocation5], %s3282_s27, %s3282_s27, %s3283_s29  }
  0x33   : > { %s3164_s24 = scalar_lea.hbm %s4584_s11, 16384 }
  0x34   : > { %p3165_p0 = scmp.ne.s32.totalorder %s4584_s11, %s3164_s24  ;;  %p3171_p10 = scmp.lt.u32.totalorder %s3164_s24, %s4584_s11 }
  0x36   : > { %p3167_p4 = pnand %p3165_p0, %p3138_p1 }
  0x38   : > { %p3168_p8 = pneg %p3167_p4 }
  0x3a   : > { %p3173_p11 = pnand %p3171_p10, %p3168_p8 }
  0x3c   : > { %3176 = shalt.err (!%p3173_p11)
}
  0x3d   : > { %s3177_s15 = scalar_lea.vmem %s3430_s16, 16384  ;;  %p3185_p6 = scmp.lt.s32.totalorder %s3430_s16, %s3430_s16 }
  0x3e   : > { %p3178_p2 = scmp.ne.s32.totalorder %s3430_s16, %s3177_s15  ;;  %p3186_p7 = scmp.lt.s32.totalorder %s3177_s15, %s3177_s15 }
  0x40   : > { %p3180_p3 = pnand %p3178_p2, %p3138_p1  ;;  %p3187_p9 = por %p3186_p7, %p3185_p6 }
  0x42   : > { %p3181_p5 = pneg %p3180_p3 }
  0x44   : > { %p3188_p12 = pnand %p3187_p9, %p3181_p5 }
  0x46   : > { %3191 = shalt.err (!%p3188_p12)
}
  0x47   : > { %s3284_s13 = smov 256   ;;  %s3285_s30 = smov 16  }
  0x48   : > { %2889 = dma.hbm_to_vmem [thread:$0]  (!%p3426_p13), %s4584_s11, 16384, %s3430_s16, [#allocation8], %s3284_s13, %s3284_s13, %s3285_s30  }
  0x49   : > { %p4617_p0 = scmp.ne.s32.totalorder %s4614_s22, 0 }
  0x4b   : > { %428 = sbr.rel (%p4617_p0) target bundleno = 2021 (0x7e5), region = 72 }
  0x52   : > { %p4618_p1 = scmp.ne.s32.totalorder %s4615_s23, 0 }
  0x54   : > { %3245 = dma.done.wait (%p4618_p1), [#allocation5], 16384  }
  0x55   : > { %3247 = vsyncadd (%p4618_p1), [#allocation5], 4294950912 }
  0x56   : > { %3249 = dma.done.wait (%p4618_p1), [#allocation8], 16384  }
  0x57   : > { %3251 = vsyncadd (%p4618_p1), [#allocation8], 4294950912  ;;  %p476_p4 = scmp.lt.s32.totalorder %s3270_s28, 3  ;;  %v533_v10 = vld [vmem:[%s4576_s3 + $0x8] sm:$0xff]  ;;  %v532_v11 = vld [vmem:[%s4576_s3] sm:$0xff]  ;;  %v3286_v12 = vmov 0.0   ;;  %v507_v15 = vlaneseq }
  0x58   : > { %740 = vmatprep.subr.mxu1 %v533_v10  ;;  %804 = vmatprep.mubr.f32.mxu1 %v3286_v12  ;;  %v487_v19 = vld [vmem:[%s4574_s1] sm:$0x3]  ;;  %vm643_vm0 = vcmask 64512   ;;  %v538_v10 = vld [vmem:[%s4578_s5 + $0x18] sm:$0xff]  ;;  %s473_s15 = sand.u32 1, %s3262_s26   ;;  %s4623_s27 = sld [smem:[#allocation18_spill]] }
  0x59   : > { %s477_s19 = scalar_select %p476_p4, %s3270_s28, 3  ;;  %741 = vmatpush1.msra.mxu1 %v532_v11  ;;  %v3505_v17 = vshrl.u32 %v507_v15, 7  ;;  %v488_v20 = vld [vmem:[%s4575_s2] sm:$0x3]  ;;  %v554_v11 = vld [vmem:[%s4578_s5 + $0x98] sm:$0xff] }
  0x5a   : > { %v535_v62 = vld [vmem:[%s4578_s5] sm:$0xff]  ;;  %s2509_s18 = sshll.u32 %s473_s15, 4  ;;  %s3288_s24 = smov [#allocation9]  }
  0x5b   : > { %s2549_s16 = sshll.u32 %s477_s19, 4  ;;  %4619 = vst [vmem:[#allocation21_spill] sm:$0xff] %v3505_v17  ;;  %v3508_v18 = vsub.s32 0, %v3505_v17  ;;  %v3519_v27 = vsub.s32 1, %v3505_v17  ;;  %v551_v63 = vld [vmem:[%s4578_s5 + $0x80] sm:$0xff]  ;;  %s2550_s19 = sshll.u32 %s3270_s28, 8 }
  0x5c   : > { %s3494_s25 = scalar_lea.vmem %s4573_s0, %s2549_s16  ;;  %s475_s16 = scalar_lea.vmem [#allocation9], %s2509_s18 }
  0x5d   : > { %v485_v0 = vld [vmem:[%s3494_s25] sm:$0xff]  ;;  %v486_v1 = vld [vmem:[%s3494_s25 + $0x8] sm:$0xff]  ;;  %v510_v21 = vrot.slane %v487_v19, %v3508_v18  ;;  %v523_v24 = vrot.slane %v488_v20, %v3508_v18  ;;  %v514_v29 = vrot.slane %v487_v19, %v3519_v27  ;;  %v527_v31 = vrot.slane %v488_v20, %v3519_v27  ;;  %s2411_s29 = sshll.u32 %s475_s16, 4  ;;  %s2397_s28 = scalar_lea.sflag [#allocation6], %s473_s15  ;;  %s4528_s29 = int_to_ptr.vmem [resolvable:$true] %s2411_s29 }
  0x5e   : > { %v489_v2 = vadd.f32 %v486_v1, %v485_v0  ;;  %v556_v19 = vld [vmem:[%s4578_s5 + $0xa8] sm:$0xff]  ;;  %s3192_s14 = scalar_lea.vmem %s4528_s29, 256  ;;  %p4626_p8 = scmp.ne.s32.totalorder %s4623_s27, 0 }
  0x5f   : > { %p3193_p13 = scmp.ne.s32.totalorder %s4528_s29, %s3192_s14  ;;  %s3196_s17 = sshll.u32 %s3288_s24, 4  ;;  %s3197_s17 = int_to_ptr.vmem [resolvable:$false] %s3196_s17 }
  0x60   : > { %490 = vadd.xlane.f32.xlu0 %v489_v2  ;;  %v536_v2 = vld [vmem:[%s4578_s5 + $0x8] sm:$0xff]  ;;  %s3198_s13 = scalar_lea.vmem %s3197_s17, 512  ;;  %p3199_p2 = scmp.lt.s32.totalorder %s4528_s29, %s3197_s17 }
  0x61   : > { %p3194_p10 = pnand %p3193_p13, %p4626_p8  ;;  %p3200_p3 = scmp.lt.s32.totalorder %s3198_s13, %s3192_s14 }
  0x63   : > { %p3195_p11 = pneg %p3194_p10  ;;  %p3201_p5 = por %p3200_p3, %p3199_p2 }
  0x65   : > { %p3202_p6 = pnand %p3201_p5, %p3195_p11 }
  0xed   : > { %v491_v3 = vpop.xlane.xlu0 %490 }
  0xee   : > { %v493_v4 = vmul.f32 0.00390625, %v491_v3  ;;  %v552_v3 = vld [vmem:[%s4578_s5 + $0x88] sm:$0xff] }
  0xf0   : > { %v494_v5 = vsub.f32 %v485_v0, %v493_v4  ;;  %v495_v6 = vsub.f32 %v486_v1, %v493_v4  ;;  %v2955_v0 = vpack.i.bf16 %v535_v62, %v551_v63  ;;  %v2957_v4 = vpack.i.bf16 %v536_v2, %v552_v3 }
  0xf2   : > { %v496_v7 = vmul.f32 %v494_v5, %v494_v5  ;;  %v497_v8 = vmul.f32 %v495_v6, %v495_v6 }
  0xf4   : > { %v498_v9 = vadd.f32 %v497_v8, %v496_v7  ;;  %v553_v7 = vld [vmem:[%s4578_s5 + $0x90] sm:$0xff] }
  0xf6   : > { %499 = vadd.xlane.f32.xlu0 %v498_v9 }
 0x123   : > { %2956 = vxpose.xlu0.b32.start [1/16] (narrow) %v2955_v0, 8 }
 0x127   : > { %2958 = vxpose.xlu0.b32.cont [2/16] (narrow) %v2957_v4, 8 }
 0x183   : > { %v500_v13 = vpop.xlane.xlu0 %499 }
 0x184   : > { %v501_v14 = vmul.f32 0.00390625, %v500_v13  ;;  %v2961_v13 = vpack.i.bf16 %v538_v10, %v554_v11 }
 0x186   : > { %v502_v16 = vadd.f32 1e-05, %v501_v14  ;;  %v539_v14 = vld [vmem:[%s4578_s5 + $0x20] sm:$0xff] }
 0x188   : > { %2994 = vrsqrt.f32 %v502_v16  ;;  %v540_v16 = vld [vmem:[%s4578_s5 + $0x28] sm:$0xff] }
 0x189   : > { %v2965_v20 = vpack.i.bf16 %v540_v16, %v556_v19 }
 0x192   : > { %v2995_v22 = vpop.eup %2994 }
 0x193   : > { %v504_v23 = vmul.f32 %v2995_v22, %v494_v5  ;;  %v505_v28 = vmul.f32 %v2995_v22, %v495_v6  ;;  %v537_v6 = vld [vmem:[%s4578_s5 + $0x10] sm:$0xff] }
 0x194   : > { %v2959_v8 = vpack.i.bf16 %v537_v6, %v553_v7  ;;  %v557_v22 = vld [vmem:[%s4578_s5 + $0xb0] sm:$0xff] }
 0x195   : > { %v517_v25 = vmul.f32 %v510_v21, %v504_v23  ;;  %v518_v30 = vmul.f32 %v514_v29, %v505_v28  ;;  %v541_v21 = vld [vmem:[%s4578_s5 + $0x30] sm:$0xff]  ;;  %v543_v28 = vld [vmem:[%s4578_s5 + $0x40] sm:$0xff] }
 0x196   : > { %2960 = vxpose.xlu0.b32.cont [3/16] (narrow) %v2959_v8, 8  ;;  %v2967_v23 = vpack.i.bf16 %v541_v21, %v557_v22  ;;  %v559_v29 = vld [vmem:[%s4578_s5 + $0xc0] sm:$0xff] }
 0x197   : > { %v530_v26 = vadd.f32 %v523_v24, %v517_v25  ;;  %v531_v32 = vadd.f32 %v527_v31, %v518_v30  ;;  %v542_v24 = vld [vmem:[%s4578_s5 + $0x38] sm:$0xff]  ;;  %v2971_v30 = vpack.i.bf16 %v543_v28, %v559_v29  ;;  %v544_v31 = vld [vmem:[%s4578_s5 + $0x48] sm:$0xff] }
 0x198   : > { %v558_v25 = vld [vmem:[%s4578_s5 + $0xb8] sm:$0xff] }
 0x199   : > { %579 = vxpose.xlu1.b32.start.end [1/1] (short) %v530_v26, 128  ;;  %v2969_v26 = vpack.i.bf16 %v542_v24, %v558_v25 }
 0x19a   : > { %2962 = vxpose.xlu0.b32.cont [4/16] (narrow) %v2961_v13, 8 }
 0x1d6   : > { %611 = vxpose.xlu1.b32.start.end [1/1] (short) %v531_v32, 128  ;;  %v560_v32 = vld [vmem:[%s4578_s5 + $0xc8] sm:$0xff] }
 0x219   : > { %v595_v33 = vpop.trf.xlu1 }
 0x21a   : > { %2512 = vmatmul.mubr.msk.f32.vlgmr.msra.gmra.mrb[0].mxu1 %vm643_vm0, %v595_v33  ;;  %v2973_v33 = vpack.i.bf16 %v544_v31, %v560_v32 }
 0x21b   : > { %810 = vmatprep.mubr.f32.mxu1 %v3286_v12 }
 0x21d   : > { %v596_v34 = vpop.trf.xlu1 }
 0x21e   : > { %2513 = vmatmul.mubr.msk.f32.gmra.mrb[2].mxu1 %vm643_vm0, %v596_v34  ;;  %v545_v34 = vld [vmem:[%s4578_s5 + $0x50] sm:$0xff] }
 0x21f   : > { %816 = vmatprep.mubr.f32.mxu1 %v3286_v12 }
 0x221   : > { %v597_v35 = vpop.trf.xlu1 }
 0x222   : > { %2514 = vmatmul.mubr.msk.f32.gmra.mrb[4].mxu1 %vm643_vm0, %v597_v35  ;;  %v561_v35 = vld [vmem:[%s4578_s5 + $0xd0] sm:$0xff] }
 0x223   : > { %822 = vmatprep.mubr.f32.mxu1 %v3286_v12 }
 0x225   : > { %v598_v36 = vpop.trf.xlu1 }
 0x226   : > { %2515 = vmatmul.mubr.msk.f32.gmra.mrb[6].mxu1 %vm643_vm0, %v598_v36  ;;  %v546_v36 = vld [vmem:[%s4578_s5 + $0x58] sm:$0xff] }
 0x227   : > { %828 = vmatprep.mubr.f32.mxu1 %v3286_v12 }
 0x229   : > { %v599_v37 = vpop.trf.xlu1 }
 0x22a   : > { %2516 = vmatmul.mubr.msk.f32.gmra.mrb[8].mxu1 %vm643_vm0, %v599_v37  ;;  %v2975_v37 = vpack.i.bf16 %v545_v34, %v561_v35 }
 0x22b   : > { %834 = vmatprep.mubr.f32.mxu1 %v3286_v12 }
 0x22d   : > { %v600_v38 = vpop.trf.xlu1 }
 0x22e   : > { %2517 = vmatmul.mubr.msk.f32.gmra.mrb[10].mxu1 %vm643_vm0, %v600_v38  ;;  %v562_v38 = vld [vmem:[%s4578_s5 + $0xd8] sm:$0xff] }
 0x22f   : > { %840 = vmatprep.mubr.f32.mxu1 %v3286_v12 }
 0x231   : > { %v601_v39 = vpop.trf.xlu1 }
 0x232   : > { %2518 = vmatmul.mubr.msk.f32.gmra.mrb[12].mxu1 %vm643_vm0, %v601_v39  ;;  %v2977_v39 = vpack.i.bf16 %v546_v36, %v562_v38 }
 0x233   : > { %846 = vmatprep.mubr.f32.mxu1 %v3286_v12 }
 0x235   : > { %v602_v40 = vpop.trf.xlu1 }
 0x236   : > { %2519 = vmatmul.mubr.msk.f32.gmra.mrb[14].mxu1 %vm643_vm0, %v602_v40  ;;  %v547_v40 = vld [vmem:[%s4578_s5 + $0x60] sm:$0xff] }
 0x237   : > { %852 = vmatprep.mubr.f32.mxu1 %v3286_v12 }
 0x239   : > { %v603_v41 = vpop.trf.xlu1 }
 0x23a   : > { %2520 = vmatmul.mubr.msk.f32.gmra.mrb[16].mxu1 %vm643_vm0, %v603_v41  ;;  %v563_v41 = vld [vmem:[%s4578_s5 + $0xe0] sm:$0xff] }
 0x23b   : > { %858 = vmatprep.mubr.f32.mxu1 %v3286_v12 }
 0x23d   : > { %v604_v42 = vpop.trf.xlu1 }
 0x23e   : > { %2521 = vmatmul.mubr.msk.f32.gmra.mrb[18].mxu1 %vm643_vm0, %v604_v42  ;;  %v548_v42 = vld [vmem:[%s4578_s5 + $0x68] sm:$0xff] }
 0x23f   : > { %864 = vmatprep.mubr.f32.mxu1 %v3286_v12 }
 0x241   : > { %v605_v43 = vpop.trf.xlu1 }
 0x242   : > { %2522 = vmatmul.mubr.msk.f32.gmra.mrb[20].mxu1 %vm643_vm0, %v605_v43  ;;  %v2979_v43 = vpack.i.bf16 %v547_v40, %v563_v41 }
 0x243   : > { %870 = vmatprep.mubr.f32.mxu1 %v3286_v12 }
 0x245   : > { %v606_v44 = vpop.trf.xlu1 }
 0x246   : > { %2523 = vmatmul.mubr.msk.f32.gmra.mrb[22].mxu1 %vm643_vm0, %v606_v44  ;;  %v564_v44 = vld [vmem:[%s4578_s5 + $0xe8] sm:$0xff] }
 0x247   : > { %876 = vmatprep.mubr.f32.mxu1 %v3286_v12 }
 0x249   : > { %v607_v45 = vpop.trf.xlu1 }
 0x24a   : > { %2524 = vmatmul.mubr.msk.f32.gmra.mrb[24].mxu1 %vm643_vm0, %v607_v45  ;;  %v2981_v45 = vpack.i.bf16 %v548_v42, %v564_v44 }
 0x24b   : > { %882 = vmatprep.mubr.f32.mxu1 %v3286_v12 }
 0x24d   : > { %v608_v46 = vpop.trf.xlu1 }
 0x24e   : > { %2525 = vmatmul.mubr.msk.f32.gmra.mrb[26].mxu1 %vm643_vm0, %v608_v46  ;;  %v549_v46 = vld [vmem:[%s4578_s5 + $0x70] sm:$0xff] }
 0x24f   : > { %888 = vmatprep.mubr.f32.mxu1 %v3286_v12 }
 0x251   : > { %v609_v47 = vpop.trf.xlu1 }
 0x252   : > { %2526 = vmatmul.mubr.msk.f32.gmra.mrb[28].mxu1 %vm643_vm0, %v609_v47  ;;  %v565_v47 = vld [vmem:[%s4578_s5 + $0xf0] sm:$0xff] }
 0x253   : > { %894 = vmatprep.mubr.f32.mxu1 %v3286_v12 }
 0x255   : > { %v610_v48 = vpop.trf.xlu1 }
 0x256   : > { %2527 = vmatmul.mubr.msk.f32.gmra.mrb[30].mxu1 %vm643_vm0, %v610_v48  ;;  %v550_v48 = vld [vmem:[%s4578_s5 + $0x78] sm:$0xff] }
 0x257   : > { %900 = vmatprep.mubr.f32.mxu1 %v3286_v12 }
 0x259   : > { %v627_v49 = vpop.trf.xlu1 }
 0x25a   : > { %2528 = vmatmul.mubr.msk.f32.gmra.mrb[32].mxu1 %vm643_vm0, %v627_v49  ;;  %v2983_v49 = vpack.i.bf16 %v549_v46, %v565_v47 }
 0x25b   : > { %906 = vmatprep.mubr.f32.mxu1 %v3286_v12 }
 0x25d   : > { %v628_v50 = vpop.trf.xlu1 }
 0x25e   : > { %2529 = vmatmul.mubr.msk.f32.gmra.mrb[34].mxu1 %vm643_vm0, %v628_v50  ;;  %v566_v50 = vld [vmem:[%s4578_s5 + $0xf8] sm:$0xff] }
 0x25f   : > { %912 = vmatprep.mubr.f32.mxu1 %v3286_v12 }
 0x261   : > { %v629_v51 = vpop.trf.xlu1 }
 0x262   : > { %2530 = vmatmul.mubr.msk.f32.gmra.mrb[36].mxu1 %vm643_vm0, %v629_v51  ;;  %v2985_v51 = vpack.i.bf16 %v550_v48, %v566_v50 }
 0x263   : > { %918 = vmatprep.mubr.f32.mxu1 %v3286_v12 }
 0x265   : > { %v630_v52 = vpop.trf.xlu1 }
 0x266   : > { %2531 = vmatmul.mubr.msk.f32.gmra.mrb[38].mxu1 %vm643_vm0, %v630_v52  ;;  %v534_v52 = vld [vmem:[%s4577_s4] sm:$0x3] }
 0x267   : > { %924 = vmatprep.mubr.f32.mxu1 %v3286_v12 }
 0x269   : > { %v631_v53 = vpop.trf.xlu1 }
 0x26a   : > { %2532 = vmatmul.mubr.msk.f32.gmra.mrb[40].mxu1 %vm643_vm0, %v631_v53  ;;  %v3686_v53 = vrot.slane %v534_v52, %v3508_v18 }
 0x26b   : > { %930 = vmatprep.mubr.f32.mxu1 %v3286_v12 }
 0x26d   : > { %v632_v54 = vpop.trf.xlu1 }
 0x26e   : > { %2533 = vmatmul.mubr.msk.f32.gmra.mrb[42].mxu1 %vm643_vm0, %v632_v54  ;;  %v3689_v54 = vrot.slane %v534_v52, %v3519_v27 }
 0x26f   : > { %936 = vmatprep.mubr.f32.mxu1 %v3286_v12 }
 0x271   : > { %v633_v55 = vpop.trf.xlu1 }
 0x272   : > { %2534 = vmatmul.mubr.msk.f32.gmra.mrb[44].mxu1 %vm643_vm0, %v633_v55 }
 0x273   : > { %942 = vmatprep.mubr.f32.mxu1 %v3286_v12 }
 0x275   : > { %v634_v56 = vpop.trf.xlu1 }
 0x276   : > { %2535 = vmatmul.mubr.msk.f32.gmra.mrb[46].mxu1 %vm643_vm0, %v634_v56 }
 0x277   : > { %948 = vmatprep.mubr.f32.mxu1 %v3286_v12 }
 0x279   : > { %v635_v57 = vpop.trf.xlu1 }
 0x27a   : > { %2536 = vmatmul.mubr.msk.f32.gmra.mrb[48].mxu1 %vm643_vm0, %v635_v57 }
 0x27b   : > { %954 = vmatprep.mubr.f32.mxu1 %v3286_v12 }
 0x27d   : > { %v636_v58 = vpop.trf.xlu1 }
 0x27e   : > { %2537 = vmatmul.mubr.msk.f32.gmra.mrb[50].mxu1 %vm643_vm0, %v636_v58 }
 0x27f   : > { %960 = vmatprep.mubr.f32.mxu1 %v3286_v12 }
 0x281   : > { %v637_v59 = vpop.trf.xlu1 }
 0x282   : > { %2538 = vmatmul.mubr.msk.f32.gmra.mrb[52].mxu1 %vm643_vm0, %v637_v59 }
 0x283   : > { %966 = vmatprep.mubr.f32.mxu1 %v3286_v12 }
 0x285   : > { %v638_v60 = vpop.trf.xlu1 }
 0x286   : > { %2539 = vmatmul.mubr.msk.f32.gmra.mrb[54].mxu1 %vm643_vm0, %v638_v60 }
 0x287   : > { %972 = vmatprep.mubr.f32.mxu1 %v3286_v12 }
 0x289   : > { %v639_v61 = vpop.trf.xlu1 }
 0x28a   : > { %2540 = vmatmul.mubr.msk.f32.gmra.mrb[56].mxu1 %vm643_vm0, %v639_v61 }
 0x28b   : > { %978 = vmatprep.mubr.f32.mxu1 %v3286_v12 }
 0x28d   : > { %v640_v1 = vpop.trf.xlu1 }
 0x28e   : > { %2541 = vmatmul.mubr.msk.f32.gmra.mrb[58].mxu1 %vm643_vm0, %v640_v1 }
 0x28f   : > { %984 = vmatprep.mubr.f32.mxu1 %v3286_v12 }
 0x291   : > { %v641_v5 = vpop.trf.xlu1 }
 0x292   : > { %2542 = vmatmul.mubr.msk.f32.gmra.mrb[60].mxu1 %vm643_vm0, %v641_v5 }
 0x293   : > { %990 = vmatprep.mubr.f32.mxu1 %v3286_v12  ;;  %v555_v12 = vld [vmem:[%s4578_s5 + $0xa0] sm:$0xff] }
 0x294   : > { %v2963_v15 = vpack.i.bf16 %v539_v14, %v555_v12 }
 0x295   : > { %v642_v9 = vpop.trf.xlu1 }
 0x296   : > { %2543 = vmatmul.mubr.msk.f32.gmra.mrb[62].mxu1 %vm643_vm0, %v642_v9  ;;  %2964 = vxpose.xlu0.b32.cont [5/16] (narrow) %v2963_v15, 8 }
 0x29a   : > { %2966 = vxpose.xlu0.b32.cont [6/16] (narrow) %v2965_v20, 8 }
 0x29e   : > { %2968 = vxpose.xlu0.b32.cont [7/16] (narrow) %v2967_v23, 8 }
 0x2a2   : > { %2970 = vxpose.xlu0.b32.cont [8/16] (narrow) %v2969_v26, 8 }
 0x2a6   : > { %2972 = vxpose.xlu0.b32.cont [9/16] (narrow) %v2971_v30, 8 }
 0x2aa   : > { %2974 = vxpose.xlu0.b32.cont [10/16] (narrow) %v2973_v33, 8 }
 0x2ae   : > { %2976 = vxpose.xlu0.b32.cont [11/16] (narrow) %v2975_v37, 8 }
 0x2b2   : > { %2978 = vxpose.xlu0.b32.cont [12/16] (narrow) %v2977_v39, 8 }
 0x2b6   : > { %2980 = vxpose.xlu0.b32.cont [13/16] (narrow) %v2979_v43, 8 }
 0x2ba   : > { %2982 = vxpose.xlu0.b32.cont [14/16] (narrow) %v2981_v45, 8 }
 0x2be   : > { %2984 = vxpose.xlu0.b32.cont [15/16] (narrow) %v2983_v49, 8 }
 0x2c2   : > { %2986 = vxpose.xlu0.b32.end [16/16] (narrow) %v2985_v51, 8 }
 0x2ed   : > { %v806_v55 = vpop.f32.mrb[0].mxu1 }
 0x2ee   : > { %v807_v56 = vadd.f32 %v806_v55, %v3686_v53  ;;  %v808_v57 = vpop.f32.mrb[1].mxu1 }
 0x2ef   : > { %v809_v58 = vadd.f32 %v808_v57, %v3689_v54 }
 0x2f0   : > { %v1061_v59 = vmul.f32 0.044715, %v807_v56  ;;  %v3697_v24 = vmul.f32 0.5, %v807_v56 }
 0x2f1   : > { %v1062_v60 = vmul.f32 0.044715, %v809_v58  ;;  %v812_v61 = vpop.f32.mrb[2].mxu1  ;;  %v3701_v36 = vmul.f32 0.5, %v809_v58 }
 0x2f2   : > { %v1125_v62 = vmul.f32 %v1061_v59, %v807_v56  ;;  %v813_v63 = vadd.f32 %v812_v61, %v3686_v53  ;;  %v814_v0 = vpop.f32.mrb[3].mxu1 }
 0x2f3   : > { %v1126_v1 = vmul.f32 %v1062_v60, %v809_v58  ;;  %v815_v2 = vadd.f32 %v814_v0, %v3689_v54 }
 0x2f4   : > { %v1189_v3 = vmul.f32 %v1125_v62, %v807_v56  ;;  %v1063_v4 = vmul.f32 0.044715, %v813_v63  ;;  %v3703_v41 = vmul.f32 0.5, %v813_v63 }
 0x2f5   : > { %v1190_v5 = vmul.f32 %v1126_v1, %v809_v58  ;;  %v1064_v6 = vmul.f32 0.044715, %v815_v2  ;;  %v818_v7 = vpop.f32.mrb[4].mxu1  ;;  %v3709_v52 = vmul.f32 0.5, %v815_v2 }
 0x2f6   : > { %v1253_v8 = vadd.f32 %v1189_v3, %v807_v56  ;;  %v1127_v9 = vmul.f32 %v1063_v4, %v813_v63  ;;  %v819_v10 = vadd.f32 %v818_v7, %v3686_v53  ;;  %v820_v11 = vpop.f32.mrb[5].mxu1 }
 0x2f7   : > { %v1128_v13 = vmul.f32 %v1064_v6, %v815_v2  ;;  %v821_v14 = vadd.f32 %v820_v11, %v3689_v54  ;;  %v1254_v12 = vadd.f32 %v1190_v5, %v809_v58 }
 0x2f8   : > { %v1317_v15 = vmul.f32 0.7978846, %v1253_v8  ;;  %v1191_v16 = vmul.f32 %v1127_v9, %v813_v63  ;;  %v1065_v19 = vmul.f32 0.044715, %v819_v10  ;;  %v3712_v59 = vmul.f32 0.5, %v819_v10 }
 0x2f9   : > { %v1192_v20 = vmul.f32 %v1128_v13, %v815_v2  ;;  %v1066_v21 = vmul.f32 0.044715, %v821_v14  ;;  %v824_v22 = vpop.f32.mrb[6].mxu1  ;;  %v1318_v23 = vmul.f32 0.7978846, %v1254_v12  ;;  %v3718_v1 = vmul.f32 0.5, %v821_v14 }
 0x2fa   : > { %2996 = vtanh.f32 %v1317_v15  ;;  %v1255_v25 = vadd.f32 %v1191_v16, %v813_v63  ;;  %v1129_v26 = vmul.f32 %v1065_v19, %v819_v10  ;;  %v825_v28 = vadd.f32 %v824_v22, %v3686_v53  ;;  %v826_v29 = vpop.f32.mrb[7].mxu1 }
 0x2fb   : > { %v1130_v30 = vmul.f32 %v1066_v21, %v821_v14  ;;  %v827_v31 = vadd.f32 %v826_v29, %v3689_v54  ;;  %v1256_v32 = vadd.f32 %v1192_v20, %v815_v2  ;;  %2998 = vtanh.f32 %v1318_v23 }
 0x2fc   : > { %v1319_v33 = vmul.f32 0.7978846, %v1255_v25  ;;  %v1193_v34 = vmul.f32 %v1129_v26, %v819_v10  ;;  %v1067_v35 = vmul.f32 0.044715, %v825_v28  ;;  %v3720_v7 = vmul.f32 0.5, %v825_v28 }
 0x2fd   : > { %v1194_v37 = vmul.f32 %v1130_v30, %v821_v14  ;;  %v1068_v38 = vmul.f32 0.044715, %v827_v31  ;;  %v830_v39 = vpop.f32.mrb[8].mxu1  ;;  %v1320_v40 = vmul.f32 0.7978846, %v1256_v32  ;;  %v3723_v11 = vmul.f32 0.5, %v827_v31 }
 0x2fe   : > { %3000 = vtanh.f32 %v1319_v33  ;;  %v1257_v42 = vadd.f32 %v1193_v34, %v819_v10  ;;  %v1131_v43 = vmul.f32 %v1067_v35, %v825_v28  ;;  %v831_v44 = vadd.f32 %v830_v39, %v3686_v53  ;;  %v832_v45 = vpop.f32.mrb[9].mxu1 }
 0x2ff   : > { %v1132_v46 = vmul.f32 %v1068_v38, %v827_v31  ;;  %v3707_v47 = vadd.f32 %v832_v45, %v3689_v54  ;;  %3002 = vtanh.f32 %v1320_v40  ;;  %v1258_v48 = vadd.f32 %v1194_v37, %v821_v14 }
 0x300   : > { %v1321_v49 = vmul.f32 0.7978846, %v1257_v42  ;;  %v1195_v50 = vmul.f32 %v1131_v43, %v825_v28  ;;  %v1069_v51 = vmul.f32 0.044715, %v831_v44  ;;  %v3725_v12 = vmul.f32 0.5, %v831_v44 }
 0x301   : > { %v1196_v55 = vmul.f32 %v1132_v46, %v827_v31  ;;  %v1070_v56 = vmul.f32 0.044715, %v3707_v47  ;;  %v836_v57 = vpop.f32.mrb[10].mxu1  ;;  %v1322_v58 = vmul.f32 0.7978846, %v1258_v48  ;;  %v3735_v23 = vmul.f32 0.5, %v3707_v47 }
 0x302   : > { %3004 = vtanh.f32 %v1321_v49  ;;  %v1259_v60 = vadd.f32 %v1195_v50, %v825_v28  ;;  %v1133_v61 = vmul.f32 %v1069_v51, %v831_v44  ;;  %v837_v62 = vadd.f32 %v836_v57, %v3686_v53  ;;  %v838_v63 = vpop.f32.mrb[11].mxu1 }
 0x303   : > { %v3716_v0 = vadd.f32 %v838_v63, %v3689_v54  ;;  %v1260_v2 = vadd.f32 %v1196_v55, %v827_v31  ;;  %3006 = vtanh.f32 %v1322_v58  ;;  %v1134_v9 = vmul.f32 %v1070_v56, %v3707_v47 }
 0x304   : > { %v2997_v3 = vpop.eup %2996  ;;  %v1323_v4 = vmul.f32 0.7978846, %v1259_v60  ;;  %v1197_v5 = vmul.f32 %v1133_v61, %v831_v44  ;;  %v1071_v6 = vmul.f32 0.044715, %v837_v62  ;;  %v3742_v35 = vmul.f32 0.5, %v837_v62 }
 0x305   : > { %v2999_v8 = vpop.eup %2998  ;;  %v842_v10 = vpop.f32.mrb[12].mxu1  ;;  %v1324_v13 = vmul.f32 0.7978846, %v1260_v2  ;;  %v1072_v20 = vmul.f32 0.044715, %v3716_v0  ;;  %v1445_v22 = vadd.f32 1.0, %v2997_v3  ;;  %v3739_v31 = vmul.f32 %v1134_v9, %v3707_v47 }
 0x306   : > { %3008 = vtanh.f32 %v1323_v4  ;;  %v1261_v14 = vadd.f32 %v1197_v5, %v831_v44  ;;  %v1135_v15 = vmul.f32 %v1071_v6, %v837_v62  ;;  %v3728_v16 = vadd.f32 %v842_v10, %v3686_v53  ;;  %v844_v19 = vpop.f32.mrb[13].mxu1 }
 0x307   : > { %v3732_v21 = vadd.f32 %v844_v19, %v3689_v54  ;;  %v1446_v29 = vadd.f32 1.0, %v2999_v8  ;;  %3010 = vtanh.f32 %v1324_v13  ;;  %v1136_v43 = vmul.f32 %v1072_v20, %v3716_v0 }
 0x308   : > { %v3001_v25 = vpop.eup %3000  ;;  %v1199_v26 = vmul.f32 %v1135_v15, %v837_v62  ;;  %v1073_v28 = vmul.f32 0.044715, %v3728_v16  ;;  %v1325_v37 = vmul.f32 0.7978846, %v1261_v14  ;;  %v1509_v45 = vmul.f32 %v1445_v22, %v3697_v24 }
 0x309   : > { %v3003_v30 = vpop.eup %3002  ;;  %v1074_v32 = vmul.f32 0.044715, %v3732_v21  ;;  %v848_v33 = vpop.f32.mrb[14].mxu1  ;;  %v1447_v34 = vadd.f32 1.0, %v3001_v25  ;;  %v1510_v55 = vmul.f32 %v1446_v29, %v3701_v36  ;;  %v1200_v6 = vmul.f32 %v1136_v43, %v3716_v0 }
 0x30a   : > { %v1263_v38 = vadd.f32 %v1199_v26, %v837_v62  ;;  %v1137_v39 = vmul.f32 %v1073_v28, %v3728_v16  ;;  %v3746_v40 = vadd.f32 %v848_v33, %v3686_v53  ;;  %v850_v42 = vpop.f32.mrb[15].mxu1  ;;  %v1448_v44 = vadd.f32 1.0, %v3003_v30 }
 0x30b   : > { %v1511_v46 = vmul.f32 %v1447_v34, %v3703_v41  ;;  %v1138_v57 = vmul.f32 %v1074_v32, %v3732_v21  ;;  %v3756_v58 = vadd.f32 %v850_v42, %v3689_v54  ;;  %3012 = vtanh.f32 %v1325_v37 }
 0x30c   : > { %v3005_v48 = vpop.eup %3004  ;;  %v1327_v49 = vmul.f32 0.7978846, %v1263_v38  ;;  %v1201_v50 = vmul.f32 %v1137_v39, %v3728_v16  ;;  %v1075_v51 = vmul.f32 0.044715, %v3746_v40  ;;  %v1512_v61 = vmul.f32 %v1448_v44, %v3709_v52 }
 0x30d   : > { %v3007_v56 = vpop.eup %3006  ;;  %v854_v60 = vpop.f32.mrb[16].mxu1  ;;  %v2553_v24 = vpack.c.bf16 %v1511_v46, %v1509_v45  ;;  %v1449_v9 = vadd.f32 1.0, %v3005_v48  ;;  %v3771_v10 = vmul.f32 %v1138_v57, %v3732_v21  ;;  %v1076_v13 = vmul.f32 0.044715, %v3756_v58 }
 0x30e   : > { %v1265_v41 = vadd.f32 %v1201_v50, %v3728_v16  ;;  %v1139_v62 = vmul.f32 %v1075_v51, %v3746_v40  ;;  %v3762_v63 = vadd.f32 %v854_v60, %v3686_v53  ;;  %v856_v2 = vpop.f32.mrb[17].mxu1  ;;  %3014 = vtanh.f32 %v1327_v49 }
 0x30f   : > { %v3765_v36 = vadd.f32 %v856_v2, %v3689_v54  ;;  %v2551_v3 = vpack.c.bf16 %v1512_v61, %v1510_v55  ;;  %v1450_v4 = vadd.f32 1.0, %v3007_v56  ;;  %v3775_v19 = vmul.f32 0.5, %v3716_v0 }
 0x310   : > { %v3009_v5 = vpop.eup %3008  ;;  %v1203_v52 = vmul.f32 %v1139_v62, %v3746_v40  ;;  %v1077_v8 = vmul.f32 0.044715, %v3762_v63  ;;  %v1329_v22 = vmul.f32 0.7978846, %v1265_v41  ;;  %v1513_v39 = vmul.f32 %v1449_v9, %v3712_v59 }
 0x311   : > { %2552 = vmatprep.subr.bf16.mxu1 %v2551_v3  ;;  %v860_v14 = vpop.f32.mrb[18].mxu1  ;;  %v1451_v15 = vadd.f32 1.0, %v3009_v5  ;;  %v3011_v20 = vpop.eup %3010  ;;  %v1078_v30 = vmul.f32 0.044715, %v3765_v36  ;;  %v1514_v34 = vmul.f32 %v1450_v4, %v3718_v1  ;;  %v1262_v48 = vadd.f32 %v3739_v31, %v3707_v47 }
 0x312   : > { %v1267_v25 = vadd.f32 %v1203_v52, %v3746_v40  ;;  %v1141_v26 = vmul.f32 %v1077_v8, %v3762_v63  ;;  %v3780_v28 = vadd.f32 %v860_v14, %v3686_v53  ;;  %2554 = vmatpush1.bf16.xpose.msra.mxu1 %v2553_v24  ;;  %v862_v29 = vpop.f32.mrb[19].mxu1  ;;  %v1452_v33 = vadd.f32 1.0, %v3011_v20 }
 0x313   : > { %v3784_v32 = vadd.f32 %v862_v29, %v3689_v54  ;;  %v1515_v42 = vmul.f32 %v1451_v15, %v3720_v7  ;;  %v1140_v49 = vmul.f32 %v1076_v13, %v3756_v58  ;;  %3016 = vtanh.f32 %v1329_v22 }
 0x314   : > { %v1205_v37 = vmul.f32 %v1141_v26, %v3762_v63  ;;  %v1079_v38 = vmul.f32 0.044715, %v3780_v28  ;;  %v1331_v43 = vmul.f32 0.7978846, %v1267_v25  ;;  %v1516_v46 = vmul.f32 %v1452_v33, %v3723_v11 }
 0x315   : > { %v1080_v44 = vmul.f32 0.044715, %v3784_v32  ;;  %v866_v45 = vpop.f32.mrb[20].mxu1  ;;  %v2557_v56 = vpack.c.bf16 %v1515_v42, %v1513_v39  ;;  %v3013_v11 = vpop.eup %3012  ;;  %v1142_v57 = vmul.f32 %v1078_v30, %v3765_v36  ;;  %v1264_v60 = vadd.f32 %v1200_v6, %v3716_v0 }
 0x316   : > { %v1269_v1 = vadd.f32 %v1205_v37, %v3762_v63  ;;  %v1143_v50 = vmul.f32 %v1079_v38, %v3780_v28  ;;  %v3799_v51 = vadd.f32 %v866_v45, %v3686_v53  ;;  %v868_v59 = vpop.f32.mrb[21].mxu1  ;;  %v2555_v55 = vpack.c.bf16 %v1516_v46, %v1514_v34 }
 0x317   : > { %v3802_v7 = vadd.f32 %v868_v59, %v3689_v54  ;;  %3018 = vtanh.f32 %v1331_v43  ;;  %v1144_v24 = vmul.f32 %v1080_v44, %v3784_v32  ;;  %v1326_v2 = vmul.f32 0.7978846, %v1262_v48 }
 0x318   : > { %v1207_v47 = vmul.f32 %v1143_v50, %v3780_v28  ;;  %v1081_v31 = vmul.f32 0.044715, %v3799_v51  ;;  %v3015_v61 = vpop.eup %3014  ;;  %2556 = vmatprep.subr.bf16.mxu1 %v2555_v55  ;;  %v1333_v3 = vmul.f32 0.7978846, %v1269_v1  ;;  %v1328_v6 = vmul.f32 0.7978846, %v1264_v60 }
 0x319   : > { %v1082_v41 = vmul.f32 0.044715, %v3802_v7  ;;  %v872_v62 = vpop.f32.mrb[22].mxu1  ;;  %3020 = vtanh.f32 %v1326_v2  ;;  %v1453_v9 = vadd.f32 1.0, %v3013_v11  ;;  %v1455_v20 = vadd.f32 1.0, %v3015_v61 }
 0x31a   : > { %v1271_v4 = vadd.f32 %v1207_v47, %v3780_v28  ;;  %v1145_v5 = vmul.f32 %v1081_v31, %v3799_v51  ;;  %v3813_v52 = vadd.f32 %v872_v62, %v3686_v53  ;;  %2558 = vmatpush1.bf16.xpose.msra.mxu1 %v2557_v56  ;;  %v874_v8 = vpop.f32.mrb[23].mxu1  ;;  %v1204_v22 = vmul.f32 %v1140_v49, %v3756_v58 }
 0x31b   : > { %v3816_v0 = vadd.f32 %v874_v8, %v3689_v54  ;;  %v1146_v14 = vmul.f32 %v1082_v41, %v3802_v7  ;;  %v3823_v25 = vmul.f32 %v1142_v57, %v3765_v36  ;;  %3022 = vtanh.f32 %v1328_v6 }
 0x31c   : > { %v1209_v13 = vmul.f32 %v1145_v5, %v3799_v51  ;;  %v1083_v15 = vmul.f32 0.044715, %v3813_v52  ;;  %v1335_v26 = vmul.f32 0.7978846, %v1271_v4  ;;  %v3832_v39 = vmul.f32 %v1144_v24, %v3784_v32 }
 0x31d   : > { %v878_v29 = vpop.f32.mrb[24].mxu1  ;;  %v1084_v34 = vmul.f32 0.044715, %v3816_v0  ;;  %v3838_v43 = vmul.f32 %v1453_v9, %v3725_v12  ;;  %v3841_v44 = vmul.f32 %v1455_v20, %v3742_v35  ;;  %3024 = vtanh.f32 %v1333_v3  ;;  %v3017_v49 = vpop.eup %3016 }
 0x31e   : > { %v1273_v30 = vadd.f32 %v1209_v13, %v3799_v51  ;;  %v1147_v33 = vmul.f32 %v1083_v15, %v3813_v52  ;;  %v3829_v37 = vadd.f32 %v878_v29, %v3686_v53  ;;  %v880_v38 = vpop.f32.mrb[25].mxu1  ;;  %v3844_v45 = vmul.f32 %v1146_v14, %v3802_v7 }
 0x31f   : > { %v3835_v42 = vadd.f32 %v880_v38, %v3689_v54  ;;  %3026 = vtanh.f32 %v1335_v26  ;;  %v2561_v12 = vpack.c.bf16 %v3841_v44, %v3838_v43  ;;  %v1266_v35 = vadd.f32 %v3771_v10, %v3732_v21 }
 0x320   : > { %v1211_v46 = vmul.f32 %v1147_v33, %v3813_v52  ;;  %v1085_v48 = vmul.f32 0.044715, %v3829_v37  ;;  %v1337_v59 = vmul.f32 0.7978846, %v1273_v30  ;;  %v1148_v55 = vmul.f32 %v1084_v34, %v3816_v0 }
 0x321   : > { %v1086_v1 = vmul.f32 0.044715, %v3835_v42  ;;  %v884_v50 = vpop.f32.mrb[26].mxu1  ;;  %v3019_v47 = vpop.eup %3018  ;;  %v1268_v61 = vadd.f32 %v1204_v22, %v3756_v58  ;;  %v1330_v24 = vmul.f32 0.7978846, %v1266_v35  ;;  %v3866_v62 = vmul.f32 0.5, %v3732_v21 }
 0x322   : > { %v1149_v56 = vmul.f32 %v1085_v48, %v3829_v37  ;;  %v3856_v11 = vadd.f32 %v884_v50, %v3686_v53  ;;  %v886_v57 = vpop.f32.mrb[27].mxu1  ;;  %v1275_v31 = vadd.f32 %v1211_v46, %v3813_v52  ;;  %v3869_v2 = vmul.f32 0.5, %v3756_v58 }
 0x323   : > { %v3860_v60 = vadd.f32 %v886_v57, %v3689_v54  ;;  %v3021_v3 = vpop.eup %3020  ;;  %v1150_v4 = vmul.f32 %v1086_v1, %v3835_v42  ;;  %v1332_v6 = vmul.f32 0.7978846, %v1268_v61  ;;  %3028 = vtanh.f32 %v1330_v24 }
 0x324   : > { %v1213_v10 = vmul.f32 %v1149_v56, %v3829_v37  ;;  %v1087_v41 = vmul.f32 0.044715, %v3856_v11  ;;  %3030 = vtanh.f32 %v1337_v59  ;;  %v3874_v9 = vmul.f32 %v1148_v55, %v3816_v0 }
 0x325   : > { %v1088_v5 = vmul.f32 0.044715, %v3860_v60  ;;  %v890_v8 = vpop.f32.mrb[28].mxu1  ;;  %v1454_v13 = vadd.f32 1.0, %v3021_v3  ;;  %v3023_v15 = vpop.eup %3022  ;;  %v1339_v20 = vmul.f32 0.7978846, %v1275_v31  ;;  %3032 = vtanh.f32 %v1332_v6 }
 0x326   : > { %v1151_v14 = vmul.f32 %v1087_v41, %v3856_v11  ;;  %v892_v21 = vpop.f32.mrb[29].mxu1  ;;  %v3878_v58 = vadd.f32 %v890_v8, %v3686_v53  ;;  %v1277_v26 = vadd.f32 %v1213_v10, %v3829_v37  ;;  %v1456_v29 = vadd.f32 1.0, %v3023_v15 }
 0x327   : > { %v3881_v22 = vadd.f32 %v892_v21, %v3689_v54  ;;  %v1009_v33 = vmul.f32 0.5, %v3728_v16  ;;  %v3887_v34 = vmul.f32 %v1150_v4, %v3835_v42  ;;  %v1152_v38 = vmul.f32 %v1088_v5, %v3860_v60  ;;  %v3892_v50 = vpop.eup %3024 }
 0x328   : > { %v1215_v30 = vmul.f32 %v1151_v14, %v3856_v11  ;;  %v1089_v46 = vmul.f32 0.044715, %v3878_v58  ;;  %v1518_v35 = vmul.f32 %v1454_v13, %v3735_v23  ;;  %v1520_v59 = vmul.f32 %v1456_v29, %v3775_v19 }
 0x329   : > { %v1090_v48 = vmul.f32 0.044715, %v3881_v22  ;;  %v896_v1 = vpop.f32.mrb[30].mxu1  ;;  %v3027_v57 = vpop.eup %3026  ;;  %v1011_v61 = vmul.f32 0.5, %v3746_v40  ;;  %v1457_v24 = vadd.f32 1.0, %v3017_v49  ;;  %v1459_v10 = vadd.f32 1.0, %v3019_v47 }
 0x32a   : > { %v1279_v55 = vadd.f32 %v1215_v30, %v3856_v11  ;;  %v3898_v16 = vadd.f32 %v896_v1, %v3686_v53  ;;  %v898_v56 = vpop.f32.mrb[31].mxu1  ;;  %v1153_v31 = vmul.f32 %v1089_v46, %v3878_v58  ;;  %v1341_v41 = vmul.f32 0.7978846, %v1277_v26 }
 0x32b   : > { %v2559_v3 = vpack.c.bf16 %v1520_v59, %v1518_v35  ;;  %v3904_v23 = vadd.f32 %v898_v56, %v3689_v54  ;;  %v1154_v5 = vmul.f32 %v1090_v48, %v3881_v22  ;;  %v1521_v8 = vmul.f32 %v1457_v24, %v1009_v33 }
 0x32c   : > { %v1091_v4 = vmul.f32 0.044715, %v3898_v16  ;;  %v1217_v19 = vmul.f32 %v1153_v31, %v3878_v58  ;;  %v1523_v6 = vmul.f32 %v1459_v10, %v1011_v61  ;;  %3034 = vtanh.f32 %v1339_v20 }
 0x32d   : > { %v902_v13 = vpop.f32.mrb[32].mxu1  ;;  %2560 = vmatprep.subr.bf16.mxu1 %v2559_v3  ;;  %v1343_v14 = vmul.f32 0.7978846, %v1279_v55  ;;  %v3029_v21 = vpop.eup %3028  ;;  %v1092_v29 = vmul.f32 0.044715, %v3904_v23  ;;  %v3923_v33 = vmul.f32 %v1152_v38, %v3860_v60  ;;  %3036 = vtanh.f32 %v1341_v41 }
 0x32e   : > { %v1155_v40 = vmul.f32 %v1091_v4, %v3898_v16  ;;  %v3910_v49 = vadd.f32 %v902_v13, %v3686_v53  ;;  %v904_v47 = vpop.f32.mrb[33].mxu1  ;;  %2562 = vmatpush1.bf16.xpose.msra.mxu1 %v2561_v12  ;;  %v1281_v15 = vadd.f32 %v1217_v19, %v3878_v58  ;;  %v2565_v26 = vpack.c.bf16 %v1523_v6, %v1521_v8  ;;  %v3920_v30 = vpop.eup %3030 }
 0x32f   : > { %v3918_v20 = vadd.f32 %v904_v47, %v3689_v54  ;;  %v1458_v46 = vadd.f32 1.0, %v3029_v21  ;;  %v3033_v43 = vpop.eup %3032  ;;  %v3928_v44 = vmul.f32 %v1154_v5, %v3881_v22  ;;  %v1270_v35 = vadd.f32 %v3823_v25, %v3765_v36 }
 0x330   : > { %v1219_v48 = vmul.f32 %v1155_v40, %v3898_v16  ;;  %v1093_v1 = vmul.f32 0.044715, %v3910_v49  ;;  %3038 = vtanh.f32 %v1343_v14  ;;  %v1460_v55 = vadd.f32 1.0, %v3033_v43 }
 0x331   : > { %v1094_v12 = vmul.f32 0.044715, %v3918_v20  ;;  %v908_v59 = vpop.f32.mrb[34].mxu1  ;;  %v3935_v56 = vmul.f32 0.5, %v3765_v36  ;;  %v1345_v61 = vmul.f32 0.7978846, %v1281_v15  ;;  %v1156_v24 = vmul.f32 %v1092_v29, %v3904_v23 }
 0x332   : > { %v1283_v38 = vadd.f32 %v1219_v48, %v3898_v16  ;;  %v910_v31 = vpop.f32.mrb[35].mxu1  ;;  %v1157_v10 = vmul.f32 %v1093_v1, %v3910_v49  ;;  %v1272_v41 = vadd.f32 %v3832_v39, %v3784_v32  ;;  %v1522_v3 = vmul.f32 %v1458_v46, %v3866_v62 }
 0x333   : > { %v1524_v25 = vmul.f32 %v1460_v55, %v3869_v2  ;;  %v1334_v4 = vmul.f32 0.7978846, %v1270_v35  ;;  %v3944_v19 = vadd.f32 %v908_v59, %v3686_v53  ;;  %v1158_v5 = vmul.f32 %v1094_v12, %v3918_v20 }
 0x334   : > { %v1221_v36 = vmul.f32 %v1157_v10, %v3910_v49  ;;  %v3949_v8 = vmul.f32 0.5, %v3784_v32  ;;  %v1336_v6 = vmul.f32 0.7978846, %v1272_v41  ;;  %v1347_v40 = vmul.f32 0.7978846, %v1283_v38 }
 0x335   : > { %v914_v13 = vpop.f32.mrb[36].mxu1  ;;  %v2563_v14 = vpack.c.bf16 %v1524_v25, %v1522_v3  ;;  %v1095_v39 = vmul.f32 0.044715, %v3944_v19  ;;  %v1013_v62 = vmul.f32 0.5, %v3762_v63  ;;  %3040 = vtanh.f32 %v1334_v4 }
 0x336   : > { %v916_v2 = vpop.f32.mrb[37].mxu1  ;;  %v1015_v47 = vmul.f32 0.5, %v3780_v28  ;;  %v1461_v21 = vadd.f32 1.0, %v3892_v50  ;;  %v1463_v15 = vadd.f32 1.0, %v3027_v57  ;;  %v3035_v29 = vpop.eup %3034  ;;  %3042 = vtanh.f32 %v1336_v6 }
 0x337   : > { %2564 = vmatprep.subr.bf16.mxu1 %v2563_v14  ;;  %v1159_v32 = vmul.f32 %v1095_v39, %v3944_v19  ;;  %v3957_v46 = vadd.f32 %v910_v31, %v3689_v54  ;;  %v3960_v48 = vadd.f32 %v914_v13, %v3686_v53  ;;  %v1285_v63 = vadd.f32 %v1221_v36, %v3910_v49  ;;  %v3976_v55 = vpop.eup %3036 }
 0x338   : > { %2566 = vmatpush1.bf16.xpose.msra.mxu1 %v2565_v26  ;;  %v3963_v1 = vmul.f32 %v1461_v21, %v1013_v62  ;;  %v3965_v28 = vmul.f32 %v1463_v15, %v1015_v47  ;;  %v3968_v50 = vadd.f32 %v916_v2, %v3689_v54  ;;  %v3971_v43 = vmul.f32 %v1156_v24, %v3904_v23 }
 0x339   : > { %v920_v57 = vpop.f32.mrb[38].mxu1  ;;  %v1223_v12 = vmul.f32 %v1159_v32, %v3944_v19  ;;  %v1096_v35 = vmul.f32 0.044715, %v3957_v46  ;;  %v1097_v59 = vmul.f32 0.044715, %v3960_v48  ;;  %3044 = vtanh.f32 %v1345_v61 }
 0x33a   : > { %v922_v26 = vpop.f32.mrb[39].mxu1  ;;  %v3979_v38 = vmul.f32 %v1158_v5, %v3918_v20  ;;  %v2569_v31 = vpack.c.bf16 %v3965_v28, %v3963_v1  ;;  %v1098_v10 = vmul.f32 0.044715, %v3968_v50  ;;  %v3984_v24 = vpop.eup %3038  ;;  %3046 = vtanh.f32 %v1347_v40 }
 0x33b   : > { %v1287_v41 = vadd.f32 %v1223_v12, %v3944_v19  ;;  %v1161_v3 = vmul.f32 %v1097_v59, %v3960_v48  ;;  %v1274_v25 = vadd.f32 %v3844_v45, %v3802_v7  ;;  %v1349_v4 = vmul.f32 0.7978846, %v1285_v63 }
 0x33c   : > { %v3991_v61 = vmul.f32 0.5, %v3802_v7  ;;  %v1276_v36 = vadd.f32 %v3874_v9, %v3816_v0  ;;  %v3996_v5 = vadd.f32 %v920_v57, %v3686_v53  ;;  %v1160_v13 = vmul.f32 %v1096_v35, %v3957_v46 }
 0x33d   : > { %v926_v6 = vpop.f32.mrb[40].mxu1  ;;  %v1225_v14 = vmul.f32 %v1161_v3, %v3960_v48  ;;  %v1338_v40 = vmul.f32 0.7978846, %v1274_v25  ;;  %v1017_v39 = vmul.f32 0.5, %v3799_v51  ;;  %v1351_v45 = vmul.f32 0.7978846, %v1287_v41 }
 0x33e   : > { %v928_v62 = vpop.f32.mrb[41].mxu1  ;;  %v1162_v2 = vmul.f32 %v1098_v10, %v3968_v50  ;;  %v1340_v7 = vmul.f32 0.7978846, %v1276_v36  ;;  %v1099_v47 = vmul.f32 0.044715, %v3996_v5  ;;  %v1019_v21 = vmul.f32 0.5, %v3813_v52 }
 0x33f   : > { %v1289_v9 = vadd.f32 %v1225_v14, %v3960_v48  ;;  %v1465_v15 = vadd.f32 1.0, %v3920_v30  ;;  %v1467_v32 = vadd.f32 1.0, %v3035_v29  ;;  %v3041_v63 = vpop.eup %3040  ;;  %3048 = vtanh.f32 %v1338_v40 }
 0x340   : > { %v1163_v57 = vmul.f32 %v1099_v47, %v3996_v5  ;;  %v4008_v51 = vadd.f32 %v922_v26, %v3689_v54  ;;  %v4011_v12 = vadd.f32 %v926_v6, %v3686_v53  ;;  %v3043_v59 = vpop.eup %3042  ;;  %v1462_v10 = vadd.f32 1.0, %v3041_v63 }
 0x341   : > { %v932_v35 = vpop.f32.mrb[42].mxu1  ;;  %v1353_v41 = vmul.f32 0.7978846, %v1289_v9  ;;  %3050 = vtanh.f32 %v1340_v7  ;;  %v4013_v3 = vmul.f32 %v1465_v15, %v1017_v39  ;;  %v1464_v30 = vadd.f32 1.0, %v3043_v59 }
 0x342   : > { %v934_v52 = vpop.f32.mrb[43].mxu1  ;;  %v1227_v29 = vmul.f32 %v1163_v57, %v3996_v5  ;;  %v4016_v25 = vmul.f32 %v1467_v32, %v1019_v21  ;;  %v1100_v36 = vmul.f32 0.044715, %v4008_v51  ;;  %3052 = vtanh.f32 %v1349_v4 }
 0x343   : > { %v1020_v26 = vmul.f32 0.5, %v3816_v0  ;;  %v1101_v6 = vmul.f32 0.044715, %v4011_v12  ;;  %v4022_v14 = vadd.f32 %v928_v62, %v3689_v54  ;;  %v4024_v40 = vpop.eup %3044  ;;  %v1526_v39 = vmul.f32 %v1462_v10, %v3935_v56 }
 0x344   : > { %v1528_v7 = vmul.f32 %v1464_v30, %v3949_v8  ;;  %3054 = vtanh.f32 %v1351_v45  ;;  %v2573_v47 = vpack.c.bf16 %v4016_v25, %v4013_v3  ;;  %v4030_v21 = vpop.eup %3046  ;;  %v4033_v0 = vmul.f32 %v1160_v13, %v3957_v46 }
 0x345   : > { %v938_v9 = vpop.f32.mrb[44].mxu1  ;;  %3056 = vtanh.f32 %v1353_v41  ;;  %v4036_v4 = vmul.f32 %v1162_v2, %v3968_v50  ;;  %v1165_v62 = vmul.f32 %v1101_v6, %v4011_v12  ;;  %v1291_v8 = vadd.f32 %v1227_v29, %v3996_v5 }
 0x346   : > { %v940_v15 = vpop.f32.mrb[45].mxu1  ;;  %v2567_v56 = vpack.c.bf16 %v1528_v7, %v1526_v39  ;;  %v1164_v45 = vmul.f32 %v1100_v36, %v4008_v51  ;;  %v1278_v32 = vadd.f32 %v3887_v34, %v3835_v42  ;;  %v1102_v13 = vmul.f32 0.044715, %v4022_v14 }
 0x347   : > { %v1229_v63 = vmul.f32 %v1165_v62, %v4011_v12  ;;  %v1280_v57 = vadd.f32 %v3923_v33, %v3860_v60  ;;  %v4048_v2 = vadd.f32 %v932_v35, %v3686_v53  ;;  %v4051_v59 = vmul.f32 0.5, %v3835_v42 }
 0x348   : > { %2568 = vmatprep.subr.bf16.mxu1 %v2567_v56  ;;  %v4054_v10 = vmul.f32 0.5, %v3860_v60  ;;  %v1342_v41 = vmul.f32 0.7978846, %v1278_v32  ;;  %v1021_v34 = vmul.f32 0.5, %v3829_v37  ;;  %v1023_v36 = vmul.f32 0.5, %v3856_v11 }
 0x349   : > { %v944_v30 = vpop.f32.mrb[46].mxu1  ;;  %2570 = vmatpush1.bf16.xpose.msra.mxu1 %v2569_v31  ;;  %v1293_v33 = vadd.f32 %v1229_v63, %v4011_v12  ;;  %v1344_v29 = vmul.f32 0.7978846, %v1280_v57  ;;  %v1103_v35 = vmul.f32 0.044715, %v4048_v2  ;;  %v3049_v6 = vpop.eup %3048  ;;  %v1469_v60 = vadd.f32 1.0, %v3976_v55 }
 0x34a   : > { %v4063_v42 = vpop.f32.mrb[47].mxu1  ;;  %3058 = vtanh.f32 %v1342_v41  ;;  %v1471_v37 = vadd.f32 1.0, %v3984_v24  ;;  %v4068_v39 = vadd.f32 %v934_v52, %v3689_v54  ;;  %v1466_v28 = vadd.f32 1.0, %v3049_v6 }
 0x34b   : > { %v3051_v1 = vpop.eup %3050  ;;  %v1355_v31 = vmul.f32 0.7978846, %v1291_v8  ;;  %3060 = vtanh.f32 %v1344_v29  ;;  %v1167_v7 = vmul.f32 %v1103_v35, %v4048_v2  ;;  %v1166_v11 = vmul.f32 %v1102_v13, %v4022_v14 }
 0x34c   : > { %v1468_v62 = vadd.f32 1.0, %v3051_v1  ;;  %v4072_v56 = vmul.f32 %v1469_v60, %v1021_v34  ;;  %v4074_v32 = vmul.f32 %v1471_v37, %v1023_v36  ;;  %v4076_v55 = vpop.eup %3052  ;;  %v1357_v24 = vmul.f32 0.7978846, %v1293_v33 }
 0x34d   : > { %v950_v63 = vpop.f32.mrb[48].mxu1  ;;  %v1231_v52 = vmul.f32 %v1167_v7, %v4048_v2  ;;  %v1104_v57 = vmul.f32 0.044715, %v4068_v39  ;;  %v4081_v8 = vadd.f32 %v938_v9, %v3686_v53  ;;  %v1530_v13 = vmul.f32 %v1466_v28, %v3991_v61 }
 0x34e   : > { %v952_v41 = vpop.f32.mrb[49].mxu1  ;;  %v4083_v29 = vpop.eup %3054  ;;  %v1532_v34 = vmul.f32 %v1468_v62, %v1020_v26  ;;  %v2577_v35 = vpack.c.bf16 %v4074_v32, %v4072_v56  ;;  %v4089_v36 = vadd.f32 %v940_v15, %v3689_v54  ;;  %3062 = vtanh.f32 %v1355_v31 }
 0x34f   : > { %v4091_v33 = vpop.eup %3056  ;;  %v4094_v6 = vmul.f32 %v1164_v45, %v4008_v51  ;;  %v1295_v9 = vadd.f32 %v1231_v52, %v4048_v2  ;;  %v1105_v60 = vmul.f32 0.044715, %v4081_v8  ;;  %v4099_v61 = vmul.f32 %v1166_v11, %v4022_v14 }
 0x350   : > { %v2571_v37 = vpack.c.bf16 %v1532_v34, %v1530_v13  ;;  %v1106_v26 = vmul.f32 0.044715, %v4089_v36  ;;  %v1282_v15 = vadd.f32 %v3928_v44, %v3881_v22  ;;  %3064 = vtanh.f32 %v1357_v24 }
 0x351   : > { %v956_v1 = vpop.f32.mrb[50].mxu1  ;;  %v1169_v28 = vmul.f32 %v1105_v60, %v4081_v8  ;;  %v1284_v45 = vadd.f32 %v3971_v43, %v3904_v23  ;;  %v4108_v31 = vadd.f32 %v944_v30, %v3686_v53  ;;  %v1359_v62 = vmul.f32 0.7978846, %v1295_v9 }
 0x352   : > { %v4110_v7 = vpop.f32.mrb[51].mxu1  ;;  %2572 = vmatprep.subr.bf16.mxu1 %v2571_v37  ;;  %v1168_v11 = vmul.f32 %v1104_v57, %v4068_v39  ;;  %v1170_v52 = vmul.f32 %v1106_v26, %v4089_v36  ;;  %v1346_v13 = vmul.f32 0.7978846, %v1282_v15  ;;  %v1025_v30 = vmul.f32 0.5, %v3878_v58 }
 0x353   : > { %2574 = vmatpush1.bf16.xpose.msra.mxu1 %v2573_v47  ;;  %v1233_v44 = vmul.f32 %v1169_v28, %v4081_v8  ;;  %v1348_v24 = vmul.f32 0.7978846, %v1284_v45  ;;  %v1107_v43 = vmul.f32 0.044715, %v4108_v31  ;;  %v1027_v9 = vmul.f32 0.5, %v3898_v16 }
 0x354   : > { %v3059_v34 = vpop.eup %3058  ;;  %3066 = vtanh.f32 %v1346_v13  ;;  %v1473_v57 = vadd.f32 1.0, %v4024_v40  ;;  %v1475_v60 = vadd.f32 1.0, %v4030_v21  ;;  %v4135_v16 = vadd.f32 %v4063_v42, %v3689_v54 }
 0x355   : > { %v4123_v37 = vpop.f32.mrb[52].mxu1  ;;  %v3061_v26 = vpop.eup %3060  ;;  %v1470_v3 = vadd.f32 1.0, %v3059_v34  ;;  %v1297_v25 = vadd.f32 %v1233_v44, %v4081_v8  ;;  %3068 = vtanh.f32 %v1348_v24  ;;  %v1171_v47 = vmul.f32 %v1107_v43, %v4108_v31 }
 0x356   : > { %v4127_v15 = vpop.f32.mrb[53].mxu1  ;;  %v1472_v58 = vadd.f32 1.0, %v3061_v26  ;;  %v4129_v28 = vmul.f32 %v1473_v57, %v1025_v30  ;;  %v4131_v45 = vmul.f32 %v1475_v60, %v1027_v9  ;;  %v4140_v44 = vadd.f32 %v950_v63, %v3686_v53 }
 0x357   : > { %v1534_v40 = vmul.f32 %v1470_v3, %v4051_v59  ;;  %v1361_v21 = vmul.f32 0.7978846, %v1297_v25  ;;  %v1235_v13 = vmul.f32 %v1171_v47, %v4108_v31  ;;  %v1108_v30 = vmul.f32 0.044715, %v4135_v16 }
 0x358   : > { %v1536_v24 = vmul.f32 %v1472_v58, %v4054_v10  ;;  %v4147_v34 = vadd.f32 %v952_v41, %v3689_v54  ;;  %v4151_v9 = vpop.eup %3062  ;;  %v1026_v59 = vmul.f32 0.5, %v3881_v22  ;;  %v1028_v57 = vmul.f32 0.5, %v3904_v23 }
 0x359   : > { %v4149_v42 = vpop.f32.mrb[54].mxu1  ;;  %v1299_v63 = vadd.f32 %v1235_v13, %v4108_v31  ;;  %v1109_v10 = vmul.f32 0.044715, %v4140_v44  ;;  %3070 = vtanh.f32 %v1359_v62  ;;  %v4160_v3 = vmul.f32 %v1168_v11, %v4068_v39 }
 0x35a   : > { %v4157_v60 = vpop.f32.mrb[55].mxu1  ;;  %v2575_v26 = vpack.c.bf16 %v1536_v24, %v1534_v40  ;;  %v1110_v41 = vmul.f32 0.044715, %v4147_v34  ;;  %v4163_v25 = vpop.eup %3064  ;;  %v4166_v47 = vmul.f32 %v1170_v52, %v4089_v36  ;;  %v1286_v23 = vadd.f32 %v3979_v38, %v3918_v20 }
 0x35b   : > { %v1173_v22 = vmul.f32 %v1109_v10, %v4140_v44  ;;  %v1288_v58 = vadd.f32 %v4033_v0, %v3957_v46  ;;  %3072 = vtanh.f32 %v1361_v21  ;;  %v1363_v62 = vmul.f32 0.7978846, %v1299_v63 }
 0x35c   : > { %2576 = vmatprep.subr.bf16.mxu1 %v2575_v26  ;;  %v1172_v11 = vmul.f32 %v1108_v30, %v4135_v16  ;;  %v4175_v40 = vadd.f32 %v956_v1, %v3686_v53  ;;  %v1174_v38 = vmul.f32 %v1110_v41, %v4147_v34  ;;  %v1350_v24 = vmul.f32 0.7978846, %v1286_v23 }
 0x35d   : > { %v4177_v13 = vpop.f32.mrb[56].mxu1  ;;  %2578 = vmatpush1.bf16.xpose.msra.mxu1 %v2577_v35  ;;  %v1237_v52 = vmul.f32 %v1173_v22, %v4140_v44  ;;  %v1352_v0 = vmul.f32 0.7978846, %v1288_v58  ;;  %v1029_v1 = vmul.f32 0.5, %v3910_v49  ;;  %v1031_v63 = vmul.f32 0.5, %v3944_v19 }
 0x35e   : > { %v4184_v10 = vpop.f32.mrb[57].mxu1  ;;  %v3067_v21 = vpop.eup %3066  ;;  %v1111_v30 = vmul.f32 0.044715, %v4175_v40  ;;  %v1477_v26 = vadd.f32 1.0, %v4076_v55  ;;  %3074 = vtanh.f32 %v1350_v24  ;;  %v1479_v35 = vadd.f32 1.0, %v4083_v29 }
 0x35f   : > { %v3069_v43 = vpop.eup %3068  ;;  %v1474_v56 = vadd.f32 1.0, %v3067_v21  ;;  %v1301_v32 = vadd.f32 %v1237_v52, %v4140_v44  ;;  %3076 = vtanh.f32 %v1352_v0  ;;  %v4201_v55 = vadd.f32 %v4110_v7, %v3689_v54 }
 0x360   : > { %v1476_v41 = vadd.f32 1.0, %v3069_v43  ;;  %v1175_v22 = vmul.f32 %v1111_v30, %v4175_v40  ;;  %v4193_v23 = vmul.f32 %v1477_v26, %v1029_v1  ;;  %v4197_v19 = vmul.f32 %v1479_v35, %v1031_v63 }
 0x361   : > { %v4195_v58 = vpop.f32.mrb[58].mxu1  ;;  %v1538_v49 = vmul.f32 %v1474_v56, %v1026_v59  ;;  %v1365_v17 = vmul.f32 0.7978846, %v1301_v32  ;;  %v4208_v43 = vadd.f32 %v4123_v37, %v3686_v53  ;;  %v4212_v0 = vadd.f32 %v4127_v15, %v3689_v54 }
 0x362   : > { %v4203_v52 = vpop.f32.mrb[59].mxu1  ;;  %v1540_v24 = vmul.f32 %v1476_v41, %v1028_v57  ;;  %v1239_v29 = vmul.f32 %v1175_v22, %v4175_v40  ;;  %v1030_v59 = vmul.f32 0.5, %v3918_v20  ;;  %v1032_v21 = vmul.f32 0.5, %v3957_v46 }
 0x363   : > { %v1112_v30 = vmul.f32 0.044715, %v4201_v55  ;;  %v4219_v57 = vpop.eup %3070  ;;  %v1113_v37 = vmul.f32 0.044715, %v4208_v43  ;;  %v1114_v26 = vmul.f32 0.044715, %v4212_v0  ;;  %3078 = vtanh.f32 %v1363_v62 }
 0x364   : > { %v2579_v1 = vpack.c.bf16 %v1540_v24, %v1538_v49  ;;  %v1303_v63 = vadd.f32 %v1239_v29, %v4175_v40  ;;  %v4227_v20 = vmul.f32 %v1172_v11, %v4135_v16  ;;  %v1290_v46 = vadd.f32 %v4036_v4, %v3968_v50 }
 0x365   : > { %v4224_v15 = vpop.f32.mrb[60].mxu1  ;;  %v1292_v56 = vadd.f32 %v4094_v6, %v4008_v51  ;;  %v4235_v35 = vpop.eup %3072  ;;  %3080 = vtanh.f32 %v1365_v17  ;;  %v4238_v41 = vmul.f32 %v1174_v38, %v4147_v34  ;;  %v1177_v62 = vmul.f32 %v1113_v37, %v4208_v43 }
 0x366   : > { %v4233_v32 = vpop.f32.mrb[61].mxu1  ;;  %2580 = vmatprep.subr.bf16.mxu1 %v2579_v1  ;;  %v4243_v11 = vadd.f32 %v4149_v42, %v3686_v53  ;;  %v4620_v4 = vpack.c.bf16 %v4131_v45, %v4129_v28  ;;  %v1367_v6 = vmul.f32 0.7978846, %v1303_v63  ;;  %v1176_v22 = vmul.f32 %v1112_v30, %v4201_v55 }
 0x367   : > { %v1354_v49 = vmul.f32 0.7978846, %v1290_v46  ;;  %v1356_v24 = vmul.f32 0.7978846, %v1292_v56  ;;  %v1241_v17 = vmul.f32 %v1177_v62, %v4208_v43  ;;  %v1178_v38 = vmul.f32 %v1114_v26, %v4212_v0 }
 0x368   : > { %2582 = vmatpush1.bf16.xpose.msra.mxu1 %v4620_v4  ;;  %v1115_v29 = vmul.f32 0.044715, %v4243_v11  ;;  %v1033_v1 = vmul.f32 0.5, %v3960_v48  ;;  %v3075_v42 = vpop.eup %3074  ;;  %v1035_v28 = vmul.f32 0.5, %v3996_v5  ;;  %v1481_v45 = vadd.f32 1.0, %v4091_v33 }
 0x369   : > { %v4253_v37 = vpop.f32.mrb[62].mxu1  ;;  %3082 = vtanh.f32 %v1354_v49  ;;  %v1483_v30 = vadd.f32 1.0, %v4151_v9  ;;  %v3077_v46 = vpop.eup %3076  ;;  %v1478_v56 = vadd.f32 1.0, %v3075_v42  ;;  %v1305_v26 = vadd.f32 %v1241_v17, %v4208_v43 }
 0x36a   : > { %v4258_v63 = vpop.f32.mrb[63].mxu1  ;;  %3084 = vtanh.f32 %v1356_v24  ;;  %v1179_v62 = vmul.f32 %v1115_v29, %v4243_v11  ;;  %v1480_v48 = vadd.f32 1.0, %v3077_v46  ;;  %v4262_v4 = vmul.f32 %v1481_v45, %v1033_v1 }
 0x36b   : > { %v4264_v7 = vmul.f32 %v1483_v30, %v1035_v28  ;;  %v4268_v5 = vadd.f32 %v4157_v60, %v3689_v54  ;;  %v1542_v33 = vmul.f32 %v1478_v56, %v1030_v59  ;;  %v1369_v9 = vmul.f32 0.7978846, %v1305_v26 }
 0x36c   : > { %v1243_v49 = vmul.f32 %v1179_v62, %v4243_v11  ;;  %v4273_v42 = vadd.f32 %v4177_v13, %v3686_v53  ;;  %v1544_v24 = vmul.f32 %v1480_v48, %v1032_v21  ;;  %v4280_v1 = vadd.f32 %v4184_v10, %v3689_v54 }
 0x36d   : > { %v2589_v17 = vpack.c.bf16 %v4264_v7, %v4262_v4  ;;  %v1116_v29 = vmul.f32 0.044715, %v4268_v5  ;;  %v1034_v60 = vmul.f32 0.5, %v3968_v50  ;;  %v1036_v59 = vmul.f32 0.5, %v4008_v51  ;;  %v4286_v13 = vpop.eup %3078 }
 0x36e   : > { %v1307_v28 = vadd.f32 %v1243_v49, %v4243_v11  ;;  %v1117_v45 = vmul.f32 0.044715, %v4273_v42  ;;  %v2583_v21 = vpack.c.bf16 %v1544_v24, %v1542_v33  ;;  %3086 = vtanh.f32 %v1367_v6 }
 0x36f   : > { %v4289_v30 = vmul.f32 %v1176_v22, %v4201_v55  ;;  %v1118_v46 = vmul.f32 0.044715, %v4280_v1  ;;  %v4292_v56 = vpop.eup %3080  ;;  %v4295_v10 = vmul.f32 %v1178_v38, %v4212_v0  ;;  %v1294_v51 = vadd.f32 %v4099_v61, %v4022_v14 }
 0x370   : > { %v1181_v50 = vmul.f32 %v1117_v45, %v4273_v42  ;;  %v1296_v26 = vadd.f32 %v4160_v3, %v4068_v39  ;;  %2584 = vmatprep.subr.bf16.mxu1 %v2583_v21  ;;  %3088 = vtanh.f32 %v1369_v9  ;;  %v1371_v6 = vmul.f32 0.7978846, %v1307_v28 }
 0x371   : > { %v1180_v22 = vmul.f32 %v1116_v29, %v4268_v5  ;;  %v4305_v62 = vadd.f32 %v4195_v58, %v3686_v53  ;;  %v4621_v38 = vpack.c.bf16 %v4197_v19, %v4193_v23  ;;  %v1182_v61 = vmul.f32 %v1118_v46, %v4280_v1 }
 0x372   : > { %v1245_v48 = vmul.f32 %v1181_v50, %v4273_v42  ;;  %v1358_v33 = vmul.f32 0.7978846, %v1294_v51  ;;  %v1360_v49 = vmul.f32 0.7978846, %v1296_v26  ;;  %v1037_v24 = vmul.f32 0.5, %v4011_v12 }
 0x373   : > { %2586 = vmatpush1.bf16.xpose.msra.mxu1 %v4621_v38  ;;  %v3083_v3 = vpop.eup %3082  ;;  %v1119_v9 = vmul.f32 0.044715, %v4305_v62  ;;  %v1039_v29 = vmul.f32 0.5, %v4048_v2  ;;  %v1485_v58 = vadd.f32 1.0, %v4163_v25  ;;  %v1487_v19 = vadd.f32 1.0, %v4219_v57 }
 0x374   : > { %v3085_v28 = vpop.eup %3084  ;;  %v1482_v45 = vadd.f32 1.0, %v3083_v3  ;;  %v1309_v23 = vadd.f32 %v1245_v48, %v4273_v42  ;;  %3090 = vtanh.f32 %v1358_v33  ;;  %v4325_v2 = vadd.f32 %v4203_v52, %v3689_v54 }
 0x375   : > { %v1484_v21 = vadd.f32 1.0, %v3085_v28  ;;  %3092 = vtanh.f32 %v1360_v49  ;;  %v1183_v46 = vmul.f32 %v1119_v9, %v4305_v62  ;;  %v4319_v50 = vmul.f32 %v1485_v58, %v1037_v24 }
 0x376   : > { %v1546_v51 = vmul.f32 %v1482_v45, %v1034_v60  ;;  %v1373_v26 = vmul.f32 0.7978846, %v1309_v23  ;;  %v4321_v12 = vmul.f32 %v1487_v19, %v1039_v29  ;;  %v4330_v57 = vadd.f32 %v4224_v15, %v3686_v53 }
 0x377   : > { %v1548_v25 = vmul.f32 %v1484_v21, %v1036_v59  ;;  %v1247_v38 = vmul.f32 %v1183_v46, %v4305_v62  ;;  %v4334_v48 = vadd.f32 %v4233_v32, %v3689_v54  ;;  %v1038_v60 = vmul.f32 0.5, %v4022_v14 }
 0x378   : > { %v1040_v33 = vmul.f32 0.5, %v4068_v39  ;;  %v2593_v49 = vpack.c.bf16 %v4321_v12, %v4319_v50  ;;  %v1120_v52 = vmul.f32 0.044715, %v4325_v2  ;;  %v4341_v59 = vpop.eup %3086  ;;  %v1121_v15 = vmul.f32 0.044715, %v4330_v57 }
 0x379   : > { %v2587_v3 = vpack.c.bf16 %v1548_v25, %v1546_v51  ;;  %v1311_v9 = vadd.f32 %v1247_v38, %v4305_v62  ;;  %v1122_v24 = vmul.f32 0.044715, %v4334_v48  ;;  %3094 = vtanh.f32 %v1371_v6 }
 0x37a   : > { %v1244_v32 = vmul.f32 %v1180_v22, %v4268_v5  ;;  %v1298_v14 = vadd.f32 %v4166_v47, %v4089_v36  ;;  %v1300_v39 = vadd.f32 %v4227_v20, %v4135_v16  ;;  %v4351_v29 = vpop.eup %3088  ;;  %3096 = vtanh.f32 %v1373_v26 }
 0x37b   : > { %2588 = vmatprep.subr.bf16.mxu1 %v2587_v3  ;;  %v4354_v58 = vmul.f32 %v1182_v61, %v4280_v1  ;;  %v1185_v28 = vmul.f32 %v1121_v15, %v4330_v57  ;;  %v4359_v6 = vadd.f32 %v4253_v37, %v3686_v53  ;;  %v1375_v47 = vmul.f32 0.7978846, %v1311_v9 }
 0x37c   : > { %2590 = vmatpush1.bf16.xpose.msra.mxu1 %v2589_v17  ;;  %v1184_v20 = vmul.f32 %v1120_v52, %v4325_v2  ;;  %v1362_v22 = vmul.f32 0.7978846, %v1298_v14  ;;  %v1364_v45 = vmul.f32 0.7978846, %v1300_v39  ;;  %v1186_v61 = vmul.f32 %v1122_v24, %v4334_v48 }
 0x37d   : > { %v1249_v23 = vmul.f32 %v1185_v28, %v4330_v57  ;;  %v1123_v19 = vmul.f32 0.044715, %v4359_v6  ;;  %v1041_v21 = vmul.f32 0.5, %v4081_v8  ;;  %v1043_v53 = vmul.f32 0.5, %v4108_v31 }
 0x37e   : > { %v3091_v46 = vpop.eup %3090  ;;  %3098 = vtanh.f32 %v1362_v22  ;;  %v1489_v7 = vadd.f32 1.0, %v4235_v35  ;;  %v1491_v37 = vadd.f32 1.0, %v4286_v13  ;;  %v4380_v8 = vadd.f32 %v4258_v63, %v3689_v54 }
 0x37f   : > { %v3093_v4 = vpop.eup %3092  ;;  %v1486_v17 = vadd.f32 1.0, %v3091_v46  ;;  %v1313_v51 = vadd.f32 %v1249_v23, %v4330_v57  ;;  %3100 = vtanh.f32 %v1364_v45  ;;  %v1187_v26 = vmul.f32 %v1123_v19, %v4359_v6 }
 0x380   : > { %v1488_v25 = vadd.f32 1.0, %v3093_v4  ;;  %v4374_v38 = vmul.f32 %v1489_v7, %v1041_v21  ;;  %v4376_v52 = vmul.f32 %v1491_v37, %v1043_v53  ;;  %3102 = vtanh.f32 %v1375_v47 }
 0x381   : > { %v1377_v31 = vmul.f32 0.7978846, %v1313_v51  ;;  %v1042_v35 = vmul.f32 0.5, %v4089_v36  ;;  %v1251_v13 = vmul.f32 %v1187_v26, %v4359_v6  ;;  %v1550_v3 = vmul.f32 %v1486_v17, %v1038_v60 }
 0x382   : > { %v1552_v9 = vmul.f32 %v1488_v25, %v1040_v33  ;;  %v1044_v15 = vmul.f32 0.5, %v4135_v16  ;;  %v2597_v24 = vpack.c.bf16 %v4376_v52, %v4374_v38  ;;  %v1124_v39 = vmul.f32 0.044715, %v4380_v8 }
 0x383   : > { %v1315_v14 = vadd.f32 %v1251_v13, %v4359_v6  ;;  %v1302_v54 = vadd.f32 %v4238_v41, %v4147_v34  ;;  %v1304_v63 = vadd.f32 %v4289_v30, %v4201_v55  ;;  %v3095_v36 = vpop.eup %3094  ;;  %v1248_v60 = vmul.f32 %v1184_v20, %v4325_v2 }
 0x384   : > { %v2591_v28 = vpack.c.bf16 %v1552_v9, %v1550_v3  ;;  %3104 = vtanh.f32 %v1377_v31  ;;  %v1250_v16 = vmul.f32 %v1186_v61, %v4334_v48  ;;  %v3097_v33 = vpop.eup %3096  ;;  %v1306_v23 = vadd.f32 %v4295_v10, %v4212_v0 }
 0x385   : > { %v1379_v47 = vmul.f32 0.7978846, %v1315_v14  ;;  %v1366_v22 = vmul.f32 0.7978846, %v1302_v54  ;;  %v1368_v45 = vmul.f32 0.7978846, %v1304_v63  ;;  %v1188_v20 = vmul.f32 %v1124_v39, %v4380_v8 }
 0x386   : > { %2592 = vmatprep.subr.bf16.mxu1 %v2591_v28  ;;  %v1045_v41 = vmul.f32 0.5, %v4140_v44  ;;  %v1047_v19 = vmul.f32 0.5, %v4175_v40  ;;  %v1493_v30 = vadd.f32 1.0, %v4292_v56  ;;  %v1495_v21 = vadd.f32 1.0, %v4341_v59  ;;  %v4435_v28 = vpop.trf.xlu0 }
 0x387   : > { %2594 = vmatpush1.bf16.xpose.msra.mxu1 %v2593_v49  ;;  %3106 = vtanh.f32 %v1379_v47  ;;  %v1308_v61 = vadd.f32 %v1244_v32, %v4268_v5  ;;  %v1370_v46 = vmul.f32 0.7978846, %v1306_v23  ;;  %v1046_v53 = vmul.f32 0.5, %v4147_v34 }
 0x388   : > { %v3099_v10 = vpop.eup %3098  ;;  %3108 = vtanh.f32 %v1366_v22  ;;  %v4407_v44 = vmul.f32 %v1493_v30, %v1045_v41  ;;  %v4409_v40 = vmul.f32 %v1495_v21, %v1047_v19  ;;  %v1049_v50 = vmul.f32 0.5, %v4208_v43 }
 0x389   : > { %v3101_v56 = vpop.eup %3100  ;;  %v1490_v59 = vadd.f32 1.0, %v3099_v10  ;;  %3110 = vtanh.f32 %v1368_v45  ;;  %v1372_v7 = vmul.f32 0.7978846, %v1308_v61  ;;  %v1497_v32 = vadd.f32 1.0, %v4351_v29 }
 0x38a   : > { %v1492_v12 = vadd.f32 1.0, %v3101_v56  ;;  %v2601_v49 = vpack.c.bf16 %v4409_v40, %v4407_v44  ;;  %3112 = vtanh.f32 %v1370_v46  ;;  %v3103_v37 = vpop.eup %3102  ;;  %v1252_v34 = vmul.f32 %v1188_v20, %v4380_v8 }
 0x38b   : > { %3114 = vtanh.f32 %v1372_v7  ;;  %v1051_v4 = vmul.f32 0.5, %v4243_v11  ;;  %v1499_v17 = vadd.f32 1.0, %v3095_v36  ;;  %v1554_v51 = vmul.f32 %v1490_v59, %v1042_v35  ;;  %v567_v7 = vld [vmem:[%s4579_s6] sm:$0xff] }
 0x38c   : > { %v1556_v26 = vmul.f32 %v1492_v12, %v1044_v15  ;;  %v4417_v25 = vmul.f32 %v1497_v32, %v1049_v50  ;;  %v1310_v43 = vadd.f32 %v4354_v58, %v4280_v1  ;;  %v1312_v13 = vadd.f32 %v1248_v60, %v4325_v2 }
 0x38d   : > { %v4421_v31 = vmul.f32 %v1499_v17, %v1051_v4  ;;  %v1053_v29 = vmul.f32 0.5, %v4273_v42  ;;  %v1055_v3 = vmul.f32 0.5, %v4305_v62  ;;  %v1501_v11 = vadd.f32 1.0, %v3097_v33 }
 0x38e   : > { %v3105_v9 = vpop.eup %3104  ;;  %v2595_v14 = vpack.c.bf16 %v1556_v26, %v1554_v51  ;;  %v1374_v39 = vmul.f32 0.7978846, %v1310_v43  ;;  %v1503_v54 = vadd.f32 1.0, %v3103_v37  ;;  %v1048_v35 = vmul.f32 0.5, %v4201_v55 }
 0x38f   : > { %v1050_v15 = vmul.f32 0.5, %v4212_v0  ;;  %v2605_v58 = vpack.c.bf16 %v4421_v31, %v4417_v25  ;;  %v1376_v63 = vmul.f32 0.7978846, %v1312_v13  ;;  %v4430_v36 = vmul.f32 %v1501_v11, %v1053_v29  ;;  %v1786_v31 = vld [vmem:[#allocation4 + $0x8] sm:$0xff] }
 0x390   : > { %2596 = vmatprep.subr.bf16.mxu1 %v2595_v14  ;;  %3116 = vtanh.f32 %v1374_v39  ;;  %v4432_v42 = vmul.f32 %v1503_v54, %v1055_v3  ;;  %v1314_v62 = vadd.f32 %v1250_v16, %v4334_v48  ;;  %v1316_v55 = vadd.f32 %v1252_v34, %v4380_v8 }
 0x391   : > { %v3107_v60 = vpop.eup %3106  ;;  %2598 = vmatpush1.bf16.xpose.msra.mxu1 %v2597_v24  ;;  %3118 = vtanh.f32 %v1376_v63  ;;  %v1057_v0 = vmul.f32 0.5, %v4330_v57  ;;  %v1059_v33 = vmul.f32 0.5, %v4359_v6  ;;  %v1505_v16 = vadd.f32 1.0, %v3105_v9  ;;  %v3135_v63 = vld [vmem:[%s3494_s25 + $0x8] sm:$0xff] }
 0x392   : > { %v3109_v47 = vpop.eup %3108  ;;  %v2609_v22 = vpack.c.bf16 %v4432_v42, %v4430_v36  ;;  %v1378_v45 = vmul.f32 0.7978846, %v1314_v62  ;;  %v1507_v23 = vadd.f32 1.0, %v3107_v60  ;;  %v1052_v30 = vmul.f32 0.5, %v4268_v5  ;;  %v1788_v60 = vld [vmem:[#allocation4 + $0x18] sm:$0xff] }
 0x393   : > { %v3111_v41 = vpop.eup %3110  ;;  %v1494_v19 = vadd.f32 1.0, %v3109_v47  ;;  %v1380_v38 = vmul.f32 0.7978846, %v1316_v55  ;;  %v1569_v21 = vmul.f32 %v1505_v16, %v1057_v0  ;;  %v2988_v59 = vunpack.i.l.bf16 %v4435_v28  ;;  %v1792_v55 = vld [vmem:[#allocation4 + $0x38] sm:$0xff]  ;;  %v1785_v0 = vld [vmem:[#allocation4] sm:$0xff]  ;;  %v1791_v16 = vld [vmem:[#allocation4 + $0x30] sm:$0xff] }
 0x394   : > { %v3113_v52 = vpop.eup %3112  ;;  %v1496_v24 = vadd.f32 1.0, %v3111_v41  ;;  %3120 = vtanh.f32 %v1378_v45  ;;  %v1571_v20 = vmul.f32 %v1507_v23, %v1059_v33  ;;  %v3287_v32 = vmov 0   ;;  %v1789_v33 = vld [vmem:[#allocation4 + $0x20] sm:$0xff]  ;;  %v1787_v45 = vld [vmem:[#allocation4 + $0x10] sm:$0xff]  ;;  %v1794_v23 = vld [vmem:[#allocation4 + $0x48] sm:$0xff] }
 0x395   : > { %v3115_v57 = vpop.eup %3114  ;;  %v1558_v61 = vmul.f32 %v1494_v19, %v1046_v53  ;;  %v1498_v6 = vadd.f32 1.0, %v3113_v52  ;;  %3122 = vtanh.f32 %v1380_v38  ;;  %1701 = vmatprep.mubr.f32.mxu1 %v2988_v59  ;;  %2992 = vset.pattern.permute.xlu1 %v3287_v32  ;;  %v1054_v17 = vmul.f32 0.5, %v4280_v1  ;;  %v1798_v19 = vld [vmem:[#allocation4 + $0x68] sm:$0xff]  ;;  %v1800_v38 = vld [vmem:[#allocation4 + $0x78] sm:$0xff] }
 0x396   : > { %v1560_v46 = vmul.f32 %v1496_v24, %v1048_v35  ;;  %v1500_v10 = vadd.f32 1.0, %v3115_v57  ;;  %v2613_v56 = vpack.c.bf16 %v1571_v20, %v1569_v21  ;;  %1712 = vperm.xlu1 %2992, %v567_v7   ;;  %2993 = vset.pattern.permute.xlu0 %v3287_v32  ;;  %v1056_v51 = vmul.f32 0.5, %v4325_v2  ;;  %v3134_v35 = vld [vmem:[%s3494_s25] sm:$0xff]  ;;  %v1795_v57 = vld [vmem:[#allocation4 + $0x50] sm:$0xff]  ;;  %v1804_v7 = vld [vmem:[#allocation4 + $0x98] sm:$0xff]  ;;  %s4624_s25 = sld [smem:[#allocation22_spill]] }
 0x397   : > { %v1562_v50 = vmul.f32 %v1498_v6, %v1050_v15  ;;  %v1058_v39 = vmul.f32 0.5, %v4334_v48  ;;  %v1060_v11 = vmul.f32 0.5, %v4380_v8  ;;  %v2991_v2 = vunpack.i.h.bf16 %v4435_v28  ;;  %v1793_v21 = vld [vmem:[#allocation4 + $0x40] sm:$0xff]  ;;  %v1799_v6 = vld [vmem:[#allocation4 + $0x70] sm:$0xff] }
 0x398   : > { %v2599_v5 = vpack.c.bf16 %v1560_v46, %v1558_v61  ;;  %v1564_v12 = vmul.f32 %v1500_v10, %v1052_v30  ;;  %v2679_v47 = vpack.c.bf16 %v1792_v55, %v1788_v60  ;;  %v2681_v41 = vpack.c.bf16 %v1791_v16, %v1787_v45  ;;  %v1796_v30 = vld [vmem:[#allocation4 + $0x58] sm:$0xff]  ;;  %v1797_v20 = vld [vmem:[#allocation4 + $0x60] sm:$0xff]  ;;  %v1802_v46 = vld [vmem:[#allocation4 + $0x88] sm:$0xff] }
 0x399   : > { %v2619_v52 = vpack.c.bf16 %v1798_v19, %v1794_v23  ;;  %v2683_v24 = vpack.c.bf16 %v1800_v38, %v1796_v30  ;;  %v2621_v61 = vpack.c.bf16 %v1797_v20, %v1793_v21  ;;  %v1806_v10 = vld [vmem:[#allocation4 + $0xa8] sm:$0xff]  ;;  %v1805_v32 = vld [vmem:[#allocation4 + $0xa0] sm:$0xff]  ;;  %v1831_v45 = vld [vmem:[#allocation4 + $0x170] sm:$0xff] }
 0x39a   : > { %v3117_v53 = vpop.eup %3116  ;;  %2600 = vmatprep.subr.bf16.mxu1 %v2599_v5  ;;  %v2603_v37 = vpack.c.bf16 %v1564_v12, %v1562_v50  ;;  %v2623_v59 = vpack.c.bf16 %v1806_v10, %v1802_v46  ;;  %v1808_v5 = vld [vmem:[#allocation4 + $0xb8] sm:$0xff]  ;;  %v1801_v50 = vld [vmem:[#allocation4 + $0x80] sm:$0xff]  ;;  %v1834_v16 = vld [vmem:[#allocation4 + $0x188] sm:$0xff] }
 0x39b   : > { %v3119_v34 = vpop.eup %3118  ;;  %2602 = vmatpush1.bf16.xpose.msra.mxu1 %v2601_v49  ;;  %v1502_v4 = vadd.f32 1.0, %v3117_v53  ;;  %v2687_v12 = vpack.c.bf16 %v1808_v5, %v1804_v7  ;;  %v1803_v53 = vld [vmem:[#allocation4 + $0x90] sm:$0xff]  ;;  %v1838_v23 = vld [vmem:[#allocation4 + $0x1a8] sm:$0xff]  ;;  %v1840_v19 = vld [vmem:[#allocation4 + $0x1b8] sm:$0xff] }
 0x39c   : > { %2604 = vmatprep.subr.bf16.mxu1 %v2603_v37  ;;  %v1504_v26 = vadd.f32 1.0, %v3119_v34  ;;  %v1807_v37 = vld [vmem:[#allocation4 + $0xb0] sm:$0xff]  ;;  %v2625_v34 = vpack.c.bf16 %v1805_v32, %v1801_v50  ;;  %v1837_v21 = vld [vmem:[#allocation4 + $0x1a0] sm:$0xff]  ;;  %v1846_v46 = vld [vmem:[#allocation4 + $0x1e8] sm:$0xff]  ;;  %s4625_s20 = smov %s4624_s25  ;;  %s4526_s21 = scalar_lea.hbm %s4624_s25, %s2550_s19 }
 0x39d   : > { %v1566_v13 = vmul.f32 %v1502_v4, %v1054_v17  ;;  %v1810_v4 = vld [vmem:[#allocation4 + $0xc8] sm:$0xff]  ;;  %v1835_v20 = vld [vmem:[#allocation4 + $0x190] sm:$0xff]  ;;  %v1844_v10 = vld [vmem:[#allocation4 + $0x1d8] sm:$0xff] }
 0x39e   : > { %v3121_v43 = vpop.eup %3120  ;;  %v1568_v29 = vmul.f32 %v1504_v26, %v1056_v51  ;;  %v1814_v17 = vld [vmem:[#allocation4 + $0xe8] sm:$0xff]  ;;  %v1812_v51 = vld [vmem:[#allocation4 + $0xd8] sm:$0xff]  ;;  %v2689_v26 = vpack.c.bf16 %v1807_v37, %v1803_v53  ;;  %v1841_v50 = vld [vmem:[#allocation4 + $0x1c0] sm:$0xff] }
 0x39f   : > { %v3123_v3 = vpop.eup %3122  ;;  %v1506_v9 = vadd.f32 1.0, %v3121_v43  ;;  %v2627_v43 = vpack.c.bf16 %v1814_v17, %v1810_v4  ;;  %v1843_v32 = vld [vmem:[#allocation4 + $0x1d0] sm:$0xff]  ;;  %v1854_v4 = vld [vmem:[#allocation4 + $0x228] sm:$0xff]  ;;  %v1852_v17 = vld [vmem:[#allocation4 + $0x218] sm:$0xff] }
 0x3a0   : > { %v2607_v14 = vpack.c.bf16 %v1568_v29, %v1566_v13  ;;  %v1508_v44 = vadd.f32 1.0, %v3123_v3  ;;  %v1816_v13 = vld [vmem:[#allocation4 + $0xf8] sm:$0xff]  ;;  %v1809_v29 = vld [vmem:[#allocation4 + $0xc0] sm:$0xff]  ;;  %v1847_v37 = vld [vmem:[#allocation4 + $0x1f0] sm:$0xff] }
 0x3a1   : > { %v1570_v40 = vmul.f32 %v1506_v9, %v1058_v39  ;;  %v1813_v3 = vld [vmem:[#allocation4 + $0xe0] sm:$0xff]  ;;  %v2691_v9 = vpack.c.bf16 %v1816_v13, %v1812_v51  ;;  %v1815_v39 = vld [vmem:[#allocation4 + $0xf0] sm:$0xff]  ;;  %v1856_v51 = vld [vmem:[#allocation4 + $0x238] sm:$0xff] }
 0x3a2   : > { %v1572_v49 = vmul.f32 %v1508_v44, %v1060_v11  ;;  %v1818_v11 = vld [vmem:[#allocation4 + $0x108] sm:$0xff] }
 0x3a3   : > { %2606 = vmatpush1.bf16.xpose.msra.mxu1 %v2605_v58  ;;  %v1790_v58 = vld [vmem:[#allocation4 + $0x28] sm:$0xff] }
 0x3a4   : > { %2608 = vmatprep.subr.bf16.mxu1 %v2607_v14  ;;  %v2611_v1 = vpack.c.bf16 %v1572_v49, %v1570_v40  ;;  %v2615_v28 = vpack.c.bf16 %v1790_v58, %v1786_v31  ;;  %v1811_v14 = vld [vmem:[#allocation4 + $0xd0] sm:$0xff]  ;;  %v1822_v44 = vld [vmem:[#allocation4 + $0x128] sm:$0xff]  ;;  %v1820_v40 = vld [vmem:[#allocation4 + $0x118] sm:$0xff] }
 0x3a5   : > { %v1824_v49 = vld [vmem:[#allocation4 + $0x138] sm:$0xff] }
 0x3a6   : > { %2616 = vmatprep.subr.bf16.mxu0 %v2615_v28  ;;  %v1828_v31 = vld [vmem:[#allocation4 + $0x158] sm:$0xff] }
 0x3a7   : > { %v1832_v58 = vld [vmem:[#allocation4 + $0x178] sm:$0xff] }
 0x3ab   : > { %2610 = vmatpush1.bf16.xpose.msra.mxu1 %v2609_v22  ;;  %v2617_v22 = vpack.c.bf16 %v1789_v33, %v1785_v0  ;;  %v1825_v0 = vld [vmem:[#allocation4 + $0x140] sm:$0xff] }
 0x3ac   : > { %2612 = vmatprep.subr.bf16.mxu1 %v2611_v1  ;;  %v2629_v1 = vpack.c.bf16 %v1813_v3, %v1809_v29  ;;  %v1829_v33 = vld [vmem:[#allocation4 + $0x160] sm:$0xff] }
 0x3ad   : > { %2618 = vmatpush1.bf16.msra.mxu0 %v2617_v22  ;;  %v2699_v22 = vpack.c.bf16 %v1832_v58, %v1828_v31  ;;  %v2637_v30 = vpack.c.bf16 %v1829_v33, %v1825_v0  ;;  %v1849_v29 = vld [vmem:[#allocation4 + $0x200] sm:$0xff]  ;;  %v1868_v31 = vld [vmem:[#allocation4 + $0x298] sm:$0xff] }
 0x3ae   : > { %2620 = vmatprep.subr.bf16.mxu0 %v2619_v52  ;;  %v2639_v52 = vpack.c.bf16 %v1838_v23, %v1834_v16  ;;  %v1853_v3 = vld [vmem:[#allocation4 + $0x220] sm:$0xff]  ;;  %v1872_v58 = vld [vmem:[#allocation4 + $0x2b8] sm:$0xff] }
 0x3af   : > { %v1865_v0 = vld [vmem:[#allocation4 + $0x280] sm:$0xff] }
 0x3b0   : > { %v1869_v33 = vld [vmem:[#allocation4 + $0x2a0] sm:$0xff] }
 0x3b1   : > { %2622 = vmatpush1.bf16.msra.mxu0 %v2621_v61  ;;  %v1839_v61 = vld [vmem:[#allocation4 + $0x1b0] sm:$0xff]  ;;  %v2657_v16 = vpack.c.bf16 %v1869_v33, %v1865_v0  ;;  %v1906_v0 = vld [vmem:[#allocation4 + $0x3c8] sm:$0xff] }
 0x3b2   : > { %2624 = vmatprep.subr.bf16.mxu0 %v2623_v59  ;;  %v2705_v7 = vpack.c.bf16 %v1839_v61, %v1835_v20  ;;  %v1874_v20 = vld [vmem:[#allocation4 + $0x2c8] sm:$0xff]  ;;  %v1876_v61 = vld [vmem:[#allocation4 + $0x2d8] sm:$0xff] }
 0x3b3   : > { %2614 = vmatpush1.bf16.xpose.msra.mxu1 %v2613_v56  ;;  %v2685_v56 = vpack.c.bf16 %v1799_v6, %v1795_v57  ;;  %v1842_v6 = vld [vmem:[#allocation4 + $0x1c8] sm:$0xff] }
 0x3b4   : > { %2680 = vmatprep.subr.bf16.mxu1 %v2679_v47  ;;  %v1827_v47 = vld [vmem:[#allocation4 + $0x150] sm:$0xff]  ;;  %v2643_v5 = vpack.c.bf16 %v1846_v46, %v1842_v6  ;;  %v1880_v46 = vld [vmem:[#allocation4 + $0x2f8] sm:$0xff]  ;;  %v1910_v33 = vld [vmem:[#allocation4 + $0x3e8] sm:$0xff] }
 0x3b5   : > { %2626 = vmatpush1.bf16.msra.mxu0 %v2625_v34  ;;  %v2701_v38 = vpack.c.bf16 %v1831_v45, %v1827_v47  ;;  %v1850_v34 = vld [vmem:[#allocation4 + $0x208] sm:$0xff]  ;;  %v2719_v47 = vpack.c.bf16 %v1872_v58, %v1868_v31  ;;  %v1871_v45 = vld [vmem:[#allocation4 + $0x2b0] sm:$0xff]  ;;  %v1897_v31 = vld [vmem:[#allocation4 + $0x380] sm:$0xff] }
 0x3b6   : > { %2628 = vmatprep.subr.bf16.mxu0 %v2627_v43  ;;  %v2709_v43 = vpack.c.bf16 %v1847_v37, %v1843_v32  ;;  %v2647_v13 = vpack.c.bf16 %v1854_v4, %v1850_v34  ;;  %v1884_v37 = vld [vmem:[#allocation4 + $0x318] sm:$0xff]  ;;  %v1901_v58 = vld [vmem:[#allocation4 + $0x3a0] sm:$0xff] }
 0x3b7   : > { %v1888_v34 = vld [vmem:[#allocation4 + $0x338] sm:$0xff] }
 0x3b9   : > { %2630 = vmatpush1.bf16.msra.mxu0 %v2629_v1  ;;  %v2649_v1 = vpack.c.bf16 %v1853_v3, %v1849_v29  ;;  %v1887_v29 = vld [vmem:[#allocation4 + $0x330] sm:$0xff]  ;;  %v1890_v3 = vld [vmem:[#allocation4 + $0x348] sm:$0xff] }
 0x3ba   : > { %1702 = vmatmul.mubr.f32.vlgmr.msra.gmra.mrb[64].mxu1 %v2991_v2  ;;  %v2693_v2 = vpack.c.bf16 %v1815_v39, %v1811_v14  ;;  %v2711_v14 = vpack.c.bf16 %v1856_v51, %v1852_v17  ;;  %v1855_v39 = vld [vmem:[#allocation4 + $0x230] sm:$0xff]  ;;  %v2727_v17 = vpack.c.bf16 %v1888_v34, %v1884_v37  ;;  %v1881_v51 = vld [vmem:[#allocation4 + $0x300] sm:$0xff] }
 0x3bb   : > { %2682 = vmatpush1.bf16.msra.mxu1 %v2681_v41  ;;  %v1836_v41 = vld [vmem:[#allocation4 + $0x198] sm:$0xff] }
 0x3bc   : > { %2684 = vmatprep.subr.bf16.mxu1 %v2683_v24  ;;  %v1833_v24 = vld [vmem:[#allocation4 + $0x180] sm:$0xff]  ;;  %v2703_v57 = vpack.c.bf16 %v1840_v19, %v1836_v41 }
 0x3bd   : > { %v2641_v59 = vpack.c.bf16 %v1837_v21, %v1833_v24 }
 0x3bf   : > { %2686 = vmatpush1.bf16.msra.mxu1 %v2685_v56  ;;  %v1848_v56 = vld [vmem:[#allocation4 + $0x1f8] sm:$0xff] }
 0x3c0   : > { %2688 = vmatprep.subr.bf16.mxu1 %v2687_v12  ;;  %v1845_v12 = vld [vmem:[#allocation4 + $0x1e0] sm:$0xff]  ;;  %v2707_v53 = vpack.c.bf16 %v1848_v56, %v1844_v10 }
 0x3c1   : > { %v1873_v10 = vld [vmem:[#allocation4 + $0x2c0] sm:$0xff] }
 0x3c2   : > { %v1877_v56 = vld [vmem:[#allocation4 + $0x2e0] sm:$0xff] }
 0x3c3   : > { %2690 = vmatpush1.bf16.msra.mxu1 %v2689_v26  ;;  %v2645_v26 = vpack.c.bf16 %v1845_v12, %v1841_v50  ;;  %v1879_v50 = vld [vmem:[#allocation4 + $0x2f0] sm:$0xff]  ;;  %v1882_v12 = vld [vmem:[#allocation4 + $0x308] sm:$0xff] }
 0x3c4   : > { %2692 = vmatprep.subr.bf16.mxu1 %v2691_v9  ;;  %v1851_v9 = vld [vmem:[#allocation4 + $0x210] sm:$0xff] }
 0x3c7   : > { %2694 = vmatpush1.bf16.msra.mxu1 %v2693_v2  ;;  %v2713_v2 = vpack.c.bf16 %v1855_v39, %v1851_v9  ;;  %v1894_v9 = vld [vmem:[#allocation4 + $0x368] sm:$0xff] }
 0x3c8   : > { %v2667_v39 = vpack.c.bf16 %v1894_v9, %v1890_v3 }
 0x415   : > { %v1713_v48 = vpop.permute.xlu1 %1712 }
 0x48d   : > { %v1703_v54 = vpop.f32.mrb[64].mxu1 }
 0x48e   : > { %v1708_v8 = vadd.f32 %v3134_v35, %v1703_v54  ;;  %v1705_v15 = vpop.f32.mrb[65].mxu1  ;;  %v2631_v54 = vpack.c.bf16 %v1822_v44, %v1818_v11  ;;  %v1821_v35 = vld [vmem:[#allocation4 + $0x120] sm:$0xff]  ;;  %v1858_v11 = vld [vmem:[#allocation4 + $0x248] sm:$0xff] }
 0x48f   : > { %v1709_v36 = vadd.f32 %v3135_v63, %v1705_v15  ;;  %v2695_v15 = vpack.c.bf16 %v1824_v49, %v1820_v40  ;;  %v1823_v63 = vld [vmem:[#allocation4 + $0x130] sm:$0xff]  ;;  %v1862_v44 = vld [vmem:[#allocation4 + $0x268] sm:$0xff]  ;;  %v1860_v40 = vld [vmem:[#allocation4 + $0x258] sm:$0xff] }
 0x490   : > { %v4463_v42 = vadd.f32 %v1713_v48, %v1708_v8  ;;  %v1819_v8 = vld [vmem:[#allocation4 + $0x110] sm:$0xff]  ;;  %2632 = vmatprep.subr.bf16.mxu0 %v2631_v54  ;;  %v1864_v49 = vld [vmem:[#allocation4 + $0x278] sm:$0xff]  ;;  %v2651_v54 = vpack.c.bf16 %v1862_v44, %v1858_v11 }
 0x491   : > { %v4465_v62 = vadd.f32 %v1713_v48, %v1709_v36  ;;  %v1817_v48 = vld [vmem:[#allocation4 + $0x100] sm:$0xff]  ;;  %v1826_v36 = vld [vmem:[#allocation4 + $0x148] sm:$0xff]  ;;  %v2697_v28 = vpack.c.bf16 %v1823_v63, %v1819_v8  ;;  %2696 = vmatprep.subr.bf16.mxu1 %v2695_v15  ;;  %v1859_v8 = vld [vmem:[#allocation4 + $0x250] sm:$0xff]  ;;  %v2715_v15 = vpack.c.bf16 %v1864_v49, %v1860_v40 }
 0x492   : > { %v2633_v60 = vpack.c.bf16 %v1821_v35, %v1817_v48  ;;  %v1857_v48 = vld [vmem:[#allocation4 + $0x240] sm:$0xff]  ;;  %v1863_v63 = vld [vmem:[#allocation4 + $0x270] sm:$0xff]  ;;  %v1892_v11 = vld [vmem:[#allocation4 + $0x358] sm:$0xff] }
 0x493   : > { %v1723_v25 = vadd.f32 %v4465_v62, %v4463_v42  ;;  %2698 = vmatpush1.bf16.msra.mxu1 %v2697_v28  ;;  %v1861_v35 = vld [vmem:[#allocation4 + $0x260] sm:$0xff]  ;;  %v2717_v28 = vpack.c.bf16 %v1863_v63, %v1859_v8  ;;  %v1896_v44 = vld [vmem:[#allocation4 + $0x378] sm:$0xff]  ;;  %v1902_v8 = vld [vmem:[#allocation4 + $0x3a8] sm:$0xff] }
 0x494   : > { %2634 = vmatpush1.bf16.msra.mxu0 %v2633_v60  ;;  %2700 = vmatprep.subr.bf16.mxu1 %v2699_v22  ;;  %v2653_v60 = vpack.c.bf16 %v1861_v35, %v1857_v48  ;;  %v1867_v22 = vld [vmem:[#allocation4 + $0x290] sm:$0xff]  ;;  %v1889_v40 = vld [vmem:[#allocation4 + $0x340] sm:$0xff]  ;;  %v2731_v49 = vpack.c.bf16 %v1896_v44, %v1892_v11  ;;  %v1898_v35 = vld [vmem:[#allocation4 + $0x388] sm:$0xff] }
 0x495   : > { %1724 = vadd.xlane.f32.xlu0 %v1723_v25  ;;  %v1830_v25 = vld [vmem:[#allocation4 + $0x168] sm:$0xff]  ;;  %v2721_v23 = vpack.c.bf16 %v1871_v45, %v1867_v22  ;;  %v1912_v22 = vld [vmem:[#allocation4 + $0x3f8] sm:$0xff]  ;;  %v2673_v45 = vpack.c.bf16 %v1901_v58, %v1897_v31  ;;  %v2119_v11 = vld [vmem:[#allocation7 + $0x20] sm:$0xff] }
 0x496   : > { %v2635_v55 = vpack.c.bf16 %v1830_v25, %v1826_v36  ;;  %v1866_v36 = vld [vmem:[#allocation4 + $0x288] sm:$0xff]  ;;  %v2121_v44 = vld [vmem:[#allocation7 + $0x30] sm:$0xff] }
 0x497   : > { %2702 = vmatpush1.bf16.msra.mxu1 %v2701_v38  ;;  %v1870_v25 = vld [vmem:[#allocation4 + $0x2a8] sm:$0xff] }
 0x498   : > { %2636 = vmatprep.subr.bf16.mxu0 %v2635_v55  ;;  %2704 = vmatprep.subr.bf16.mxu1 %v2703_v57  ;;  %v2655_v55 = vpack.c.bf16 %v1870_v25, %v1866_v36  ;;  %v1878_v57 = vld [vmem:[#allocation4 + $0x2e8] sm:$0xff]  ;;  %v2671_v36 = vpack.c.bf16 %v1902_v8, %v1898_v35  ;;  %v1904_v25 = vld [vmem:[#allocation4 + $0x3b8] sm:$0xff] }
 0x499   : > { %2638 = vmatpush1.bf16.msra.mxu0 %v2637_v30  ;;  %v2659_v6 = vpack.c.bf16 %v1878_v57, %v1874_v20 }
 0x49a   : > { %2640 = vmatprep.subr.bf16.mxu0 %v2639_v52 }
 0x49b   : > { %2706 = vmatpush1.bf16.msra.mxu1 %v2705_v7  ;;  %v2661_v7 = vpack.c.bf16 %v1877_v56, %v1873_v10 }
 0x49c   : > { %2708 = vmatprep.subr.bf16.mxu1 %v2707_v53  ;;  %v1886_v53 = vld [vmem:[#allocation4 + $0x328] sm:$0xff] }
 0x49d   : > { %2642 = vmatpush1.bf16.msra.mxu0 %v2641_v59  ;;  %v2723_v59 = vpack.c.bf16 %v1880_v46, %v1876_v61  ;;  %v2663_v4 = vpack.c.bf16 %v1886_v53, %v1882_v12  ;;  %v2116_v61 = vld [vmem:[#allocation7 + $0x8] sm:$0xff] }
 0x49e   : > { %2644 = vmatprep.subr.bf16.mxu0 %v2643_v5  ;;  %v1875_v5 = vld [vmem:[#allocation4 + $0x2d0] sm:$0xff] }
 0x49f   : > { %2710 = vmatpush1.bf16.msra.mxu1 %v2709_v43  ;;  %v2725_v32 = vpack.c.bf16 %v1879_v50, %v1875_v5  ;;  %v1883_v43 = vld [vmem:[#allocation4 + $0x310] sm:$0xff]  ;;  %v1722_v5 = vld [vmem:[%s4581_s8] sm:$0x3] }
 0x4a0   : > { %2712 = vmatprep.subr.bf16.mxu1 %v2711_v14  ;;  %v2729_v14 = vpack.c.bf16 %v1887_v29, %v1883_v43  ;;  %v1756_v37 = vrot.slane %v1722_v5, %v3508_v18  ;;  %v1760_v34 = vrot.slane %v1722_v5, %v3519_v27  ;;  %v2122_v29 = vld [vmem:[#allocation7 + $0x38] sm:$0xff]  ;;  %v2147_v5 = vld [vmem:[#allocation7 + $0x100] sm:$0xff] }
 0x4a1   : > { %2646 = vmatpush1.bf16.msra.mxu0 %v2645_v26  ;;  %v1885_v26 = vld [vmem:[#allocation4 + $0x320] sm:$0xff] }
 0x4a2   : > { %2648 = vmatprep.subr.bf16.mxu0 %v2647_v13  ;;  %v2665_v13 = vpack.c.bf16 %v1885_v26, %v1881_v51  ;;  %v2117_v51 = vld [vmem:[#allocation7 + $0x10] sm:$0xff] }
 0x4a3   : > { %2714 = vmatpush1.bf16.msra.mxu1 %v2713_v2  ;;  %v1891_v2 = vld [vmem:[#allocation4 + $0x350] sm:$0xff] }
 0x4a4   : > { %2716 = vmatprep.subr.bf16.mxu1 %v2715_v15  ;;  %v1900_v15 = vld [vmem:[#allocation4 + $0x398] sm:$0xff] }
 0x4a5   : > { %2650 = vmatpush1.bf16.msra.mxu0 %v2649_v1  ;;  %v1893_v1 = vld [vmem:[#allocation4 + $0x360] sm:$0xff] }
 0x4a6   : > { %2652 = vmatprep.subr.bf16.mxu0 %v2651_v54  ;;  %v1895_v54 = vld [vmem:[#allocation4 + $0x370] sm:$0xff]  ;;  %v2669_v48 = vpack.c.bf16 %v1893_v1, %v1889_v40  ;;  %v2126_v40 = vld [vmem:[#allocation7 + $0x58] sm:$0xff]  ;;  %v2123_v1 = vld [vmem:[#allocation7 + $0x40] sm:$0xff] }
 0x4a7   : > { %2718 = vmatpush1.bf16.msra.mxu1 %v2717_v28  ;;  %v2733_v63 = vpack.c.bf16 %v1895_v54, %v1891_v2  ;;  %v1899_v28 = vld [vmem:[#allocation4 + $0x390] sm:$0xff]  ;;  %v2128_v54 = vld [vmem:[#allocation7 + $0x68] sm:$0xff] }
 0x4a8   : > { %2720 = vmatprep.subr.bf16.mxu1 %v2719_v47  ;;  %v1908_v47 = vld [vmem:[#allocation4 + $0x3d8] sm:$0xff]  ;;  %v2125_v2 = vld [vmem:[#allocation7 + $0x50] sm:$0xff] }
 0x4a9   : > { %2654 = vmatpush1.bf16.msra.mxu0 %v2653_v60  ;;  %v2735_v60 = vpack.c.bf16 %v1904_v25, %v1900_v15  ;;  %v2753_v35 = vpack.c.bf16 %v2125_v2, %v2123_v1  ;;  %v2127_v15 = vld [vmem:[#allocation7 + $0x60] sm:$0xff]  ;;  %v2134_v25 = vld [vmem:[#allocation7 + $0x98] sm:$0xff]  ;;  %v2165_v2 = vld [vmem:[#allocation7 + $0x190] sm:$0xff] }
 0x4aa   : > { %2656 = vmatprep.subr.bf16.mxu0 %v2655_v55  ;;  %v1903_v55 = vld [vmem:[#allocation4 + $0x3b0] sm:$0xff]  ;;  %v2163_v1 = vld [vmem:[#allocation7 + $0x180] sm:$0xff] }
 0x4ab   : > { %2722 = vmatpush1.bf16.msra.mxu1 %v2721_v23  ;;  %v2675_v23 = vpack.c.bf16 %v1910_v33, %v1906_v0  ;;  %v2138_v0 = vld [vmem:[#allocation7 + $0xb8] sm:$0xff] }
 0x4ac   : > { %2724 = vmatprep.subr.bf16.mxu1 %v2723_v59 }
 0x4ad   : > { %2658 = vmatpush1.bf16.msra.mxu0 %v2657_v16  ;;  %v2737_v16 = vpack.c.bf16 %v1903_v55, %v1899_v28  ;;  %v2133_v28 = vld [vmem:[#allocation7 + $0x90] sm:$0xff]  ;;  %v2136_v55 = vld [vmem:[#allocation7 + $0xa8] sm:$0xff] }
 0x4ae   : > { %2660 = vmatprep.subr.bf16.mxu0 %v2659_v6  ;;  %v2118_v6 = vld [vmem:[#allocation7 + $0x18] sm:$0xff] }
 0x4af   : > { %2726 = vmatpush1.bf16.msra.mxu1 %v2725_v32  ;;  %v2743_v46 = vpack.c.bf16 %v2118_v6, %v2116_v61  ;;  %v2143_v6 = vld [vmem:[#allocation7 + $0xe0] sm:$0xff] }
 0x4b0   : > { %2728 = vmatprep.subr.bf16.mxu1 %v2727_v17  ;;  %v2115_v17 = vld [vmem:[#allocation7] sm:$0xff] }
 0x4b1   : > { %2662 = vmatpush1.bf16.msra.mxu0 %v2661_v7  ;;  %v1721_v7 = vld [vmem:[%s4580_s7] sm:$0x3] }
 0x4b2   : > { %2664 = vmatprep.subr.bf16.mxu0 %v2663_v4  ;;  %v1743_v50 = vrot.slane %v1721_v7, %v3508_v18  ;;  %v1747_v12 = vrot.slane %v1721_v7, %v3519_v27 }
 0x4b3   : > { %2730 = vmatpush1.bf16.msra.mxu1 %v2729_v14  ;;  %v2745_v14 = vpack.c.bf16 %v2117_v51, %v2115_v17  ;;  %v2156_v17 = vld [vmem:[#allocation7 + $0x148] sm:$0xff] }
 0x4b4   : > { %2732 = vmatprep.subr.bf16.mxu1 %v2731_v49 }
 0x4b5   : > { %2666 = vmatpush1.bf16.msra.mxu0 %v2665_v13  ;;  %v2120_v13 = vld [vmem:[#allocation7 + $0x28] sm:$0xff] }
 0x4b6   : > { %2668 = vmatprep.subr.bf16.mxu0 %v2667_v39  ;;  %v2747_v39 = vpack.c.bf16 %v2122_v29, %v2120_v13  ;;  %v2157_v13 = vld [vmem:[#allocation7 + $0x150] sm:$0xff] }
 0x4b7   : > { %2734 = vmatpush1.bf16.msra.mxu1 %v2733_v63  ;;  %v2129_v63 = vld [vmem:[#allocation7 + $0x70] sm:$0xff] }
 0x4b8   : > { %2736 = vmatprep.subr.bf16.mxu1 %v2735_v60  ;;  %v2757_v31 = vpack.c.bf16 %v2129_v63, %v2127_v15  ;;  %v2131_v60 = vld [vmem:[#allocation7 + $0x80] sm:$0xff]  ;;  %v2169_v63 = vld [vmem:[#allocation7 + $0x1b0] sm:$0xff] }
 0x4b9   : > { %2670 = vmatpush1.bf16.msra.mxu0 %v2669_v48  ;;  %v2130_v48 = vld [vmem:[#allocation7 + $0x78] sm:$0xff]  ;;  %v2761_v33 = vpack.c.bf16 %v2133_v28, %v2131_v60  ;;  %v2167_v15 = vld [vmem:[#allocation7 + $0x1a0] sm:$0xff]  ;;  %v2173_v28 = vld [vmem:[#allocation7 + $0x1d0] sm:$0xff] }
 0x4ba   : > { %2672 = vmatprep.subr.bf16.mxu0 %v2671_v36  ;;  %v2755_v8 = vpack.c.bf16 %v2130_v48, %v2128_v54  ;;  %v2132_v36 = vld [vmem:[#allocation7 + $0x88] sm:$0xff]  ;;  %v2170_v48 = vld [vmem:[#allocation7 + $0x1b8] sm:$0xff]  ;;  %v2171_v60 = vld [vmem:[#allocation7 + $0x1c0] sm:$0xff] }
 0x4bb   : > { %2738 = vmatpush1.bf16.msra.mxu1 %v2737_v16  ;;  %v2759_v58 = vpack.c.bf16 %v2134_v25, %v2132_v36  ;;  %v2140_v16 = vld [vmem:[#allocation7 + $0xc8] sm:$0xff]  ;;  %v2174_v25 = vld [vmem:[#allocation7 + $0x1d8] sm:$0xff] }
 0x4bc   : > { %v2168_v54 = vld [vmem:[#allocation7 + $0x1a8] sm:$0xff] }
 0x4bd   : > { %2674 = vmatpush1.bf16.msra.mxu0 %v2673_v45  ;;  %v2137_v45 = vld [vmem:[#allocation7 + $0xb0] sm:$0xff]  ;;  %v2172_v36 = vld [vmem:[#allocation7 + $0x1c8] sm:$0xff] }
 0x4be   : > { %2676 = vmatprep.subr.bf16.mxu0 %v2675_v23  ;;  %v2142_v23 = vld [vmem:[#allocation7 + $0xd8] sm:$0xff] }
 0x522   : > { %v1725_v41 = vpop.xlane.xlu0 %1724 }
 0x523   : > { %v1726_v19 = vmul.f32 0.00390625, %v1725_v41  ;;  %v1905_v41 = vld [vmem:[#allocation4 + $0x3c0] sm:$0xff] }
 0x525   : > { %v4470_v30 = vsub.f32 %v4463_v42, %v1726_v19  ;;  %v4473_v38 = vsub.f32 %v4465_v62, %v1726_v19  ;;  %v1909_v19 = vld [vmem:[#allocation4 + $0x3e0] sm:$0xff] }
 0x526   : > { %v2677_v20 = vpack.c.bf16 %v1909_v19, %v1905_v41  ;;  %v2767_v19 = vpack.c.bf16 %v2142_v23, %v2140_v16  ;;  %v2180_v16 = vld [vmem:[#allocation7 + $0x208] sm:$0xff]  ;;  %v2182_v23 = vld [vmem:[#allocation7 + $0x218] sm:$0xff] }
 0x527   : > { %v1729_v52 = vmul.f32 %v4470_v30, %v4470_v30  ;;  %v1730_v24 = vmul.f32 %v4473_v38, %v4473_v38 }
 0x528   : > { %2678 = vmatpush1.bf16.msra.mxu0 %v2677_v20  ;;  %v2146_v20 = vld [vmem:[#allocation7 + $0xf8] sm:$0xff] }
 0x529   : > { %v1731_v21 = vadd.f32 %v1730_v24, %v1729_v52  ;;  %v2739_v52 = vpack.c.bf16 %v1912_v22, %v1908_v47  ;;  %v1907_v24 = vld [vmem:[#allocation4 + $0x3d0] sm:$0xff]  ;;  %2744 = vmatprep.subr.bf16.mxu0 %v2743_v46  ;;  %v2763_v47 = vpack.c.bf16 %v2138_v0, %v2136_v55  ;;  %v2135_v22 = vld [vmem:[#allocation7 + $0xa0] sm:$0xff]  ;;  %v2176_v55 = vld [vmem:[#allocation7 + $0x1e8] sm:$0xff] }
 0x52a   : > { %v2765_v41 = vpack.c.bf16 %v2137_v45, %v2135_v22  ;;  %v2145_v46 = vld [vmem:[#allocation7 + $0xf0] sm:$0xff]  ;;  %v2178_v0 = vld [vmem:[#allocation7 + $0x1f8] sm:$0xff]  ;;  %v2175_v22 = vld [vmem:[#allocation7 + $0x1e0] sm:$0xff] }
 0x52b   : > { %1732 = vadd.xlane.f32.xlu1 %v1731_v21  ;;  %v1911_v21 = vld [vmem:[#allocation4 + $0x3f0] sm:$0xff]  ;;  %2740 = vmatprep.subr.bf16.mxu1 %v2739_v52  ;;  %v2139_v52 = vld [vmem:[#allocation7 + $0xc0] sm:$0xff] }
 0x52c   : > { %v2741_v57 = vpack.c.bf16 %v1911_v21, %v1907_v24  ;;  %v2141_v24 = vld [vmem:[#allocation7 + $0xd0] sm:$0xff]  ;;  %v2144_v21 = vld [vmem:[#allocation7 + $0xe8] sm:$0xff] }
 0x52d   : > { %v2771_v61 = vpack.c.bf16 %v2146_v20, %v2144_v21  ;;  %v2177_v45 = vld [vmem:[#allocation7 + $0x1f0] sm:$0xff] }
 0x52e   : > { %2742 = vmatpush1.bf16.msra.mxu1 %v2741_v57  ;;  %v2769_v57 = vpack.c.bf16 %v2141_v24, %v2139_v52  ;;  %v4494_v52 = vld [vmem:[%s4583_s10] sm:$0xf] }
 0x52f   : > { %v4622_v24 = vld [vmem:[#allocation21_spill] sm:$0xff]  ;;  %v1918_v20 = vrot.slane %v4494_v52, %v3508_v18 }
 0x530   : > { %v1929_v21 = vsub.s32 3, %v4622_v24 }
 0x5b8   : > { %v1733_v10 = vpop.xlane.xlu1 %1732 }
 0x5b9   : > { %v1734_v56 = vmul.f32 0.00390625, %v1733_v10  ;;  %v2148_v10 = vld [vmem:[#allocation7 + $0x108] sm:$0xff] }
 0x5bb   : > { %v1735_v59 = vadd.f32 1e-05, %v1734_v56  ;;  %v2150_v56 = vld [vmem:[#allocation7 + $0x118] sm:$0xff] }
 0x5bc   : > { %v2775_v7 = vpack.c.bf16 %v2150_v56, %v2148_v10 }
 0x5bd   : > { %3124 = vrsqrt.f32 %v1735_v59  ;;  %v2773_v59 = vpack.c.bf16 %v2145_v46, %v2143_v6 }
 0x5c7   : > { %v3125_v32 = vpop.eup %3124 }
 0x5c8   : > { %v1738_v53 = vmul.f32 %v3125_v32, %v4473_v38  ;;  %v1737_v4 = vmul.f32 %v3125_v32, %v4470_v30  ;;  %v2124_v38 = vld [vmem:[#allocation7 + $0x48] sm:$0xff]  ;;  %v2749_v30 = vpack.c.bf16 %v2121_v44, %v2119_v11  ;;  %v2159_v11 = vld [vmem:[#allocation7 + $0x160] sm:$0xff]  ;;  %v2161_v44 = vld [vmem:[#allocation7 + $0x170] sm:$0xff] }
 0x5c9   : > { %v2751_v49 = vpack.c.bf16 %v2126_v40, %v2124_v38  ;;  %v2152_v32 = vld [vmem:[#allocation7 + $0x128] sm:$0xff]  ;;  %v2166_v40 = vld [vmem:[#allocation7 + $0x198] sm:$0xff] }
 0x5ca   : > { %v1751_v26 = vmul.f32 %v1747_v12, %v1738_v53  ;;  %v1750_v43 = vmul.f32 %v1743_v50, %v1737_v4  ;;  %v2149_v50 = vld [vmem:[#allocation7 + $0x110] sm:$0xff]  ;;  %v2154_v53 = vld [vmem:[#allocation7 + $0x138] sm:$0xff]  ;;  %v2164_v38 = vld [vmem:[#allocation7 + $0x188] sm:$0xff] }
 0x5cb   : > { %v2777_v12 = vpack.c.bf16 %v2149_v50, %v2147_v5  ;;  %v2153_v4 = vld [vmem:[#allocation7 + $0x130] sm:$0xff] }
 0x5cc   : > { %v1764_v3 = vadd.f32 %v1760_v34, %v1751_v26  ;;  %v1763_v9 = vadd.f32 %v1756_v37, %v1750_v43  ;;  %v2779_v37 = vpack.c.bf16 %v2154_v53, %v2152_v32  ;;  %v2151_v34 = vld [vmem:[#allocation7 + $0x120] sm:$0xff]  ;;  %v2158_v26 = vld [vmem:[#allocation7 + $0x158] sm:$0xff] }
 0x5cd   : > { %v2781_v51 = vpack.c.bf16 %v2153_v4, %v2151_v34  ;;  %v2155_v43 = vld [vmem:[#allocation7 + $0x140] sm:$0xff]  ;;  %v2783_v29 = vpack.c.bf16 %v2158_v26, %v2156_v17 }
 0x5ce   : > { %1999 = vmatprep.mubr.f32.mxu0 %v1764_v3  ;;  %2070 = vmatprep.mubr.f32.mxu1 %v1764_v3  ;;  %v2160_v3 = vld [vmem:[#allocation7 + $0x168] sm:$0xff] }
 0x5cf   : > { %2000 = vmatmul.mubr.f32.vlgmr.msra.gmra.mrb[0].mxu0 %v1763_v9  ;;  %2071 = vmatmul.mubr.f32.vlgmr.msra.gmra.mrb[66].mxu1 %v1763_v9  ;;  %v2162_v9 = vld [vmem:[#allocation7 + $0x178] sm:$0xff] }
 0x5d0   : > { %2746 = vmatpush1.bf16.msra.mxu0 %v2745_v14  ;;  %v2785_v14 = vpack.c.bf16 %v2157_v13, %v2155_v43 }
 0x5d1   : > { %2748 = vmatprep.subr.bf16.mxu0 %v2747_v39  ;;  %v2787_v39 = vpack.c.bf16 %v2162_v9, %v2160_v3 }
 0x5d4   : > { %2750 = vmatpush1.bf16.msra.mxu0 %v2749_v30  ;;  %v2789_v30 = vpack.c.bf16 %v2161_v44, %v2159_v11  ;;  %v2179_v44 = vld [vmem:[#allocation7 + $0x200] sm:$0xff] }
 0x5d5   : > { %2752 = vmatprep.subr.bf16.mxu0 %v2751_v49  ;;  %v2791_v49 = vpack.c.bf16 %v2166_v40, %v2164_v38  ;;  %v2181_v38 = vld [vmem:[#allocation7 + $0x210] sm:$0xff] }
 0x5d8   : > { %2754 = vmatpush1.bf16.msra.mxu0 %v2753_v35  ;;  %v2793_v35 = vpack.c.bf16 %v2165_v2, %v2163_v1  ;;  %v2184_v1 = vld [vmem:[#allocation7 + $0x228] sm:$0xff]  ;;  %v2186_v2 = vld [vmem:[#allocation7 + $0x238] sm:$0xff] }
 0x5d9   : > { %2756 = vmatprep.subr.bf16.mxu0 %v2755_v8  ;;  %v2795_v8 = vpack.c.bf16 %v2170_v48, %v2168_v54 }
 0x5dc   : > { %2758 = vmatpush1.bf16.msra.mxu0 %v2757_v31  ;;  %v2797_v31 = vpack.c.bf16 %v2169_v63, %v2167_v15 }
 0x5dd   : > { %2760 = vmatprep.subr.bf16.mxu0 %v2759_v58  ;;  %v2799_v58 = vpack.c.bf16 %v2174_v25, %v2172_v36  ;;  %v2811_v36 = vpack.c.bf16 %v2186_v2, %v2184_v1  ;;  %v2183_v25 = vld [vmem:[#allocation7 + $0x220] sm:$0xff]  ;;  %v2218_v1 = vld [vmem:[#allocation7 + $0x338] sm:$0xff] }
 0x5e0   : > { %2762 = vmatpush1.bf16.msra.mxu0 %v2761_v33  ;;  %v2801_v33 = vpack.c.bf16 %v2173_v28, %v2171_v60  ;;  %v2188_v60 = vld [vmem:[#allocation7 + $0x248] sm:$0xff]  ;;  %v2190_v28 = vld [vmem:[#allocation7 + $0x258] sm:$0xff] }
 0x5e1   : > { %2764 = vmatprep.subr.bf16.mxu0 %v2763_v47  ;;  %v2803_v47 = vpack.c.bf16 %v2178_v0, %v2176_v55  ;;  %v2815_v0 = vpack.c.bf16 %v2190_v28, %v2188_v60  ;;  %v2224_v60 = vld [vmem:[#allocation7 + $0x368] sm:$0xff]  ;;  %v2226_v28 = vld [vmem:[#allocation7 + $0x378] sm:$0xff] }
 0x5e4   : > { %2766 = vmatpush1.bf16.msra.mxu0 %v2765_v41  ;;  %v2805_v41 = vpack.c.bf16 %v2177_v45, %v2175_v22  ;;  %v2192_v22 = vld [vmem:[#allocation7 + $0x268] sm:$0xff]  ;;  %v2194_v45 = vld [vmem:[#allocation7 + $0x278] sm:$0xff] }
 0x5e5   : > { %2768 = vmatprep.subr.bf16.mxu0 %v2767_v19  ;;  %v2807_v19 = vpack.c.bf16 %v2182_v23, %v2180_v16  ;;  %v2819_v23 = vpack.c.bf16 %v2194_v45, %v2192_v22  ;;  %v2225_v22 = vld [vmem:[#allocation7 + $0x370] sm:$0xff]  ;;  %v2228_v45 = vld [vmem:[#allocation7 + $0x388] sm:$0xff] }
 0x5e8   : > { %2770 = vmatpush1.bf16.msra.mxu0 %v2769_v57  ;;  %v1922_v57 = vrot.slane %v4494_v52, %v3519_v27 }
 0x5e9   : > { %2772 = vmatprep.subr.bf16.mxu0 %v2771_v61  ;;  %v1930_v61 = vrot.slane %v4494_v52, %v1929_v21  ;;  %v2196_v21 = vld [vmem:[#allocation7 + $0x288] sm:$0xff] }
 0x5ec   : > { %2774 = vmatpush1.bf16.msra.mxu0 %v2773_v59 }
 0x5ed   : > { %2776 = vmatprep.subr.bf16.mxu0 %v2775_v7 }
 0x5f0   : > { %2778 = vmatpush1.bf16.msra.mxu0 %v2777_v12 }
 0x5f1   : > { %2780 = vmatprep.subr.bf16.mxu0 %v2779_v37 }
 0x5f4   : > { %2782 = vmatpush1.bf16.msra.mxu0 %v2781_v51 }
 0x5f5   : > { %2784 = vmatprep.subr.bf16.mxu0 %v2783_v29 }
 0x5f8   : > { %2786 = vmatpush1.bf16.msra.mxu0 %v2785_v14 }
 0x5f9   : > { %2788 = vmatprep.subr.bf16.mxu0 %v2787_v39 }
 0x5fc   : > { %2790 = vmatpush1.bf16.msra.mxu0 %v2789_v30 }
 0x5fd   : > { %2792 = vmatprep.subr.bf16.mxu0 %v2791_v49 }
 0x600   : > { %2794 = vmatpush1.bf16.msra.mxu0 %v2793_v35 }
 0x601   : > { %2796 = vmatprep.subr.bf16.mxu0 %v2795_v8  ;;  %v2809_v8 = vpack.c.bf16 %v2181_v38, %v2179_v44 }
 0x604   : > { %2798 = vmatpush1.bf16.msra.mxu0 %v2797_v31  ;;  %v2185_v31 = vld [vmem:[#allocation7 + $0x230] sm:$0xff] }
 0x605   : > { %2800 = vmatprep.subr.bf16.mxu0 %v2799_v58  ;;  %v2813_v55 = vpack.c.bf16 %v2185_v31, %v2183_v25  ;;  %v2219_v31 = vld [vmem:[#allocation7 + $0x340] sm:$0xff] }
 0x608   : > { %2802 = vmatpush1.bf16.msra.mxu0 %v2801_v33  ;;  %v2187_v33 = vld [vmem:[#allocation7 + $0x240] sm:$0xff] }
 0x609   : > { %2804 = vmatprep.subr.bf16.mxu0 %v2803_v47  ;;  %v2189_v47 = vld [vmem:[#allocation7 + $0x250] sm:$0xff] }
 0x60a   : > { %v2817_v16 = vpack.c.bf16 %v2189_v47, %v2187_v33  ;;  %v2851_v33 = vpack.c.bf16 %v2226_v28, %v2224_v60  ;;  %v2223_v47 = vld [vmem:[#allocation7 + $0x360] sm:$0xff] }
 0x60c   : > { %2806 = vmatpush1.bf16.msra.mxu0 %v2805_v41  ;;  %v2191_v41 = vld [vmem:[#allocation7 + $0x260] sm:$0xff] }
 0x60d   : > { %2808 = vmatprep.subr.bf16.mxu0 %v2807_v19  ;;  %v2193_v19 = vld [vmem:[#allocation7 + $0x270] sm:$0xff] }
 0x6a2   : > { %v2001_v6 = vpop.f32.mrb[0].mxu0  ;;  %v4502_v46 = vpop.f32.mrb[66].mxu1 }
 0x6a3   : > { %v2002_v10 = vadd.f32 %v2001_v6, %v1918_v20  ;;  %v2003_v56 = vpop.f32.mrb[1].mxu0  ;;  %v2074_v59 = vpop.f32.mrb[67].mxu1  ;;  %v2198_v20 = vld [vmem:[#allocation7 + $0x298] sm:$0xff]  ;;  %v2195_v6 = vld [vmem:[#allocation7 + $0x280] sm:$0xff] }
 0x6a4   : > { %v2004_v7 = vadd.f32 %v2003_v56, %v1922_v57  ;;  %v2075_v5 = vadd.f32 %v2074_v59, %v1930_v61  ;;  %v2821_v57 = vpack.c.bf16 %v2193_v19, %v2191_v41  ;;  %v2823_v61 = vpack.c.bf16 %v2198_v20, %v2196_v21  ;;  %v2200_v56 = vld [vmem:[#allocation7 + $0x2a8] sm:$0xff]  ;;  %v2202_v59 = vld [vmem:[#allocation7 + $0x2b8] sm:$0xff]  ;;  %v2227_v21 = vld [vmem:[#allocation7 + $0x380] sm:$0xff] }
 0x6a5   : > { %v2081_v50 = vmul.f32 0.044715, %v2002_v10  ;;  %v2077_v54 = vmul.f32 0.5, %v2002_v10  ;;  %v2229_v20 = vld [vmem:[#allocation7 + $0x390] sm:$0xff] }
 0x6a6   : > { %v2082_v12 = vmul.f32 0.044715, %v2004_v7  ;;  %v2084_v32 = vmul.f32 0.044715, %v2075_v5  ;;  %v2078_v30 = vmul.f32 0.5, %v2004_v7  ;;  %v2080_v15 = vmul.f32 0.5, %v2075_v5 }
 0x6a7   : > { %v2085_v53 = vmul.f32 %v2081_v50, %v2002_v10  ;;  %v2827_v50 = vpack.c.bf16 %v2202_v59, %v2200_v56  ;;  %v2231_v56 = vld [vmem:[#allocation7 + $0x3a0] sm:$0xff]  ;;  %v2233_v59 = vld [vmem:[#allocation7 + $0x3b0] sm:$0xff] }
 0x6a8   : > { %v2086_v37 = vmul.f32 %v2082_v12, %v2004_v7  ;;  %v2088_v34 = vmul.f32 %v2084_v32, %v2075_v5  ;;  %v2199_v12 = vld [vmem:[#allocation7 + $0x2a0] sm:$0xff]  ;;  %v2201_v32 = vld [vmem:[#allocation7 + $0x2b0] sm:$0xff] }
 0x6a9   : > { %v2089_v4 = vmul.f32 %v2085_v53, %v2002_v10  ;;  %v2204_v53 = vld [vmem:[#allocation7 + $0x2c8] sm:$0xff] }
 0x6aa   : > { %v2090_v17 = vmul.f32 %v2086_v37, %v2004_v7  ;;  %v2092_v51 = vmul.f32 %v2088_v34, %v2075_v5  ;;  %v2206_v37 = vld [vmem:[#allocation7 + $0x2d8] sm:$0xff] }
 0x6ab   : > { %v2093_v26 = vadd.f32 %v2089_v4, %v2002_v10  ;;  %v2197_v10 = vld [vmem:[#allocation7 + $0x290] sm:$0xff]  ;;  %v2829_v4 = vpack.c.bf16 %v2201_v32, %v2199_v12  ;;  %v2235_v32 = vld [vmem:[#allocation7 + $0x3c0] sm:$0xff] }
 0x6ac   : > { %v2094_v43 = vadd.f32 %v2090_v17, %v2004_v7  ;;  %v2096_v13 = vadd.f32 %v2092_v51, %v2075_v5  ;;  %v1925_v7 = vsub.s32 2, %v4622_v24  ;;  %v2825_v5 = vpack.c.bf16 %v2197_v10, %v2195_v6  ;;  %v2203_v51 = vld [vmem:[#allocation7 + $0x2c0] sm:$0xff] }
 0x6ad   : > { %v2097_v29 = vmul.f32 0.7978846, %v2093_v26  ;;  %v2831_v17 = vpack.c.bf16 %v2206_v37, %v2204_v53  ;;  %v2205_v26 = vld [vmem:[#allocation7 + $0x2d0] sm:$0xff]  ;;  %v2857_v6 = vpack.c.bf16 %v2229_v20, %v2227_v21  ;;  %v2240_v37 = vld [vmem:[#allocation7 + $0x3e8] sm:$0xff] }
 0x6ae   : > { %v2098_v3 = vmul.f32 0.7978846, %v2094_v43  ;;  %v2100_v9 = vmul.f32 0.7978846, %v2096_v13  ;;  %v1926_v34 = vrot.slane %v4494_v52, %v1925_v7  ;;  %v2208_v43 = vld [vmem:[#allocation7 + $0x2e8] sm:$0xff]  ;;  %v2210_v13 = vld [vmem:[#allocation7 + $0x2f8] sm:$0xff] }
 0x6af   : > { %3126 = vtanh.f32 %v2097_v29  ;;  %v2833_v29 = vpack.c.bf16 %v2205_v26, %v2203_v51  ;;  %v2236_v7 = vld [vmem:[#allocation7 + $0x3c8] sm:$0xff]  ;;  %v2237_v53 = vld [vmem:[#allocation7 + $0x3d0] sm:$0xff]  ;;  %v2239_v51 = vld [vmem:[#allocation7 + $0x3e0] sm:$0xff] }
 0x6b0   : > { %3128 = vtanh.f32 %v2098_v3  ;;  %v4507_v24 = vadd.f32 %v4502_v46, %v1926_v34  ;;  %v2835_v3 = vpack.c.bf16 %v2210_v13, %v2208_v43  ;;  %v2242_v34 = vld [vmem:[#allocation7 + $0x3f8] sm:$0xff]  ;;  %v2241_v26 = vld [vmem:[#allocation7 + $0x3f0] sm:$0xff] }
 0x6b1   : > { %3130 = vtanh.f32 %v2100_v9  ;;  %v2207_v9 = vld [vmem:[#allocation7 + $0x2e0] sm:$0xff]  ;;  %v2869_v13 = vpack.c.bf16 %v2241_v26, %v2239_v51 }
 0x6b2   : > { %v2083_v52 = vmul.f32 0.044715, %v4507_v24 }
 0x6b4   : > { %v2087_v46 = vmul.f32 %v2083_v52, %v4507_v24 }
 0x6b9   : > { %v3127_v14 = vpop.eup %3126 }
 0x6ba   : > { %v3129_v39 = vpop.eup %3128  ;;  %v2105_v11 = vadd.f32 1.0, %v3127_v14  ;;  %v2209_v14 = vld [vmem:[#allocation7 + $0x2f0] sm:$0xff] }
 0x6bb   : > { %v3131_v40 = vpop.eup %3130  ;;  %v2106_v49 = vadd.f32 1.0, %v3129_v39  ;;  %v2212_v39 = vld [vmem:[#allocation7 + $0x308] sm:$0xff]  ;;  %v2837_v44 = vpack.c.bf16 %v2209_v14, %v2207_v9  ;;  %v1767_v14 = vld [vmem:[%s4585_s12] sm:$0x3] }
 0x6bc   : > { %v2108_v48 = vadd.f32 1.0, %v3131_v40  ;;  %v2109_v63 = vmul.f32 %v2105_v11, %v2077_v54  ;;  %v2214_v11 = vld [vmem:[#allocation7 + $0x318] sm:$0xff]  ;;  %v2211_v40 = vld [vmem:[#allocation7 + $0x300] sm:$0xff] }
 0x6bd   : > { %v2110_v35 = vmul.f32 %v2106_v49, %v2078_v30  ;;  %v2839_v38 = vpack.c.bf16 %v2214_v11, %v2212_v39  ;;  %v2213_v30 = vld [vmem:[#allocation7 + $0x310] sm:$0xff]  ;;  %v2216_v49 = vld [vmem:[#allocation7 + $0x328] sm:$0xff]  ;;  %v1772_v39 = vrot.slane %v1767_v14, %v3508_v18  ;;  %v1776_v11 = vrot.slane %v1767_v14, %v3519_v27 }
 0x6be   : > { %v2112_v58 = vmul.f32 %v2108_v48, %v2080_v15  ;;  %v2841_v2 = vpack.c.bf16 %v2213_v30, %v2211_v40  ;;  %v2843_v54 = vpack.c.bf16 %v2218_v1, %v2216_v49  ;;  %v2215_v48 = vld [vmem:[#allocation7 + $0x320] sm:$0xff]  ;;  %v2222_v15 = vld [vmem:[#allocation7 + $0x358] sm:$0xff] }
 0x6bf   : > { %2307 = vmatprep.mubr.f32.mxu0 %v2110_v35  ;;  %v2217_v35 = vld [vmem:[#allocation7 + $0x330] sm:$0xff]  ;;  %v1779_v52 = vadd.f32 %v1772_v39, %v4463_v42 }
 0x6c0   : > { %2308 = vmatmul.mubr.f32.vlgmr.msra.gmra.mrb[2].mxu0 %v2109_v63  ;;  %v2091_v63 = vmul.f32 %v2087_v46, %v4507_v24 }
 0x6c1   : > { %2810 = vmatpush1.bf16.msra.mxu0 %v2809_v8  ;;  %2378 = vmatprep.mubr.f32.mxu0 %v2112_v58  ;;  %v2220_v8 = vld [vmem:[#allocation7 + $0x348] sm:$0xff]  ;;  %v2221_v58 = vld [vmem:[#allocation7 + $0x350] sm:$0xff] }
 0x6c2   : > { %2812 = vmatprep.subr.bf16.mxu0 %v2811_v36  ;;  %v2845_v36 = vpack.c.bf16 %v2217_v35, %v2215_v48  ;;  %v2847_v25 = vpack.c.bf16 %v2222_v15, %v2220_v8 }
 0x6c5   : > { %2814 = vmatpush1.bf16.msra.mxu0 %v2813_v55  ;;  %v2095_v55 = vadd.f32 %v2091_v63, %v4507_v24 }
 0x6c6   : > { %2816 = vmatprep.subr.bf16.mxu0 %v2815_v0  ;;  %v2849_v0 = vpack.c.bf16 %v2221_v58, %v2219_v31 }
 0x6c7   : > { %v2099_v41 = vmul.f32 0.7978846, %v2095_v55 }
 0x6c9   : > { %2818 = vmatpush1.bf16.msra.mxu0 %v2817_v16  ;;  %v2230_v16 = vld [vmem:[#allocation7 + $0x398] sm:$0xff]  ;;  %3132 = vtanh.f32 %v2099_v41 }
 0x6ca   : > { %2820 = vmatprep.subr.bf16.mxu0 %v2819_v23  ;;  %v2853_v23 = vpack.c.bf16 %v2225_v22, %v2223_v47  ;;  %v2855_v19 = vpack.c.bf16 %v2230_v16, %v2228_v45 }
 0x6cd   : > { %2822 = vmatpush1.bf16.msra.mxu0 %v2821_v57  ;;  %v2232_v57 = vld [vmem:[#allocation7 + $0x3a8] sm:$0xff] }
 0x6ce   : > { %2824 = vmatprep.subr.bf16.mxu0 %v2823_v61  ;;  %v2234_v61 = vld [vmem:[#allocation7 + $0x3b8] sm:$0xff] }
 0x6cf   : > { %v2859_v10 = vpack.c.bf16 %v2234_v61, %v2232_v57 }
 0x6d1   : > { %2826 = vmatpush1.bf16.msra.mxu0 %v2825_v5  ;;  %v2238_v5 = vld [vmem:[#allocation7 + $0x3d8] sm:$0xff] }
 0x6d2   : > { %2828 = vmatprep.subr.bf16.mxu0 %v2827_v50  ;;  %v2861_v50 = vpack.c.bf16 %v2233_v59, %v2231_v56  ;;  %v2863_v12 = vpack.c.bf16 %v2238_v5, %v2236_v7 }
 0x6d3   : > { %v3133_v43 = vpop.eup %3132 }
 0x6d5   : > { %2830 = vmatpush1.bf16.msra.mxu0 %v2829_v4  ;;  %v2865_v4 = vpack.c.bf16 %v2237_v53, %v2235_v32 }
 0x6d6   : > { %2832 = vmatprep.subr.bf16.mxu0 %v2831_v17  ;;  %v2867_v17 = vpack.c.bf16 %v2242_v34, %v2240_v37 }
 0x6d9   : > { %2834 = vmatpush1.bf16.msra.mxu0 %v2833_v29  ;;  %v2107_v29 = vadd.f32 1.0, %v3133_v43 }
 0x6da   : > { %2836 = vmatprep.subr.bf16.mxu0 %v2835_v3  ;;  %v2079_v3 = vmul.f32 0.5, %v4507_v24 }
 0x6dc   : > { %v2111_v9 = vmul.f32 %v2107_v29, %v2079_v3 }
 0x6dd   : > { %2838 = vmatpush1.bf16.msra.mxu0 %v2837_v44  ;;  %v1780_v44 = vadd.f32 %v1776_v11, %v4465_v62 }
 0x6de   : > { %2840 = vmatprep.subr.bf16.mxu0 %v2839_v38 }
 0x6e1   : > { %2842 = vmatpush1.bf16.msra.mxu0 %v2841_v2 }
 0x6e2   : > { %2844 = vmatprep.subr.bf16.mxu0 %v2843_v54 }
 0x6e5   : > { %2846 = vmatpush1.bf16.msra.mxu0 %v2845_v36 }
 0x6e6   : > { %2848 = vmatprep.subr.bf16.mxu0 %v2847_v25 }
 0x6e9   : > { %2850 = vmatpush1.bf16.msra.mxu0 %v2849_v0 }
 0x6ea   : > { %2852 = vmatprep.subr.bf16.mxu0 %v2851_v33 }
 0x6ed   : > { %2854 = vmatpush1.bf16.msra.mxu0 %v2853_v23 }
 0x6ee   : > { %2856 = vmatprep.subr.bf16.mxu0 %v2855_v19 }
 0x6f1   : > { %2858 = vmatpush1.bf16.msra.mxu0 %v2857_v6 }
 0x6f2   : > { %2860 = vmatprep.subr.bf16.mxu0 %v2859_v10 }
 0x6f5   : > { %2862 = vmatpush1.bf16.msra.mxu0 %v2861_v50 }
 0x6f6   : > { %2864 = vmatprep.subr.bf16.mxu0 %v2863_v12 }
 0x6f9   : > { %2866 = vmatpush1.bf16.msra.mxu0 %v2865_v4 }
 0x6fa   : > { %2868 = vmatprep.subr.bf16.mxu0 %v2867_v17 }
 0x6fd   : > { %2870 = vmatpush1.bf16.msra.mxu0 %v2869_v13 }
 0x700   : > { %2379 = vmatmul.mubr.f32.vlgmr.msra.gmra.mrb[2].mxu0 %v2111_v9 }
 0x7d3   : > { %v2380_v24 = vpop.f32.mrb[2].mxu0 }
 0x7d4   : > { %v2385_v38 = vadd.f32 %v2380_v24, %v1779_v52  ;;  %v2382_v40 = vpop.f32.mrb[3].mxu0 }
 0x7d5   : > { %v2386_v30 = vadd.f32 %v2382_v40, %v1780_v44 }
 0x7d6   : > { %2394 = vst [vmem:[%s475_s16] sm:$0xff] %v2385_v38 }
 0x7d7   : > { %2395 = vst [vmem:[%s475_s16 + $0x8] sm:$0xff] %v2386_v30 }
 0x7d8   : > { %3205 = shalt.err (!%p3202_p6)
}
 0x7d9   : > { %s3206_s15 = scalar_lea.hbm %s4526_s21, 256  ;;  %s3210_s19 = scalar_lea.hbm %s4625_s20, 1024 }
 0x7da   : > { %p3207_p7 = scmp.ne.s32.totalorder %s4526_s21, %s3206_s15  ;;  %p3211_p0 = scmp.lt.u32.totalorder %s4526_s21, %s4625_s20 }
 0x7db   : > { %p3212_p1 = scmp.lt.u32.totalorder %s3210_s19, %s3206_s15  ;;  %p3214_p13 = scmp.lt.u32.totalorder %s3206_s15, %s4526_s21 }
 0x7dc   : > { %p3208_p9 = pnand %p3207_p7, %p4626_p8 }
 0x7dd   : > { %p3213_p4 = por %p3212_p1, %p3211_p0 }
 0x7de   : > { %p3209_p12 = pneg %p3208_p9 }
 0x7df   : > { %p3215_p10 = por %p3214_p13, %p3213_p4 }
 0x7e1   : > { %p3216_p11 = pnand %p3215_p10, %p3209_p12 }
 0x7e3   : > { %3219 = shalt.err (!%p3216_p11)
}
 0x7e4   : > { %2881 = dma.vmem_to_hbm [thread:$0]  (%p4626_p8), %s4528_s29, 256, %s4526_s21, %s2397_s28  }
 0x7e5 PF: > { %s4627_s23 = sld [smem:[#allocation16_spill]]  ;;  %s4628_s25 = sld [smem:[#allocation13_spill]] }
 0x7e6   : > { %s4629_s14 = sld [smem:[#allocation19_spill]] }
 0x7eb   : > { %p2898_p2 = scmp.ge.s32.totalorder %s4627_s23, 2  ;;  %s2423_s24 = sand.u32 1, %s4628_s25  }
 0x7ec   : > { %p4630_p3 = scmp.ne.s32.totalorder %s4629_s14, 0  ;;  %s2424_s17 = scalar_lea.sflag [#allocation6], %s2423_s24 }
 0x7ee   : > { %p2891_p5 = pnand %p2898_p2, %p4630_p3 }
 0x7f0   : > { %3253 = dma.done.wait (!%p2891_p5), %s2424_s17, 256  }
 0x7f1   : > { %3255 = vsyncadd (!%p2891_p5), %s2424_s17, 4294967040  ;;  %s28_s30 = sadd.s32 1, %s4627_s23   ;;  %s4631_s13 = sld [smem:[#allocation14_spill]] }
 0x7f2   : > { %p25_p6 = scmp.ge.s32.totalorder %s28_s30, 6   ;;  %s4632_s27 = sld [smem:[#allocation20_spill]] }
 0x7f3   : > { %s4633_s28 = sld [smem:[#allocation15_spill]]  ;;  %s4634_s29 = sld [smem:[#allocation17_spill]] }
 0x7f4   : > { %s4635_s25 = smov %s3262_s26  ;;  %27 = sbr.rel (!%p25_p6) target bundleno = 8 (0x8), region = 124 }
 0x7f7   : > { %s4636_s26 = smov %s4631_s13 }
 0x7fb   :  { %2429 = vsyncpa [#allocation5], 1 }
 0x7fc   :  { %2431 = vsyncpa [#allocation5 + $0x1], 1 }
 0x7fd   :  { %2432 = vsyncpa [#allocation8], 1 }
 0x7fe   :  { %2433 = vsyncpa [#allocation6], 1 }
 0x7ff   :  { %2435 = vsyncpa [#allocation6 + $0x1], 1 }

</bundles_post_ra>
